<compile_context>
chip_gen: v6e
topology: v6e:2x2x1
jax: 0.10.0
libtpu: 0.0.40
codegen_flags: <defaults>
</compile_context>

<pallas_src>
import functools
import numpy as np

import jax
import jax.numpy as jnp
from jax.experimental import pallas as pl
from jax.experimental.pallas import tpu as pltpu

_VMEM = pl.BlockSpec(memory_space=pltpu.MemorySpace.VMEM)


# ----------------------------- fused kernel ------------------------------- #

def _make_fused_kernel(treedef, *, B, Se, St, heads, d_model, scale):
    """Builds the whole-model kernel body (closure over static config)."""
    H, D = heads, d_model

    def kernel(*refs):
        out_ref = refs[-1]
        ins = jax.tree_util.tree_unflatten(treedef, refs[:-1])

        def dense(x, w_ref, b_ref=None, relu=False):
            y = jnp.dot(x, w_ref[...], preferred_element_type=jnp.float32)
            if b_ref is not None:
                y = y + b_ref[...]
            if relu:
                y = jnp.maximum(y, 0.0)
            return y

        def softmax_last(s):
            s = s - jnp.max(s, axis=-1, keepdims=True)
            p = jnp.exp(s)
            # EUP approximate reciprocal (free slot) instead of VPU divide.
            return p * pl.reciprocal(jnp.sum(p, axis=-1, keepdims=True), approx=True)

        def mha(q2d, kv2d, pr, Sq, Sk):
            # q2d: (B*Sq, D), kv2d: (B*Sk, D). Per-head weights: (H, D, D).
            # NOTE: no 1/sqrt(d) scaling (matches the reference).
            out = None
            for h in range(H):
                q = jnp.dot(q2d, pr["wq"][h],
                            preferred_element_type=jnp.float32).reshape(B, Sq, D)
                k = jnp.dot(kv2d, pr["wk"][h],
                            preferred_element_type=jnp.float32).reshape(B, Sk, D)
                v = jnp.dot(kv2d, pr["wv"][h],
                            preferred_element_type=jnp.float32).reshape(B, Sk, D)
                s = jnp.einsum("bqd,bkd->bqk", q, k,
                               preferred_element_type=jnp.float32)
                p = softmax_last(s)
                o = jnp.einsum("bqk,bkd->bqd", p, v,
                               preferred_element_type=jnp.float32)
                # unify-heads: concat-then-matmul == sum_h o_h @ Wu[h]
                c = jnp.dot(o.reshape(B * Sq, D), pr["wu"][h],
                            preferred_element_type=jnp.float32)
                out = c if out is None else out + c
            return out + pr["bu"][...]

        def add_ln(x, res, g_ref, b_ref):
            # LayerNorm(x + residual), biased variance, eps=1e-5 (nn.LayerNorm)
            xx = x + res
            mu = jnp.mean(xx, axis=-1, keepdims=True)
            var = jnp.mean(jnp.square(xx - mu), axis=-1, keepdims=True)
            return (xx - mu) * jax.lax.rsqrt(var + 1e-5) * g_ref[...] + b_ref[...]

        def ffn(x, pr):
            h1 = dense(x, pr["w1"], pr["b1"], relu=True)
            return dense(h1, pr["w2"], pr["b2"])

        # -------- encoder --------
        ep = ins["enc"]
        enc = dense(ins["x"][...], ep["emb_w"], ep["emb_b"]) * scale + ins["pe_e"][...]
        for lp in ep["layers"]:
            a = mha(enc, enc, lp["attn"], Se, Se)
            enc = add_ln(a, enc, lp["g1"], lp["be1"])
            f = ffn(enc, lp["ff"])
            enc = add_ln(f, enc, lp["g2"], lp["be2"])

        # -------- decoder --------
        dp = ins["dec"]
        dec = dense(ins["y"][...], dp["emb_w"], dp["emb_b"]) * scale + ins["pe_d"][...]
        for lp in dp["layers"]:
            a1 = mha(dec, dec, lp["attn1"], St, St)
            dec = add_ln(a1, dec, lp["g1"], lp["be1"])
            a2 = mha(dec, enc, lp["attn2"], St, Se)
            dec = add_ln(a2, dec, lp["g2"], lp["be2"])
            f = ffn(dec, lp["ff"])
            dec = add_ln(f, dec, lp["g3"], lp["be3"])

        # -------- final map --------
        out = jnp.dot(dec, ins["map_w"][...],
                      preferred_element_type=jnp.float32) + ins["map_b"][...]
        out_ref[...] = out.astype(out_ref.dtype)

    return kernel


# ------------------------------ forward pass ------------------------------ #

def ml4f_transformer(params, x, y, *, heads, d_model):
    """x: (B, in_seq, inp_dim_e), y: (B, tar_seq, inp_dim_d) -> (B, tar_seq, 1)."""
    B, Se, De = x.shape
    _, St, Dd = y.shape
    scale = float(np.sqrt(float(d_model)))

    pe = params["pe"]
    kin = dict(
        x=x.reshape(B * Se, De).astype(jnp.float32),
        y=y.reshape(B * St, Dd).astype(jnp.float32),
        pe_e=jnp.tile(pe[:Se], (B, 1)),          # (B*Se, D)
        pe_d=jnp.tile(pe[:St], (B, 1)),          # (B*St, D)
        enc=params["enc"],
        dec=params["dec"],
        map_w=params["map_w"],
        map_b=params["map_b"],
    )
    leaves, treedef = jax.tree_util.tree_flatten(kin)
    kernel = _make_fused_kernel(treedef, B=B, Se=Se, St=St,
                                heads=heads, d_model=d_model, scale=scale)

    out2d = pl.pallas_call(
        kernel,
        out_shape=jax.ShapeDtypeStruct((B * St, 1), jnp.float32),
        in_specs=[_VMEM] * len(leaves),
        out_specs=_VMEM,
    )(*leaves)
    return out2d.reshape(B, St, 1)


# ------------------------- deterministic parameters ------------------------ #

def _dense_init(key, fan_in, fan_out, bias=True):
    kw, kb = jax.random.split(key)
    bound = 1.0 / np.sqrt(fan_in)
    w = jax.random.uniform(kw, (fan_in, fan_out), jnp.float32, -bound, bound)
    b = (jax.random.uniform(kb, (1, fan_out), jnp.float32, -bound, bound)
         if bias else None)
    return w, b


def _init_mha(key, heads, d_model):
    k1, k2, k3, k4 = jax.random.split(key, 4)
    wq, _ = _dense_init(k1, d_model, heads * d_model, bias=False)
    wk, _ = _dense_init(k2, d_model, heads * d_model, bias=False)
    wv, _ = _dense_init(k3, d_model, heads * d_model, bias=False)
    wu, bu = _dense_init(k4, heads * d_model, d_model)

    # Per-head layout used by the fused kernel:
    #   wq/wk/wv[h] = W[:, h*D:(h+1)*D]  -> (H, D, D)
    #   wu[h]       = Wu[h*D:(h+1)*D, :] -> (H, D, D)
    def split_in(w):
        return jnp.transpose(w.reshape(d_model, heads, d_model), (1, 0, 2))

    return dict(wq=split_in(wq), wk=split_in(wk), wv=split_in(wv),
                wu=wu.reshape(heads, d_model, d_model), bu=bu)


def _init_ff(key, d_model, dff):
    k1, k2 = jax.random.split(key)
    w1, b1 = _dense_init(k1, d_model, dff)
    w2, b2 = _dense_init(k2, dff, d_model)
    return dict(w1=w1, b1=b1, w2=w2, b2=b2)


def _ln_params(d_model):
    return jnp.ones((1, d_model), jnp.float32), jnp.zeros((1, d_model), jnp.float32)


def _init_enc_layer(key, heads, d_model, dff):
    k1, k2 = jax.random.split(key)
    g1, be1 = _ln_params(d_model)
    g2, be2 = _ln_params(d_model)
    return dict(attn=_init_mha(k1, heads, d_model), ff=_init_ff(k2, d_model, dff),
                g1=g1, be1=be1, g2=g2, be2=be2)


def _init_dec_layer(key, heads, d_model, dff):
    k1, k2, k3 = jax.random.split(key, 3)
    g1, be1 = _ln_params(d_model)
    g2, be2 = _ln_params(d_model)
    g3, be3 = _ln_params(d_model)
    return dict(attn1=_init_mha(k1, heads, d_model),
                attn2=_init_mha(k2, heads, d_model),
                ff=_init_ff(k3, d_model, dff),
                g1=g1, be1=be1, g2=g2, be2=be2, g3=g3, be3=be3)


def _make_pe(pe_window, d_model):
    # Exact replica of PositionalEncoding.__init__ table construction.
    pe = np.zeros((pe_window, d_model), np.float32)
    for pos in range(pe_window):
        for i in range(0, d_model, 2):
            pe[pos, i] = np.sin(pos / 10000 ** (2 * i / d_model))
        for i in range(1, d_model, 2):
            pe[pos, i] = np.cos(pos / 10000 ** (2 * (i + 1) / d_model))
    return jnp.asarray(pe)


def init_params(key, inp_dim_e, inp_dim_d, d_model, dff, N_e, N_d, heads, pe_window):
    keys = jax.random.split(key, 4 + N_e + N_d)
    enc_emb_w, enc_emb_b = _dense_init(keys[0], inp_dim_e, d_model)
    dec_emb_w, dec_emb_b = _dense_init(keys[1], inp_dim_d, d_model)
    map_w, map_b = _dense_init(keys[2], d_model, 1)
    enc_layers = [_init_enc_layer(keys[4 + i], heads, d_model, dff) for i in range(N_e)]
    dec_layers = [_init_dec_layer(keys[4 + N_e + i], heads, d_model, dff) for i in range(N_d)]
    return dict(
        pe=_make_pe(pe_window, d_model),
        enc=dict(emb_w=enc_emb_w, emb_b=enc_emb_b, layers=enc_layers),
        dec=dict(emb_w=dec_emb_w, emb_b=dec_emb_b, layers=dec_layers),
        map_w=map_w, map_b=map_b,
    )


# ----------------------------------- main ---------------------------------- #

if __name__ == "__main__":
    # Module defaults: d_model=20, dff=80, N_e=1, N_d=1, heads=4, pe_window=100
    B, Se, St = 2, 8, 8
    inp_dim_e, inp_dim_d = 5, 3
    d_model, dff, heads, N_e, N_d, pe_window = 20, 80, 4, 1, 1, 100

    root = jax.random.PRNGKey(0)
    kp, kx, ky = jax.random.split(root, 3)
    params = init_params(kp, inp_dim_e, inp_dim_d, d_model, dff, N_e, N_d,
                         heads, pe_window)

    x = jax.random.normal(kx, (B, Se, inp_dim_e), jnp.float32)
    y = jax.random.normal(ky, (B, St, inp_dim_d), jnp.float32)

    forward = jax.jit(functools.partial(ml4f_transformer,
                                        heads=heads, d_model=d_model))

    out = jax.block_until_ready(forward(params, x, y))
    assert out.shape == (B, St, 1), out.shape
    assert bool(jnp.all(jnp.isfinite(out)))
    print("KERNEL_OK")
</pallas_src>

<mosaic_0001>
module attributes {stable_mosaic.version = 11 : i64} {
  func.func @kernel(%arg0: memref<1x20xf32, #tpu.memory_space<vmem>>, %arg1: memref<3x20xf32, #tpu.memory_space<vmem>>, %arg2: memref<1x20xf32, #tpu.memory_space<vmem>>, %arg3: memref<4x20x20xf32, #tpu.memory_space<vmem>>, %arg4: memref<4x20x20xf32, #tpu.memory_space<vmem>>, %arg5: memref<4x20x20xf32, #tpu.memory_space<vmem>>, %arg6: memref<4x20x20xf32, #tpu.memory_space<vmem>>, %arg7: memref<1x20xf32, #tpu.memory_space<vmem>>, %arg8: memref<4x20x20xf32, #tpu.memory_space<vmem>>, %arg9: memref<4x20x20xf32, #tpu.memory_space<vmem>>, %arg10: memref<4x20x20xf32, #tpu.memory_space<vmem>>, %arg11: memref<4x20x20xf32, #tpu.memory_space<vmem>>, %arg12: memref<1x20xf32, #tpu.memory_space<vmem>>, %arg13: memref<1x20xf32, #tpu.memory_space<vmem>>, %arg14: memref<1x20xf32, #tpu.memory_space<vmem>>, %arg15: memref<1x80xf32, #tpu.memory_space<vmem>>, %arg16: memref<1x20xf32, #tpu.memory_space<vmem>>, %arg17: memref<20x80xf32, #tpu.memory_space<vmem>>, %arg18: memref<80x20xf32, #tpu.memory_space<vmem>>, %arg19: memref<1x20xf32, #tpu.memory_space<vmem>>, %arg20: memref<1x20xf32, #tpu.memory_space<vmem>>, %arg21: memref<1x20xf32, #tpu.memory_space<vmem>>, %arg22: memref<1x20xf32, #tpu.memory_space<vmem>>, %arg23: memref<5x20xf32, #tpu.memory_space<vmem>>, %arg24: memref<1x20xf32, #tpu.memory_space<vmem>>, %arg25: memref<4x20x20xf32, #tpu.memory_space<vmem>>, %arg26: memref<4x20x20xf32, #tpu.memory_space<vmem>>, %arg27: memref<4x20x20xf32, #tpu.memory_space<vmem>>, %arg28: memref<4x20x20xf32, #tpu.memory_space<vmem>>, %arg29: memref<1x20xf32, #tpu.memory_space<vmem>>, %arg30: memref<1x20xf32, #tpu.memory_space<vmem>>, %arg31: memref<1x80xf32, #tpu.memory_space<vmem>>, %arg32: memref<1x20xf32, #tpu.memory_space<vmem>>, %arg33: memref<20x80xf32, #tpu.memory_space<vmem>>, %arg34: memref<80x20xf32, #tpu.memory_space<vmem>>, %arg35: memref<1x20xf32, #tpu.memory_space<vmem>>, %arg36: memref<1x20xf32, #tpu.memory_space<vmem>>, %arg37: memref<1x1xf32, #tpu.memory_space<vmem>>, %arg38: memref<20x1xf32, #tpu.memory_space<vmem>>, %arg39: memref<16x20xf32, #tpu.memory_space<vmem>>, %arg40: memref<16x20xf32, #tpu.memory_space<vmem>>, %arg41: memref<16x5xf32, #tpu.memory_space<vmem>>, %arg42: memref<16x3xf32, #tpu.memory_space<vmem>>, %arg43: memref<16x1xf32, #tpu.memory_space<vmem>>) attributes {dimension_semantics = [], scalar_prefetch = 0 : i64, scratch_operands = 0 : i64, tpu.core_type = #tpu.core_type<tc>} {
    %c0 = arith.constant 0 : index
    %c0_0 = arith.constant 0 : index
    %0 = vector.load %arg41[%c0, %c0_0] : memref<16x5xf32, #tpu.memory_space<vmem>>, vector<16x5xf32>
    %c0_1 = arith.constant 0 : index
    %c0_2 = arith.constant 0 : index
    %1 = vector.load %arg23[%c0_1, %c0_2] : memref<5x20xf32, #tpu.memory_space<vmem>>, vector<5x20xf32>
    %cst = arith.constant dense<0.000000e+00> : vector<16x20xf32>
    %2 = tpu.matmul %0, %1, %cst {dimension_numbers = #tpu.dot_dimension_numbers<[1], [0], [0], [1], [0, 0, 1, 1], [], []>} : vector<16x5xf32>, vector<5x20xf32>, vector<16x20xf32> -> vector<16x20xf32>
    %c0_3 = arith.constant 0 : index
    %c0_4 = arith.constant 0 : index
    %3 = vector.load %arg22[%c0_3, %c0_4] : memref<1x20xf32, #tpu.memory_space<vmem>>, vector<1x20xf32>
    %4 = vector.broadcast %3 : vector<1x20xf32> to vector<16x20xf32>
    %5 = arith.addf %2, %4 : vector<16x20xf32>
    %cst_5 = arith.constant 4.47213602 : f32
    %6 = vector.broadcast %cst_5 : f32 to vector<16x20xf32>
    %7 = arith.mulf %5, %6 : vector<16x20xf32>
    %c0_6 = arith.constant 0 : index
    %c0_7 = arith.constant 0 : index
    %8 = vector.load %arg40[%c0_6, %c0_7] : memref<16x20xf32, #tpu.memory_space<vmem>>, vector<16x20xf32>
    %9 = arith.addf %7, %8 : vector<16x20xf32>
    %c0_8 = arith.constant 0 : index
    %c0_9 = arith.constant 0 : index
    %c0_10 = arith.constant 0 : index
    %10 = vector.load %arg26[%c0_8, %c0_9, %c0_10] : memref<4x20x20xf32, #tpu.memory_space<vmem>>, vector<1x20x20xf32>
    %11 = vector.shape_cast %10 : vector<1x20x20xf32> to vector<20x20xf32>
    %cst_11 = arith.constant dense<0.000000e+00> : vector<16x20xf32>
    %12 = tpu.matmul %9, %11, %cst_11 {dimension_numbers = #tpu.dot_dimension_numbers<[1], [0], [0], [1], [0, 0, 1, 1], [], []>} : vector<16x20xf32>, vector<20x20xf32>, vector<16x20xf32> -> vector<16x20xf32>
    %13 = vector.shape_cast %12 : vector<16x20xf32> to vector<2x8x20xf32>
    %c0_12 = arith.constant 0 : index
    %c0_13 = arith.constant 0 : index
    %c0_14 = arith.constant 0 : index
    %14 = vector.load %arg25[%c0_12, %c0_13, %c0_14] : memref<4x20x20xf32, #tpu.memory_space<vmem>>, vector<1x20x20xf32>
    %15 = vector.shape_cast %14 : vector<1x20x20xf32> to vector<20x20xf32>
    %cst_15 = arith.constant dense<0.000000e+00> : vector<16x20xf32>
    %16 = tpu.matmul %9, %15, %cst_15 {dimension_numbers = #tpu.dot_dimension_numbers<[1], [0], [0], [1], [0, 0, 1, 1], [], []>} : vector<16x20xf32>, vector<20x20xf32>, vector<16x20xf32> -> vector<16x20xf32>
    %17 = vector.shape_cast %16 : vector<16x20xf32> to vector<2x8x20xf32>
    %c0_16 = arith.constant 0 : index
    %c0_17 = arith.constant 0 : index
    %c0_18 = arith.constant 0 : index
    %18 = vector.load %arg28[%c0_16, %c0_17, %c0_18] : memref<4x20x20xf32, #tpu.memory_space<vmem>>, vector<1x20x20xf32>
    %19 = vector.shape_cast %18 : vector<1x20x20xf32> to vector<20x20xf32>
    %cst_19 = arith.constant dense<0.000000e+00> : vector<16x20xf32>
    %20 = tpu.matmul %9, %19, %cst_19 {dimension_numbers = #tpu.dot_dimension_numbers<[1], [0], [0], [1], [0, 0, 1, 1], [], []>} : vector<16x20xf32>, vector<20x20xf32>, vector<16x20xf32> -> vector<16x20xf32>
    %21 = vector.shape_cast %20 : vector<16x20xf32> to vector<2x8x20xf32>
    "tpu.trace_start"() <{level = 10 : i32, message = "bqd,bkd->bqk"}> : () -> ()
    %cst_20 = arith.constant dense<0.000000e+00> : vector<2x8x8xf32>
    %22 = tpu.matmul %13, %17, %cst_20 {dimension_numbers = #tpu.dot_dimension_numbers<[2], [2], [1], [1], [0, 0, 0, 1, 1, 1], [0], [0]>} : vector<2x8x20xf32>, vector<2x8x20xf32>, vector<2x8x8xf32> -> vector<2x8x8xf32>
    "tpu.trace_stop"() : () -> ()
    %cst_21 = arith.constant dense<0xFF800000> : vector<2x8xf32>
    %23 = vector.multi_reduction <maximumf>, %22, %cst_21 [2] : vector<2x8x8xf32> to vector<2x8xf32>
    %24 = vector.shape_cast %23 : vector<2x8xf32> to vector<2x8x1xf32>
    %25 = vector.broadcast %24 : vector<2x8x1xf32> to vector<2x8x8xf32>
    %26 = arith.subf %22, %25 : vector<2x8x8xf32>
    %27 = math.exp %26 : vector<2x8x8xf32>
    %cst_22 = arith.constant dense<0.000000e+00> : vector<2x8xf32>
    %28 = vector.multi_reduction <add>, %27, %cst_22 [2] : vector<2x8x8xf32> to vector<2x8xf32>
    %29 = vector.shape_cast %28 : vector<2x8xf32> to vector<2x8x1xf32>
    %30 = tpu.reciprocal %29 {approx = true} : vector<2x8x1xf32> -> vector<2x8x1xf32>
    %31 = vector.broadcast %30 : vector<2x8x1xf32> to vector<2x8x8xf32>
    %32 = arith.mulf %27, %31 : vector<2x8x8xf32>
    "tpu.trace_start"() <{level = 10 : i32, message = "bqk,bkd->bqd"}> : () -> ()
    %cst_23 = arith.constant dense<0.000000e+00> : vector<2x8x20xf32>
    %33 = tpu.matmul %32, %21, %cst_23 {dimension_numbers = #tpu.dot_dimension_numbers<[2], [1], [1], [2], [0, 0, 0, 1, 1, 2], [0], [0]>} : vector<2x8x8xf32>, vector<2x8x20xf32>, vector<2x8x20xf32> -> vector<2x8x20xf32>
    "tpu.trace_stop"() : () -> ()
    %34 = vector.shape_cast %33 : vector<2x8x20xf32> to vector<16x20xf32>
    %c0_24 = arith.constant 0 : index
    %c0_25 = arith.constant 0 : index
    %c0_26 = arith.constant 0 : index
    %35 = vector.load %arg27[%c0_24, %c0_25, %c0_26] : memref<4x20x20xf32, #tpu.memory_space<vmem>>, vector<1x20x20xf32>
    %36 = vector.shape_cast %35 : vector<1x20x20xf32> to vector<20x20xf32>
    %cst_27 = arith.constant dense<0.000000e+00> : vector<16x20xf32>
    %37 = tpu.matmul %34, %36, %cst_27 {dimension_numbers = #tpu.dot_dimension_numbers<[1], [0], [0], [1], [0, 0, 1, 1], [], []>} : vector<16x20xf32>, vector<20x20xf32>, vector<16x20xf32> -> vector<16x20xf32>
    %c1 = arith.constant 1 : index
    %c0_28 = arith.constant 0 : index
    %c0_29 = arith.constant 0 : index
    %38 = vector.load %arg26[%c1, %c0_28, %c0_29] : memref<4x20x20xf32, #tpu.memory_space<vmem>>, vector<1x20x20xf32>
    %39 = vector.shape_cast %38 : vector<1x20x20xf32> to vector<20x20xf32>
    %cst_30 = arith.constant dense<0.000000e+00> : vector<16x20xf32>
    %40 = tpu.matmul %9, %39, %cst_30 {dimension_numbers = #tpu.dot_dimension_numbers<[1], [0], [0], [1], [0, 0, 1, 1], [], []>} : vector<16x20xf32>, vector<20x20xf32>, vector<16x20xf32> -> vector<16x20xf32>
    %41 = vector.shape_cast %40 : vector<16x20xf32> to vector<2x8x20xf32>
    %c1_31 = arith.constant 1 : index
    %c0_32 = arith.constant 0 : index
    %c0_33 = arith.constant 0 : index
    %42 = vector.load %arg25[%c1_31, %c0_32, %c0_33] : memref<4x20x20xf32, #tpu.memory_space<vmem>>, vector<1x20x20xf32>
    %43 = vector.shape_cast %42 : vector<1x20x20xf32> to vector<20x20xf32>
    %cst_34 = arith.constant dense<0.000000e+00> : vector<16x20xf32>
    %44 = tpu.matmul %9, %43, %cst_34 {dimension_numbers = #tpu.dot_dimension_numbers<[1], [0], [0], [1], [0, 0, 1, 1], [], []>} : vector<16x20xf32>, vector<20x20xf32>, vector<16x20xf32> -> vector<16x20xf32>
    %45 = vector.shape_cast %44 : vector<16x20xf32> to vector<2x8x20xf32>
    %c1_35 = arith.constant 1 : index
    %c0_36 = arith.constant 0 : index
    %c0_37 = arith.constant 0 : index
    %46 = vector.load %arg28[%c1_35, %c0_36, %c0_37] : memref<4x20x20xf32, #tpu.memory_space<vmem>>, vector<1x20x20xf32>
    %47 = vector.shape_cast %46 : vector<1x20x20xf32> to vector<20x20xf32>
    %cst_38 = arith.constant dense<0.000000e+00> : vector<16x20xf32>
    %48 = tpu.matmul %9, %47, %cst_38 {dimension_numbers = #tpu.dot_dimension_numbers<[1], [0], [0], [1], [0, 0, 1, 1], [], []>} : vector<16x20xf32>, vector<20x20xf32>, vector<16x20xf32> -> vector<16x20xf32>
    %49 = vector.shape_cast %48 : vector<16x20xf32> to vector<2x8x20xf32>
    "tpu.trace_start"() <{level = 10 : i32, message = "bqd,bkd->bqk"}> : () -> ()
    %cst_39 = arith.constant dense<0.000000e+00> : vector<2x8x8xf32>
    %50 = tpu.matmul %41, %45, %cst_39 {dimension_numbers = #tpu.dot_dimension_numbers<[2], [2], [1], [1], [0, 0, 0, 1, 1, 1], [0], [0]>} : vector<2x8x20xf32>, vector<2x8x20xf32>, vector<2x8x8xf32> -> vector<2x8x8xf32>
    "tpu.trace_stop"() : () -> ()
    %cst_40 = arith.constant dense<0xFF800000> : vector<2x8xf32>
    %51 = vector.multi_reduction <maximumf>, %50, %cst_40 [2] : vector<2x8x8xf32> to vector<2x8xf32>
    %52 = vector.shape_cast %51 : vector<2x8xf32> to vector<2x8x1xf32>
    %53 = vector.broadcast %52 : vector<2x8x1xf32> to vector<2x8x8xf32>
    %54 = arith.subf %50, %53 : vector<2x8x8xf32>
    %55 = math.exp %54 : vector<2x8x8xf32>
    %cst_41 = arith.constant dense<0.000000e+00> : vector<2x8xf32>
    %56 = vector.multi_reduction <add>, %55, %cst_41 [2] : vector<2x8x8xf32> to vector<2x8xf32>
    %57 = vector.shape_cast %56 : vector<2x8xf32> to vector<2x8x1xf32>
    %58 = tpu.reciprocal %57 {approx = true} : vector<2x8x1xf32> -> vector<2x8x1xf32>
    %59 = vector.broadcast %58 : vector<2x8x1xf32> to vector<2x8x8xf32>
    %60 = arith.mulf %55, %59 : vector<2x8x8xf32>
    "tpu.trace_start"() <{level = 10 : i32, message = "bqk,bkd->bqd"}> : () -> ()
    %cst_42 = arith.constant dense<0.000000e+00> : vector<2x8x20xf32>
    %61 = tpu.matmul %60, %49, %cst_42 {dimension_numbers = #tpu.dot_dimension_numbers<[2], [1], [1], [2], [0, 0, 0, 1, 1, 2], [0], [0]>} : vector<2x8x8xf32>, vector<2x8x20xf32>, vector<2x8x20xf32> -> vector<2x8x20xf32>
    "tpu.trace_stop"() : () -> ()
    %62 = vector.shape_cast %61 : vector<2x8x20xf32> to vector<16x20xf32>
    %c1_43 = arith.constant 1 : index
    %c0_44 = arith.constant 0 : index
    %c0_45 = arith.constant 0 : index
    %63 = vector.load %arg27[%c1_43, %c0_44, %c0_45] : memref<4x20x20xf32, #tpu.memory_space<vmem>>, vector<1x20x20xf32>
    %64 = vector.shape_cast %63 : vector<1x20x20xf32> to vector<20x20xf32>
    %cst_46 = arith.constant dense<0.000000e+00> : vector<16x20xf32>
    %65 = tpu.matmul %62, %64, %cst_46 {dimension_numbers = #tpu.dot_dimension_numbers<[1], [0], [0], [1], [0, 0, 1, 1], [], []>} : vector<16x20xf32>, vector<20x20xf32>, vector<16x20xf32> -> vector<16x20xf32>
    %66 = arith.addf %37, %65 : vector<16x20xf32>
    %c2 = arith.constant 2 : index
    %c0_47 = arith.constant 0 : index
    %c0_48 = arith.constant 0 : index
    %67 = vector.load %arg26[%c2, %c0_47, %c0_48] : memref<4x20x20xf32, #tpu.memory_space<vmem>>, vector<1x20x20xf32>
    %68 = vector.shape_cast %67 : vector<1x20x20xf32> to vector<20x20xf32>
    %cst_49 = arith.constant dense<0.000000e+00> : vector<16x20xf32>
    %69 = tpu.matmul %9, %68, %cst_49 {dimension_numbers = #tpu.dot_dimension_numbers<[1], [0], [0], [1], [0, 0, 1, 1], [], []>} : vector<16x20xf32>, vector<20x20xf32>, vector<16x20xf32> -> vector<16x20xf32>
    %70 = vector.shape_cast %69 : vector<16x20xf32> to vector<2x8x20xf32>
    %c2_50 = arith.constant 2 : index
    %c0_51 = arith.constant 0 : index
    %c0_52 = arith.constant 0 : index
    %71 = vector.load %arg25[%c2_50, %c0_51, %c0_52] : memref<4x20x20xf32, #tpu.memory_space<vmem>>, vector<1x20x20xf32>
    %72 = vector.shape_cast %71 : vector<1x20x20xf32> to vector<20x20xf32>
    %cst_53 = arith.constant dense<0.000000e+00> : vector<16x20xf32>
    %73 = tpu.matmul %9, %72, %cst_53 {dimension_numbers = #tpu.dot_dimension_numbers<[1], [0], [0], [1], [0, 0, 1, 1], [], []>} : vector<16x20xf32>, vector<20x20xf32>, vector<16x20xf32> -> vector<16x20xf32>
    %74 = vector.shape_cast %73 : vector<16x20xf32> to vector<2x8x20xf32>
    %c2_54 = arith.constant 2 : index
    %c0_55 = arith.constant 0 : index
    %c0_56 = arith.constant 0 : index
    %75 = vector.load %arg28[%c2_54, %c0_55, %c0_56] : memref<4x20x20xf32, #tpu.memory_space<vmem>>, vector<1x20x20xf32>
    %76 = vector.shape_cast %75 : vector<1x20x20xf32> to vector<20x20xf32>
    %cst_57 = arith.constant dense<0.000000e+00> : vector<16x20xf32>
    %77 = tpu.matmul %9, %76, %cst_57 {dimension_numbers = #tpu.dot_dimension_numbers<[1], [0], [0], [1], [0, 0, 1, 1], [], []>} : vector<16x20xf32>, vector<20x20xf32>, vector<16x20xf32> -> vector<16x20xf32>
    %78 = vector.shape_cast %77 : vector<16x20xf32> to vector<2x8x20xf32>
    "tpu.trace_start"() <{level = 10 : i32, message = "bqd,bkd->bqk"}> : () -> ()
    %cst_58 = arith.constant dense<0.000000e+00> : vector<2x8x8xf32>
    %79 = tpu.matmul %70, %74, %cst_58 {dimension_numbers = #tpu.dot_dimension_numbers<[2], [2], [1], [1], [0, 0, 0, 1, 1, 1], [0], [0]>} : vector<2x8x20xf32>, vector<2x8x20xf32>, vector<2x8x8xf32> -> vector<2x8x8xf32>
    "tpu.trace_stop"() : () -> ()
    %cst_59 = arith.constant dense<0xFF800000> : vector<2x8xf32>
    %80 = vector.multi_reduction <maximumf>, %79, %cst_59 [2] : vector<2x8x8xf32> to vector<2x8xf32>
    %81 = vector.shape_cast %80 : vector<2x8xf32> to vector<2x8x1xf32>
    %82 = vector.broadcast %81 : vector<2x8x1xf32> to vector<2x8x8xf32>
    %83 = arith.subf %79, %82 : vector<2x8x8xf32>
    %84 = math.exp %83 : vector<2x8x8xf32>
    %cst_60 = arith.constant dense<0.000000e+00> : vector<2x8xf32>
    %85 = vector.multi_reduction <add>, %84, %cst_60 [2] : vector<2x8x8xf32> to vector<2x8xf32>
    %86 = vector.shape_cast %85 : vector<2x8xf32> to vector<2x8x1xf32>
    %87 = tpu.reciprocal %86 {approx = true} : vector<2x8x1xf32> -> vector<2x8x1xf32>
    %88 = vector.broadcast %87 : vector<2x8x1xf32> to vector<2x8x8xf32>
    %89 = arith.mulf %84, %88 : vector<2x8x8xf32>
    "tpu.trace_start"() <{level = 10 : i32, message = "bqk,bkd->bqd"}> : () -> ()
    %cst_61 = arith.constant dense<0.000000e+00> : vector<2x8x20xf32>
    %90 = tpu.matmul %89, %78, %cst_61 {dimension_numbers = #tpu.dot_dimension_numbers<[2], [1], [1], [2], [0, 0, 0, 1, 1, 2], [0], [0]>} : vector<2x8x8xf32>, vector<2x8x20xf32>, vector<2x8x20xf32> -> vector<2x8x20xf32>
    "tpu.trace_stop"() : () -> ()
    %91 = vector.shape_cast %90 : vector<2x8x20xf32> to vector<16x20xf32>
    %c2_62 = arith.constant 2 : index
    %c0_63 = arith.constant 0 : index
    %c0_64 = arith.constant 0 : index
    %92 = vector.load %arg27[%c2_62, %c0_63, %c0_64] : memref<4x20x20xf32, #tpu.memory_space<vmem>>, vector<1x20x20xf32>
    %93 = vector.shape_cast %92 : vector<1x20x20xf32> to vector<20x20xf32>
    %cst_65 = arith.constant dense<0.000000e+00> : vector<16x20xf32>
    %94 = tpu.matmul %91, %93, %cst_65 {dimension_numbers = #tpu.dot_dimension_numbers<[1], [0], [0], [1], [0, 0, 1, 1], [], []>} : vector<16x20xf32>, vector<20x20xf32>, vector<16x20xf32> -> vector<16x20xf32>
    %95 = arith.addf %66, %94 : vector<16x20xf32>
    %c3 = arith.constant 3 : index
    %c0_66 = arith.constant 0 : index
    %c0_67 = arith.constant 0 : index
    %96 = vector.load %arg26[%c3, %c0_66, %c0_67] : memref<4x20x20xf32, #tpu.memory_space<vmem>>, vector<1x20x20xf32>
    %97 = vector.shape_cast %96 : vector<1x20x20xf32> to vector<20x20xf32>
    %cst_68 = arith.constant dense<0.000000e+00> : vector<16x20xf32>
    %98 = tpu.matmul %9, %97, %cst_68 {dimension_numbers = #tpu.dot_dimension_numbers<[1], [0], [0], [1], [0, 0, 1, 1], [], []>} : vector<16x20xf32>, vector<20x20xf32>, vector<16x20xf32> -> vector<16x20xf32>
    %99 = vector.shape_cast %98 : vector<16x20xf32> to vector<2x8x20xf32>
    %c3_69 = arith.constant 3 : index
    %c0_70 = arith.constant 0 : index
    %c0_71 = arith.constant 0 : index
    %100 = vector.load %arg25[%c3_69, %c0_70, %c0_71] : memref<4x20x20xf32, #tpu.memory_space<vmem>>, vector<1x20x20xf32>
    %101 = vector.shape_cast %100 : vector<1x20x20xf32> to vector<20x20xf32>
    %cst_72 = arith.constant dense<0.000000e+00> : vector<16x20xf32>
    %102 = tpu.matmul %9, %101, %cst_72 {dimension_numbers = #tpu.dot_dimension_numbers<[1], [0], [0], [1], [0, 0, 1, 1], [], []>} : vector<16x20xf32>, vector<20x20xf32>, vector<16x20xf32> -> vector<16x20xf32>
    %103 = vector.shape_cast %102 : vector<16x20xf32> to vector<2x8x20xf32>
    %c3_73 = arith.constant 3 : index
    %c0_74 = arith.constant 0 : index
    %c0_75 = arith.constant 0 : index
    %104 = vector.load %arg28[%c3_73, %c0_74, %c0_75] : memref<4x20x20xf32, #tpu.memory_space<vmem>>, vector<1x20x20xf32>
    %105 = vector.shape_cast %104 : vector<1x20x20xf32> to vector<20x20xf32>
    %cst_76 = arith.constant dense<0.000000e+00> : vector<16x20xf32>
    %106 = tpu.matmul %9, %105, %cst_76 {dimension_numbers = #tpu.dot_dimension_numbers<[1], [0], [0], [1], [0, 0, 1, 1], [], []>} : vector<16x20xf32>, vector<20x20xf32>, vector<16x20xf32> -> vector<16x20xf32>
    %107 = vector.shape_cast %106 : vector<16x20xf32> to vector<2x8x20xf32>
    "tpu.trace_start"() <{level = 10 : i32, message = "bqd,bkd->bqk"}> : () -> ()
    %cst_77 = arith.constant dense<0.000000e+00> : vector<2x8x8xf32>
    %108 = tpu.matmul %99, %103, %cst_77 {dimension_numbers = #tpu.dot_dimension_numbers<[2], [2], [1], [1], [0, 0, 0, 1, 1, 1], [0], [0]>} : vector<2x8x20xf32>, vector<2x8x20xf32>, vector<2x8x8xf32> -> vector<2x8x8xf32>
    "tpu.trace_stop"() : () -> ()
    %cst_78 = arith.constant dense<0xFF800000> : vector<2x8xf32>
    %109 = vector.multi_reduction <maximumf>, %108, %cst_78 [2] : vector<2x8x8xf32> to vector<2x8xf32>
    %110 = vector.shape_cast %109 : vector<2x8xf32> to vector<2x8x1xf32>
    %111 = vector.broadcast %110 : vector<2x8x1xf32> to vector<2x8x8xf32>
    %112 = arith.subf %108, %111 : vector<2x8x8xf32>
    %113 = math.exp %112 : vector<2x8x8xf32>
    %cst_79 = arith.constant dense<0.000000e+00> : vector<2x8xf32>
    %114 = vector.multi_reduction <add>, %113, %cst_79 [2] : vector<2x8x8xf32> to vector<2x8xf32>
    %115 = vector.shape_cast %114 : vector<2x8xf32> to vector<2x8x1xf32>
    %116 = tpu.reciprocal %115 {approx = true} : vector<2x8x1xf32> -> vector<2x8x1xf32>
    %117 = vector.broadcast %116 : vector<2x8x1xf32> to vector<2x8x8xf32>
    %118 = arith.mulf %113, %117 : vector<2x8x8xf32>
    "tpu.trace_start"() <{level = 10 : i32, message = "bqk,bkd->bqd"}> : () -> ()
    %cst_80 = arith.constant dense<0.000000e+00> : vector<2x8x20xf32>
    %119 = tpu.matmul %118, %107, %cst_80 {dimension_numbers = #tpu.dot_dimension_numbers<[2], [1], [1], [2], [0, 0, 0, 1, 1, 2], [0], [0]>} : vector<2x8x8xf32>, vector<2x8x20xf32>, vector<2x8x20xf32> -> vector<2x8x20xf32>
    "tpu.trace_stop"() : () -> ()
    %120 = vector.shape_cast %119 : vector<2x8x20xf32> to vector<16x20xf32>
    %c3_81 = arith.constant 3 : index
    %c0_82 = arith.constant 0 : index
    %c0_83 = arith.constant 0 : index
    %121 = vector.load %arg27[%c3_81, %c0_82, %c0_83] : memref<4x20x20xf32, #tpu.memory_space<vmem>>, vector<1x20x20xf32>
    %122 = vector.shape_cast %121 : vector<1x20x20xf32> to vector<20x20xf32>
    %cst_84 = arith.constant dense<0.000000e+00> : vector<16x20xf32>
    %123 = tpu.matmul %120, %122, %cst_84 {dimension_numbers = #tpu.dot_dimension_numbers<[1], [0], [0], [1], [0, 0, 1, 1], [], []>} : vector<16x20xf32>, vector<20x20xf32>, vector<16x20xf32> -> vector<16x20xf32>
    %124 = arith.addf %95, %123 : vector<16x20xf32>
    %c0_85 = arith.constant 0 : index
    %c0_86 = arith.constant 0 : index
    %125 = vector.load %arg24[%c0_85, %c0_86] : memref<1x20xf32, #tpu.memory_space<vmem>>, vector<1x20xf32>
    %126 = vector.broadcast %125 : vector<1x20xf32> to vector<16x20xf32>
    %127 = arith.addf %124, %126 : vector<16x20xf32>
    %128 = arith.addf %127, %9 : vector<16x20xf32>
    %cst_87 = arith.constant dense<0.000000e+00> : vector<16xf32>
    %129 = vector.multi_reduction <add>, %128, %cst_87 [1] : vector<16x20xf32> to vector<16xf32>
    %130 = vector.shape_cast %129 : vector<16xf32> to vector<16x1xf32>
    %cst_88 = arith.constant 2.000000e+01 : f32
    %131 = vector.broadcast %cst_88 : f32 to vector<16x1xf32>
    %132 = arith.divf %130, %131 : vector<16x1xf32>
    %133 = vector.broadcast %132 : vector<16x1xf32> to vector<16x20xf32>
    %134 = arith.subf %128, %133 : vector<16x20xf32>
    %135 = arith.mulf %134, %134 : vector<16x20xf32>
    %cst_89 = arith.constant dense<0.000000e+00> : vector<16xf32>
    %136 = vector.multi_reduction <add>, %135, %cst_89 [1] : vector<16x20xf32> to vector<16xf32>
    %137 = vector.shape_cast %136 : vector<16xf32> to vector<16x1xf32>
    %cst_90 = arith.constant 2.000000e+01 : f32
    %138 = vector.broadcast %cst_90 : f32 to vector<16x1xf32>
    %139 = arith.divf %137, %138 : vector<16x1xf32>
    %140 = vector.broadcast %132 : vector<16x1xf32> to vector<16x20xf32>
    %141 = arith.subf %128, %140 : vector<16x20xf32>
    %cst_91 = arith.constant 9.99999974E-6 : f32
    %142 = vector.broadcast %cst_91 : f32 to vector<16x1xf32>
    %143 = arith.addf %139, %142 : vector<16x1xf32>
    %144 = math.rsqrt %143 : vector<16x1xf32>
    %145 = vector.broadcast %144 : vector<16x1xf32> to vector<16x20xf32>
    %146 = arith.mulf %141, %145 : vector<16x20xf32>
    %c0_92 = arith.constant 0 : index
    %c0_93 = arith.constant 0 : index
    %147 = vector.load %arg35[%c0_92, %c0_93] : memref<1x20xf32, #tpu.memory_space<vmem>>, vector<1x20xf32>
    %148 = vector.broadcast %147 : vector<1x20xf32> to vector<16x20xf32>
    %149 = arith.mulf %146, %148 : vector<16x20xf32>
    %c0_94 = arith.constant 0 : index
    %c0_95 = arith.constant 0 : index
    %150 = vector.load %arg29[%c0_94, %c0_95] : memref<1x20xf32, #tpu.memory_space<vmem>>, vector<1x20xf32>
    %151 = vector.broadcast %150 : vector<1x20xf32> to vector<16x20xf32>
    %152 = arith.addf %149, %151 : vector<16x20xf32>
    %c0_96 = arith.constant 0 : index
    %c0_97 = arith.constant 0 : index
    %153 = vector.load %arg33[%c0_96, %c0_97] : memref<20x80xf32, #tpu.memory_space<vmem>>, vector<20x80xf32>
    %cst_98 = arith.constant dense<0.000000e+00> : vector<16x80xf32>
    %154 = tpu.matmul %152, %153, %cst_98 {dimension_numbers = #tpu.dot_dimension_numbers<[1], [0], [0], [1], [0, 0, 1, 1], [], []>} : vector<16x20xf32>, vector<20x80xf32>, vector<16x80xf32> -> vector<16x80xf32>
    %c0_99 = arith.constant 0 : index
    %c0_100 = arith.constant 0 : index
    %155 = vector.load %arg31[%c0_99, %c0_100] : memref<1x80xf32, #tpu.memory_space<vmem>>, vector<1x80xf32>
    %156 = vector.broadcast %155 : vector<1x80xf32> to vector<16x80xf32>
    %157 = arith.addf %154, %156 : vector<16x80xf32>
    %cst_101 = arith.constant 0.000000e+00 : f32
    %158 = vector.broadcast %cst_101 : f32 to vector<16x80xf32>
    %159 = arith.maximumf %157, %158 : vector<16x80xf32>
    %c0_102 = arith.constant 0 : index
    %c0_103 = arith.constant 0 : index
    %160 = vector.load %arg34[%c0_102, %c0_103] : memref<80x20xf32, #tpu.memory_space<vmem>>, vector<80x20xf32>
    %cst_104 = arith.constant dense<0.000000e+00> : vector<16x20xf32>
    %161 = tpu.matmul %159, %160, %cst_104 {dimension_numbers = #tpu.dot_dimension_numbers<[1], [0], [0], [1], [0, 0, 1, 1], [], []>} : vector<16x80xf32>, vector<80x20xf32>, vector<16x20xf32> -> vector<16x20xf32>
    %c0_105 = arith.constant 0 : index
    %c0_106 = arith.constant 0 : index
    %162 = vector.load %arg32[%c0_105, %c0_106] : memref<1x20xf32, #tpu.memory_space<vmem>>, vector<1x20xf32>
    %163 = vector.broadcast %162 : vector<1x20xf32> to vector<16x20xf32>
    %164 = arith.addf %161, %163 : vector<16x20xf32>
    %165 = arith.addf %164, %152 : vector<16x20xf32>
    %cst_107 = arith.constant dense<0.000000e+00> : vector<16xf32>
    %166 = vector.multi_reduction <add>, %165, %cst_107 [1] : vector<16x20xf32> to vector<16xf32>
    %167 = vector.shape_cast %166 : vector<16xf32> to vector<16x1xf32>
    %cst_108 = arith.constant 2.000000e+01 : f32
    %168 = vector.broadcast %cst_108 : f32 to vector<16x1xf32>
    %169 = arith.divf %167, %168 : vector<16x1xf32>
    %170 = vector.broadcast %169 : vector<16x1xf32> to vector<16x20xf32>
    %171 = arith.subf %165, %170 : vector<16x20xf32>
    %172 = arith.mulf %171, %171 : vector<16x20xf32>
    %cst_109 = arith.constant dense<0.000000e+00> : vector<16xf32>
    %173 = vector.multi_reduction <add>, %172, %cst_109 [1] : vector<16x20xf32> to vector<16xf32>
    %174 = vector.shape_cast %173 : vector<16xf32> to vector<16x1xf32>
    %cst_110 = arith.constant 2.000000e+01 : f32
    %175 = vector.broadcast %cst_110 : f32 to vector<16x1xf32>
    %176 = arith.divf %174, %175 : vector<16x1xf32>
    %177 = vector.broadcast %169 : vector<16x1xf32> to vector<16x20xf32>
    %178 = arith.subf %165, %177 : vector<16x20xf32>
    %cst_111 = arith.constant 9.99999974E-6 : f32
    %179 = vector.broadcast %cst_111 : f32 to vector<16x1xf32>
    %180 = arith.addf %176, %179 : vector<16x1xf32>
    %181 = math.rsqrt %180 : vector<16x1xf32>
    %182 = vector.broadcast %181 : vector<16x1xf32> to vector<16x20xf32>
    %183 = arith.mulf %178, %182 : vector<16x20xf32>
    %c0_112 = arith.constant 0 : index
    %c0_113 = arith.constant 0 : index
    %184 = vector.load %arg36[%c0_112, %c0_113] : memref<1x20xf32, #tpu.memory_space<vmem>>, vector<1x20xf32>
    %185 = vector.broadcast %184 : vector<1x20xf32> to vector<16x20xf32>
    %186 = arith.mulf %183, %185 : vector<16x20xf32>
    %c0_114 = arith.constant 0 : index
    %c0_115 = arith.constant 0 : index
    %187 = vector.load %arg30[%c0_114, %c0_115] : memref<1x20xf32, #tpu.memory_space<vmem>>, vector<1x20xf32>
    %188 = vector.broadcast %187 : vector<1x20xf32> to vector<16x20xf32>
    %189 = arith.addf %186, %188 : vector<16x20xf32>
    %c0_116 = arith.constant 0 : index
    %c0_117 = arith.constant 0 : index
    %190 = vector.load %arg42[%c0_116, %c0_117] : memref<16x3xf32, #tpu.memory_space<vmem>>, vector<16x3xf32>
    %c0_118 = arith.constant 0 : index
    %c0_119 = arith.constant 0 : index
    %191 = vector.load %arg1[%c0_118, %c0_119] : memref<3x20xf32, #tpu.memory_space<vmem>>, vector<3x20xf32>
    %cst_120 = arith.constant dense<0.000000e+00> : vector<16x20xf32>
    %192 = tpu.matmul %190, %191, %cst_120 {dimension_numbers = #tpu.dot_dimension_numbers<[1], [0], [0], [1], [0, 0, 1, 1], [], []>} : vector<16x3xf32>, vector<3x20xf32>, vector<16x20xf32> -> vector<16x20xf32>
    %c0_121 = arith.constant 0 : index
    %c0_122 = arith.constant 0 : index
    %193 = vector.load %arg0[%c0_121, %c0_122] : memref<1x20xf32, #tpu.memory_space<vmem>>, vector<1x20xf32>
    %194 = vector.broadcast %193 : vector<1x20xf32> to vector<16x20xf32>
    %195 = arith.addf %192, %194 : vector<16x20xf32>
    %cst_123 = arith.constant 4.47213602 : f32
    %196 = vector.broadcast %cst_123 : f32 to vector<16x20xf32>
    %197 = arith.mulf %195, %196 : vector<16x20xf32>
    %c0_124 = arith.constant 0 : index
    %c0_125 = arith.constant 0 : index
    %198 = vector.load %arg39[%c0_124, %c0_125] : memref<16x20xf32, #tpu.memory_space<vmem>>, vector<16x20xf32>
    %199 = arith.addf %197, %198 : vector<16x20xf32>
    %c0_126 = arith.constant 0 : index
    %c0_127 = arith.constant 0 : index
    %c0_128 = arith.constant 0 : index
    %200 = vector.load %arg4[%c0_126, %c0_127, %c0_128] : memref<4x20x20xf32, #tpu.memory_space<vmem>>, vector<1x20x20xf32>
    %201 = vector.shape_cast %200 : vector<1x20x20xf32> to vector<20x20xf32>
    %cst_129 = arith.constant dense<0.000000e+00> : vector<16x20xf32>
    %202 = tpu.matmul %199, %201, %cst_129 {dimension_numbers = #tpu.dot_dimension_numbers<[1], [0], [0], [1], [0, 0, 1, 1], [], []>} : vector<16x20xf32>, vector<20x20xf32>, vector<16x20xf32> -> vector<16x20xf32>
    %203 = vector.shape_cast %202 : vector<16x20xf32> to vector<2x8x20xf32>
    %c0_130 = arith.constant 0 : index
    %c0_131 = arith.constant 0 : index
    %c0_132 = arith.constant 0 : index
    %204 = vector.load %arg3[%c0_130, %c0_131, %c0_132] : memref<4x20x20xf32, #tpu.memory_space<vmem>>, vector<1x20x20xf32>
    %205 = vector.shape_cast %204 : vector<1x20x20xf32> to vector<20x20xf32>
    %cst_133 = arith.constant dense<0.000000e+00> : vector<16x20xf32>
    %206 = tpu.matmul %199, %205, %cst_133 {dimension_numbers = #tpu.dot_dimension_numbers<[1], [0], [0], [1], [0, 0, 1, 1], [], []>} : vector<16x20xf32>, vector<20x20xf32>, vector<16x20xf32> -> vector<16x20xf32>
    %207 = vector.shape_cast %206 : vector<16x20xf32> to vector<2x8x20xf32>
    %c0_134 = arith.constant 0 : index
    %c0_135 = arith.constant 0 : index
    %c0_136 = arith.constant 0 : index
    %208 = vector.load %arg6[%c0_134, %c0_135, %c0_136] : memref<4x20x20xf32, #tpu.memory_space<vmem>>, vector<1x20x20xf32>
    %209 = vector.shape_cast %208 : vector<1x20x20xf32> to vector<20x20xf32>
    %cst_137 = arith.constant dense<0.000000e+00> : vector<16x20xf32>
    %210 = tpu.matmul %199, %209, %cst_137 {dimension_numbers = #tpu.dot_dimension_numbers<[1], [0], [0], [1], [0, 0, 1, 1], [], []>} : vector<16x20xf32>, vector<20x20xf32>, vector<16x20xf32> -> vector<16x20xf32>
    %211 = vector.shape_cast %210 : vector<16x20xf32> to vector<2x8x20xf32>
    "tpu.trace_start"() <{level = 10 : i32, message = "bqd,bkd->bqk"}> : () -> ()
    %cst_138 = arith.constant dense<0.000000e+00> : vector<2x8x8xf32>
    %212 = tpu.matmul %203, %207, %cst_138 {dimension_numbers = #tpu.dot_dimension_numbers<[2], [2], [1], [1], [0, 0, 0, 1, 1, 1], [0], [0]>} : vector<2x8x20xf32>, vector<2x8x20xf32>, vector<2x8x8xf32> -> vector<2x8x8xf32>
    "tpu.trace_stop"() : () -> ()
    %cst_139 = arith.constant dense<0xFF800000> : vector<2x8xf32>
    %213 = vector.multi_reduction <maximumf>, %212, %cst_139 [2] : vector<2x8x8xf32> to vector<2x8xf32>
    %214 = vector.shape_cast %213 : vector<2x8xf32> to vector<2x8x1xf32>
    %215 = vector.broadcast %214 : vector<2x8x1xf32> to vector<2x8x8xf32>
    %216 = arith.subf %212, %215 : vector<2x8x8xf32>
    %217 = math.exp %216 : vector<2x8x8xf32>
    %cst_140 = arith.constant dense<0.000000e+00> : vector<2x8xf32>
    %218 = vector.multi_reduction <add>, %217, %cst_140 [2] : vector<2x8x8xf32> to vector<2x8xf32>
    %219 = vector.shape_cast %218 : vector<2x8xf32> to vector<2x8x1xf32>
    %220 = tpu.reciprocal %219 {approx = true} : vector<2x8x1xf32> -> vector<2x8x1xf32>
    %221 = vector.broadcast %220 : vector<2x8x1xf32> to vector<2x8x8xf32>
    %222 = arith.mulf %217, %221 : vector<2x8x8xf32>
    "tpu.trace_start"() <{level = 10 : i32, message = "bqk,bkd->bqd"}> : () -> ()
    %cst_141 = arith.constant dense<0.000000e+00> : vector<2x8x20xf32>
    %223 = tpu.matmul %222, %211, %cst_141 {dimension_numbers = #tpu.dot_dimension_numbers<[2], [1], [1], [2], [0, 0, 0, 1, 1, 2], [0], [0]>} : vector<2x8x8xf32>, vector<2x8x20xf32>, vector<2x8x20xf32> -> vector<2x8x20xf32>
    "tpu.trace_stop"() : () -> ()
    %224 = vector.shape_cast %223 : vector<2x8x20xf32> to vector<16x20xf32>
    %c0_142 = arith.constant 0 : index
    %c0_143 = arith.constant 0 : index
    %c0_144 = arith.constant 0 : index
    %225 = vector.load %arg5[%c0_142, %c0_143, %c0_144] : memref<4x20x20xf32, #tpu.memory_space<vmem>>, vector<1x20x20xf32>
    %226 = vector.shape_cast %225 : vector<1x20x20xf32> to vector<20x20xf32>
    %cst_145 = arith.constant dense<0.000000e+00> : vector<16x20xf32>
    %227 = tpu.matmul %224, %226, %cst_145 {dimension_numbers = #tpu.dot_dimension_numbers<[1], [0], [0], [1], [0, 0, 1, 1], [], []>} : vector<16x20xf32>, vector<20x20xf32>, vector<16x20xf32> -> vector<16x20xf32>
    %c1_146 = arith.constant 1 : index
    %c0_147 = arith.constant 0 : index
    %c0_148 = arith.constant 0 : index
    %228 = vector.load %arg4[%c1_146, %c0_147, %c0_148] : memref<4x20x20xf32, #tpu.memory_space<vmem>>, vector<1x20x20xf32>
    %229 = vector.shape_cast %228 : vector<1x20x20xf32> to vector<20x20xf32>
    %cst_149 = arith.constant dense<0.000000e+00> : vector<16x20xf32>
    %230 = tpu.matmul %199, %229, %cst_149 {dimension_numbers = #tpu.dot_dimension_numbers<[1], [0], [0], [1], [0, 0, 1, 1], [], []>} : vector<16x20xf32>, vector<20x20xf32>, vector<16x20xf32> -> vector<16x20xf32>
    %231 = vector.shape_cast %230 : vector<16x20xf32> to vector<2x8x20xf32>
    %c1_150 = arith.constant 1 : index
    %c0_151 = arith.constant 0 : index
    %c0_152 = arith.constant 0 : index
    %232 = vector.load %arg3[%c1_150, %c0_151, %c0_152] : memref<4x20x20xf32, #tpu.memory_space<vmem>>, vector<1x20x20xf32>
    %233 = vector.shape_cast %232 : vector<1x20x20xf32> to vector<20x20xf32>
    %cst_153 = arith.constant dense<0.000000e+00> : vector<16x20xf32>
    %234 = tpu.matmul %199, %233, %cst_153 {dimension_numbers = #tpu.dot_dimension_numbers<[1], [0], [0], [1], [0, 0, 1, 1], [], []>} : vector<16x20xf32>, vector<20x20xf32>, vector<16x20xf32> -> vector<16x20xf32>
    %235 = vector.shape_cast %234 : vector<16x20xf32> to vector<2x8x20xf32>
    %c1_154 = arith.constant 1 : index
    %c0_155 = arith.constant 0 : index
    %c0_156 = arith.constant 0 : index
    %236 = vector.load %arg6[%c1_154, %c0_155, %c0_156] : memref<4x20x20xf32, #tpu.memory_space<vmem>>, vector<1x20x20xf32>
    %237 = vector.shape_cast %236 : vector<1x20x20xf32> to vector<20x20xf32>
    %cst_157 = arith.constant dense<0.000000e+00> : vector<16x20xf32>
    %238 = tpu.matmul %199, %237, %cst_157 {dimension_numbers = #tpu.dot_dimension_numbers<[1], [0], [0], [1], [0, 0, 1, 1], [], []>} : vector<16x20xf32>, vector<20x20xf32>, vector<16x20xf32> -> vector<16x20xf32>
    %239 = vector.shape_cast %238 : vector<16x20xf32> to vector<2x8x20xf32>
    "tpu.trace_start"() <{level = 10 : i32, message = "bqd,bkd->bqk"}> : () -> ()
    %cst_158 = arith.constant dense<0.000000e+00> : vector<2x8x8xf32>
    %240 = tpu.matmul %231, %235, %cst_158 {dimension_numbers = #tpu.dot_dimension_numbers<[2], [2], [1], [1], [0, 0, 0, 1, 1, 1], [0], [0]>} : vector<2x8x20xf32>, vector<2x8x20xf32>, vector<2x8x8xf32> -> vector<2x8x8xf32>
    "tpu.trace_stop"() : () -> ()
    %cst_159 = arith.constant dense<0xFF800000> : vector<2x8xf32>
    %241 = vector.multi_reduction <maximumf>, %240, %cst_159 [2] : vector<2x8x8xf32> to vector<2x8xf32>
    %242 = vector.shape_cast %241 : vector<2x8xf32> to vector<2x8x1xf32>
    %243 = vector.broadcast %242 : vector<2x8x1xf32> to vector<2x8x8xf32>
    %244 = arith.subf %240, %243 : vector<2x8x8xf32>
    %245 = math.exp %244 : vector<2x8x8xf32>
    %cst_160 = arith.constant dense<0.000000e+00> : vector<2x8xf32>
    %246 = vector.multi_reduction <add>, %245, %cst_160 [2] : vector<2x8x8xf32> to vector<2x8xf32>
    %247 = vector.shape_cast %246 : vector<2x8xf32> to vector<2x8x1xf32>
    %248 = tpu.reciprocal %247 {approx = true} : vector<2x8x1xf32> -> vector<2x8x1xf32>
    %249 = vector.broadcast %248 : vector<2x8x1xf32> to vector<2x8x8xf32>
    %250 = arith.mulf %245, %249 : vector<2x8x8xf32>
    "tpu.trace_start"() <{level = 10 : i32, message = "bqk,bkd->bqd"}> : () -> ()
    %cst_161 = arith.constant dense<0.000000e+00> : vector<2x8x20xf32>
    %251 = tpu.matmul %250, %239, %cst_161 {dimension_numbers = #tpu.dot_dimension_numbers<[2], [1], [1], [2], [0, 0, 0, 1, 1, 2], [0], [0]>} : vector<2x8x8xf32>, vector<2x8x20xf32>, vector<2x8x20xf32> -> vector<2x8x20xf32>
    "tpu.trace_stop"() : () -> ()
    %252 = vector.shape_cast %251 : vector<2x8x20xf32> to vector<16x20xf32>
    %c1_162 = arith.constant 1 : index
    %c0_163 = arith.constant 0 : index
    %c0_164 = arith.constant 0 : index
    %253 = vector.load %arg5[%c1_162, %c0_163, %c0_164] : memref<4x20x20xf32, #tpu.memory_space<vmem>>, vector<1x20x20xf32>
    %254 = vector.shape_cast %253 : vector<1x20x20xf32> to vector<20x20xf32>
    %cst_165 = arith.constant dense<0.000000e+00> : vector<16x20xf32>
    %255 = tpu.matmul %252, %254, %cst_165 {dimension_numbers = #tpu.dot_dimension_numbers<[1], [0], [0], [1], [0, 0, 1, 1], [], []>} : vector<16x20xf32>, vector<20x20xf32>, vector<16x20xf32> -> vector<16x20xf32>
    %256 = arith.addf %227, %255 : vector<16x20xf32>
    %c2_166 = arith.constant 2 : index
    %c0_167 = arith.constant 0 : index
    %c0_168 = arith.constant 0 : index
    %257 = vector.load %arg4[%c2_166, %c0_167, %c0_168] : memref<4x20x20xf32, #tpu.memory_space<vmem>>, vector<1x20x20xf32>
    %258 = vector.shape_cast %257 : vector<1x20x20xf32> to vector<20x20xf32>
    %cst_169 = arith.constant dense<0.000000e+00> : vector<16x20xf32>
    %259 = tpu.matmul %199, %258, %cst_169 {dimension_numbers = #tpu.dot_dimension_numbers<[1], [0], [0], [1], [0, 0, 1, 1], [], []>} : vector<16x20xf32>, vector<20x20xf32>, vector<16x20xf32> -> vector<16x20xf32>
    %260 = vector.shape_cast %259 : vector<16x20xf32> to vector<2x8x20xf32>
    %c2_170 = arith.constant 2 : index
    %c0_171 = arith.constant 0 : index
    %c0_172 = arith.constant 0 : index
    %261 = vector.load %arg3[%c2_170, %c0_171, %c0_172] : memref<4x20x20xf32, #tpu.memory_space<vmem>>, vector<1x20x20xf32>
    %262 = vector.shape_cast %261 : vector<1x20x20xf32> to vector<20x20xf32>
    %cst_173 = arith.constant dense<0.000000e+00> : vector<16x20xf32>
    %263 = tpu.matmul %199, %262, %cst_173 {dimension_numbers = #tpu.dot_dimension_numbers<[1], [0], [0], [1], [0, 0, 1, 1], [], []>} : vector<16x20xf32>, vector<20x20xf32>, vector<16x20xf32> -> vector<16x20xf32>
    %264 = vector.shape_cast %263 : vector<16x20xf32> to vector<2x8x20xf32>
    %c2_174 = arith.constant 2 : index
    %c0_175 = arith.constant 0 : index
    %c0_176 = arith.constant 0 : index
    %265 = vector.load %arg6[%c2_174, %c0_175, %c0_176] : memref<4x20x20xf32, #tpu.memory_space<vmem>>, vector<1x20x20xf32>
    %266 = vector.shape_cast %265 : vector<1x20x20xf32> to vector<20x20xf32>
    %cst_177 = arith.constant dense<0.000000e+00> : vector<16x20xf32>
    %267 = tpu.matmul %199, %266, %cst_177 {dimension_numbers = #tpu.dot_dimension_numbers<[1], [0], [0], [1], [0, 0, 1, 1], [], []>} : vector<16x20xf32>, vector<20x20xf32>, vector<16x20xf32> -> vector<16x20xf32>
    %268 = vector.shape_cast %267 : vector<16x20xf32> to vector<2x8x20xf32>
    "tpu.trace_start"() <{level = 10 : i32, message = "bqd,bkd->bqk"}> : () -> ()
    %cst_178 = arith.constant dense<0.000000e+00> : vector<2x8x8xf32>
    %269 = tpu.matmul %260, %264, %cst_178 {dimension_numbers = #tpu.dot_dimension_numbers<[2], [2], [1], [1], [0, 0, 0, 1, 1, 1], [0], [0]>} : vector<2x8x20xf32>, vector<2x8x20xf32>, vector<2x8x8xf32> -> vector<2x8x8xf32>
    "tpu.trace_stop"() : () -> ()
    %cst_179 = arith.constant dense<0xFF800000> : vector<2x8xf32>
    %270 = vector.multi_reduction <maximumf>, %269, %cst_179 [2] : vector<2x8x8xf32> to vector<2x8xf32>
    %271 = vector.shape_cast %270 : vector<2x8xf32> to vector<2x8x1xf32>
    %272 = vector.broadcast %271 : vector<2x8x1xf32> to vector<2x8x8xf32>
    %273 = arith.subf %269, %272 : vector<2x8x8xf32>
    %274 = math.exp %273 : vector<2x8x8xf32>
    %cst_180 = arith.constant dense<0.000000e+00> : vector<2x8xf32>
    %275 = vector.multi_reduction <add>, %274, %cst_180 [2] : vector<2x8x8xf32> to vector<2x8xf32>
    %276 = vector.shape_cast %275 : vector<2x8xf32> to vector<2x8x1xf32>
    %277 = tpu.reciprocal %276 {approx = true} : vector<2x8x1xf32> -> vector<2x8x1xf32>
    %278 = vector.broadcast %277 : vector<2x8x1xf32> to vector<2x8x8xf32>
    %279 = arith.mulf %274, %278 : vector<2x8x8xf32>
    "tpu.trace_start"() <{level = 10 : i32, message = "bqk,bkd->bqd"}> : () -> ()
    %cst_181 = arith.constant dense<0.000000e+00> : vector<2x8x20xf32>
    %280 = tpu.matmul %279, %268, %cst_181 {dimension_numbers = #tpu.dot_dimension_numbers<[2], [1], [1], [2], [0, 0, 0, 1, 1, 2], [0], [0]>} : vector<2x8x8xf32>, vector<2x8x20xf32>, vector<2x8x20xf32> -> vector<2x8x20xf32>
    "tpu.trace_stop"() : () -> ()
    %281 = vector.shape_cast %280 : vector<2x8x20xf32> to vector<16x20xf32>
    %c2_182 = arith.constant 2 : index
    %c0_183 = arith.constant 0 : index
    %c0_184 = arith.constant 0 : index
    %282 = vector.load %arg5[%c2_182, %c0_183, %c0_184] : memref<4x20x20xf32, #tpu.memory_space<vmem>>, vector<1x20x20xf32>
    %283 = vector.shape_cast %282 : vector<1x20x20xf32> to vector<20x20xf32>
    %cst_185 = arith.constant dense<0.000000e+00> : vector<16x20xf32>
    %284 = tpu.matmul %281, %283, %cst_185 {dimension_numbers = #tpu.dot_dimension_numbers<[1], [0], [0], [1], [0, 0, 1, 1], [], []>} : vector<16x20xf32>, vector<20x20xf32>, vector<16x20xf32> -> vector<16x20xf32>
    %285 = arith.addf %256, %284 : vector<16x20xf32>
    %c3_186 = arith.constant 3 : index
    %c0_187 = arith.constant 0 : index
    %c0_188 = arith.constant 0 : index
    %286 = vector.load %arg4[%c3_186, %c0_187, %c0_188] : memref<4x20x20xf32, #tpu.memory_space<vmem>>, vector<1x20x20xf32>
    %287 = vector.shape_cast %286 : vector<1x20x20xf32> to vector<20x20xf32>
    %cst_189 = arith.constant dense<0.000000e+00> : vector<16x20xf32>
    %288 = tpu.matmul %199, %287, %cst_189 {dimension_numbers = #tpu.dot_dimension_numbers<[1], [0], [0], [1], [0, 0, 1, 1], [], []>} : vector<16x20xf32>, vector<20x20xf32>, vector<16x20xf32> -> vector<16x20xf32>
    %289 = vector.shape_cast %288 : vector<16x20xf32> to vector<2x8x20xf32>
    %c3_190 = arith.constant 3 : index
    %c0_191 = arith.constant 0 : index
    %c0_192 = arith.constant 0 : index
    %290 = vector.load %arg3[%c3_190, %c0_191, %c0_192] : memref<4x20x20xf32, #tpu.memory_space<vmem>>, vector<1x20x20xf32>
    %291 = vector.shape_cast %290 : vector<1x20x20xf32> to vector<20x20xf32>
    %cst_193 = arith.constant dense<0.000000e+00> : vector<16x20xf32>
    %292 = tpu.matmul %199, %291, %cst_193 {dimension_numbers = #tpu.dot_dimension_numbers<[1], [0], [0], [1], [0, 0, 1, 1], [], []>} : vector<16x20xf32>, vector<20x20xf32>, vector<16x20xf32> -> vector<16x20xf32>
    %293 = vector.shape_cast %292 : vector<16x20xf32> to vector<2x8x20xf32>
    %c3_194 = arith.constant 3 : index
    %c0_195 = arith.constant 0 : index
    %c0_196 = arith.constant 0 : index
    %294 = vector.load %arg6[%c3_194, %c0_195, %c0_196] : memref<4x20x20xf32, #tpu.memory_space<vmem>>, vector<1x20x20xf32>
    %295 = vector.shape_cast %294 : vector<1x20x20xf32> to vector<20x20xf32>
    %cst_197 = arith.constant dense<0.000000e+00> : vector<16x20xf32>
    %296 = tpu.matmul %199, %295, %cst_197 {dimension_numbers = #tpu.dot_dimension_numbers<[1], [0], [0], [1], [0, 0, 1, 1], [], []>} : vector<16x20xf32>, vector<20x20xf32>, vector<16x20xf32> -> vector<16x20xf32>
    %297 = vector.shape_cast %296 : vector<16x20xf32> to vector<2x8x20xf32>
    "tpu.trace_start"() <{level = 10 : i32, message = "bqd,bkd->bqk"}> : () -> ()
    %cst_198 = arith.constant dense<0.000000e+00> : vector<2x8x8xf32>
    %298 = tpu.matmul %289, %293, %cst_198 {dimension_numbers = #tpu.dot_dimension_numbers<[2], [2], [1], [1], [0, 0, 0, 1, 1, 1], [0], [0]>} : vector<2x8x20xf32>, vector<2x8x20xf32>, vector<2x8x8xf32> -> vector<2x8x8xf32>
    "tpu.trace_stop"() : () -> ()
    %cst_199 = arith.constant dense<0xFF800000> : vector<2x8xf32>
    %299 = vector.multi_reduction <maximumf>, %298, %cst_199 [2] : vector<2x8x8xf32> to vector<2x8xf32>
    %300 = vector.shape_cast %299 : vector<2x8xf32> to vector<2x8x1xf32>
    %301 = vector.broadcast %300 : vector<2x8x1xf32> to vector<2x8x8xf32>
    %302 = arith.subf %298, %301 : vector<2x8x8xf32>
    %303 = math.exp %302 : vector<2x8x8xf32>
    %cst_200 = arith.constant dense<0.000000e+00> : vector<2x8xf32>
    %304 = vector.multi_reduction <add>, %303, %cst_200 [2] : vector<2x8x8xf32> to vector<2x8xf32>
    %305 = vector.shape_cast %304 : vector<2x8xf32> to vector<2x8x1xf32>
    %306 = tpu.reciprocal %305 {approx = true} : vector<2x8x1xf32> -> vector<2x8x1xf32>
    %307 = vector.broadcast %306 : vector<2x8x1xf32> to vector<2x8x8xf32>
    %308 = arith.mulf %303, %307 : vector<2x8x8xf32>
    "tpu.trace_start"() <{level = 10 : i32, message = "bqk,bkd->bqd"}> : () -> ()
    %cst_201 = arith.constant dense<0.000000e+00> : vector<2x8x20xf32>
    %309 = tpu.matmul %308, %297, %cst_201 {dimension_numbers = #tpu.dot_dimension_numbers<[2], [1], [1], [2], [0, 0, 0, 1, 1, 2], [0], [0]>} : vector<2x8x8xf32>, vector<2x8x20xf32>, vector<2x8x20xf32> -> vector<2x8x20xf32>
    "tpu.trace_stop"() : () -> ()
    %310 = vector.shape_cast %309 : vector<2x8x20xf32> to vector<16x20xf32>
    %c3_202 = arith.constant 3 : index
    %c0_203 = arith.constant 0 : index
    %c0_204 = arith.constant 0 : index
    %311 = vector.load %arg5[%c3_202, %c0_203, %c0_204] : memref<4x20x20xf32, #tpu.memory_space<vmem>>, vector<1x20x20xf32>
    %312 = vector.shape_cast %311 : vector<1x20x20xf32> to vector<20x20xf32>
    %cst_205 = arith.constant dense<0.000000e+00> : vector<16x20xf32>
    %313 = tpu.matmul %310, %312, %cst_205 {dimension_numbers = #tpu.dot_dimension_numbers<[1], [0], [0], [1], [0, 0, 1, 1], [], []>} : vector<16x20xf32>, vector<20x20xf32>, vector<16x20xf32> -> vector<16x20xf32>
    %314 = arith.addf %285, %313 : vector<16x20xf32>
    %c0_206 = arith.constant 0 : index
    %c0_207 = arith.constant 0 : index
    %315 = vector.load %arg2[%c0_206, %c0_207] : memref<1x20xf32, #tpu.memory_space<vmem>>, vector<1x20xf32>
    %316 = vector.broadcast %315 : vector<1x20xf32> to vector<16x20xf32>
    %317 = arith.addf %314, %316 : vector<16x20xf32>
    %318 = arith.addf %317, %199 : vector<16x20xf32>
    %cst_208 = arith.constant dense<0.000000e+00> : vector<16xf32>
    %319 = vector.multi_reduction <add>, %318, %cst_208 [1] : vector<16x20xf32> to vector<16xf32>
    %320 = vector.shape_cast %319 : vector<16xf32> to vector<16x1xf32>
    %cst_209 = arith.constant 2.000000e+01 : f32
    %321 = vector.broadcast %cst_209 : f32 to vector<16x1xf32>
    %322 = arith.divf %320, %321 : vector<16x1xf32>
    %323 = vector.broadcast %322 : vector<16x1xf32> to vector<16x20xf32>
    %324 = arith.subf %318, %323 : vector<16x20xf32>
    %325 = arith.mulf %324, %324 : vector<16x20xf32>
    %cst_210 = arith.constant dense<0.000000e+00> : vector<16xf32>
    %326 = vector.multi_reduction <add>, %325, %cst_210 [1] : vector<16x20xf32> to vector<16xf32>
    %327 = vector.shape_cast %326 : vector<16xf32> to vector<16x1xf32>
    %cst_211 = arith.constant 2.000000e+01 : f32
    %328 = vector.broadcast %cst_211 : f32 to vector<16x1xf32>
    %329 = arith.divf %327, %328 : vector<16x1xf32>
    %330 = vector.broadcast %322 : vector<16x1xf32> to vector<16x20xf32>
    %331 = arith.subf %318, %330 : vector<16x20xf32>
    %cst_212 = arith.constant 9.99999974E-6 : f32
    %332 = vector.broadcast %cst_212 : f32 to vector<16x1xf32>
    %333 = arith.addf %329, %332 : vector<16x1xf32>
    %334 = math.rsqrt %333 : vector<16x1xf32>
    %335 = vector.broadcast %334 : vector<16x1xf32> to vector<16x20xf32>
    %336 = arith.mulf %331, %335 : vector<16x20xf32>
    %c0_213 = arith.constant 0 : index
    %c0_214 = arith.constant 0 : index
    %337 = vector.load %arg19[%c0_213, %c0_214] : memref<1x20xf32, #tpu.memory_space<vmem>>, vector<1x20xf32>
    %338 = vector.broadcast %337 : vector<1x20xf32> to vector<16x20xf32>
    %339 = arith.mulf %336, %338 : vector<16x20xf32>
    %c0_215 = arith.constant 0 : index
    %c0_216 = arith.constant 0 : index
    %340 = vector.load %arg12[%c0_215, %c0_216] : memref<1x20xf32, #tpu.memory_space<vmem>>, vector<1x20xf32>
    %341 = vector.broadcast %340 : vector<1x20xf32> to vector<16x20xf32>
    %342 = arith.addf %339, %341 : vector<16x20xf32>
    %c0_217 = arith.constant 0 : index
    %c0_218 = arith.constant 0 : index
    %c0_219 = arith.constant 0 : index
    %343 = vector.load %arg9[%c0_217, %c0_218, %c0_219] : memref<4x20x20xf32, #tpu.memory_space<vmem>>, vector<1x20x20xf32>
    %344 = vector.shape_cast %343 : vector<1x20x20xf32> to vector<20x20xf32>
    %cst_220 = arith.constant dense<0.000000e+00> : vector<16x20xf32>
    %345 = tpu.matmul %342, %344, %cst_220 {dimension_numbers = #tpu.dot_dimension_numbers<[1], [0], [0], [1], [0, 0, 1, 1], [], []>} : vector<16x20xf32>, vector<20x20xf32>, vector<16x20xf32> -> vector<16x20xf32>
    %346 = vector.shape_cast %345 : vector<16x20xf32> to vector<2x8x20xf32>
    %c0_221 = arith.constant 0 : index
    %c0_222 = arith.constant 0 : index
    %c0_223 = arith.constant 0 : index
    %347 = vector.load %arg8[%c0_221, %c0_222, %c0_223] : memref<4x20x20xf32, #tpu.memory_space<vmem>>, vector<1x20x20xf32>
    %348 = vector.shape_cast %347 : vector<1x20x20xf32> to vector<20x20xf32>
    %cst_224 = arith.constant dense<0.000000e+00> : vector<16x20xf32>
    %349 = tpu.matmul %189, %348, %cst_224 {dimension_numbers = #tpu.dot_dimension_numbers<[1], [0], [0], [1], [0, 0, 1, 1], [], []>} : vector<16x20xf32>, vector<20x20xf32>, vector<16x20xf32> -> vector<16x20xf32>
    %350 = vector.shape_cast %349 : vector<16x20xf32> to vector<2x8x20xf32>
    %c0_225 = arith.constant 0 : index
    %c0_226 = arith.constant 0 : index
    %c0_227 = arith.constant 0 : index
    %351 = vector.load %arg11[%c0_225, %c0_226, %c0_227] : memref<4x20x20xf32, #tpu.memory_space<vmem>>, vector<1x20x20xf32>
    %352 = vector.shape_cast %351 : vector<1x20x20xf32> to vector<20x20xf32>
    %cst_228 = arith.constant dense<0.000000e+00> : vector<16x20xf32>
    %353 = tpu.matmul %189, %352, %cst_228 {dimension_numbers = #tpu.dot_dimension_numbers<[1], [0], [0], [1], [0, 0, 1, 1], [], []>} : vector<16x20xf32>, vector<20x20xf32>, vector<16x20xf32> -> vector<16x20xf32>
    %354 = vector.shape_cast %353 : vector<16x20xf32> to vector<2x8x20xf32>
    "tpu.trace_start"() <{level = 10 : i32, message = "bqd,bkd->bqk"}> : () -> ()
    %cst_229 = arith.constant dense<0.000000e+00> : vector<2x8x8xf32>
    %355 = tpu.matmul %346, %350, %cst_229 {dimension_numbers = #tpu.dot_dimension_numbers<[2], [2], [1], [1], [0, 0, 0, 1, 1, 1], [0], [0]>} : vector<2x8x20xf32>, vector<2x8x20xf32>, vector<2x8x8xf32> -> vector<2x8x8xf32>
    "tpu.trace_stop"() : () -> ()
    %cst_230 = arith.constant dense<0xFF800000> : vector<2x8xf32>
    %356 = vector.multi_reduction <maximumf>, %355, %cst_230 [2] : vector<2x8x8xf32> to vector<2x8xf32>
    %357 = vector.shape_cast %356 : vector<2x8xf32> to vector<2x8x1xf32>
    %358 = vector.broadcast %357 : vector<2x8x1xf32> to vector<2x8x8xf32>
    %359 = arith.subf %355, %358 : vector<2x8x8xf32>
    %360 = math.exp %359 : vector<2x8x8xf32>
    %cst_231 = arith.constant dense<0.000000e+00> : vector<2x8xf32>
    %361 = vector.multi_reduction <add>, %360, %cst_231 [2] : vector<2x8x8xf32> to vector<2x8xf32>
    %362 = vector.shape_cast %361 : vector<2x8xf32> to vector<2x8x1xf32>
    %363 = tpu.reciprocal %362 {approx = true} : vector<2x8x1xf32> -> vector<2x8x1xf32>
    %364 = vector.broadcast %363 : vector<2x8x1xf32> to vector<2x8x8xf32>
    %365 = arith.mulf %360, %364 : vector<2x8x8xf32>
    "tpu.trace_start"() <{level = 10 : i32, message = "bqk,bkd->bqd"}> : () -> ()
    %cst_232 = arith.constant dense<0.000000e+00> : vector<2x8x20xf32>
    %366 = tpu.matmul %365, %354, %cst_232 {dimension_numbers = #tpu.dot_dimension_numbers<[2], [1], [1], [2], [0, 0, 0, 1, 1, 2], [0], [0]>} : vector<2x8x8xf32>, vector<2x8x20xf32>, vector<2x8x20xf32> -> vector<2x8x20xf32>
    "tpu.trace_stop"() : () -> ()
    %367 = vector.shape_cast %366 : vector<2x8x20xf32> to vector<16x20xf32>
    %c0_233 = arith.constant 0 : index
    %c0_234 = arith.constant 0 : index
    %c0_235 = arith.constant 0 : index
    %368 = vector.load %arg10[%c0_233, %c0_234, %c0_235] : memref<4x20x20xf32, #tpu.memory_space<vmem>>, vector<1x20x20xf32>
    %369 = vector.shape_cast %368 : vector<1x20x20xf32> to vector<20x20xf32>
    %cst_236 = arith.constant dense<0.000000e+00> : vector<16x20xf32>
    %370 = tpu.matmul %367, %369, %cst_236 {dimension_numbers = #tpu.dot_dimension_numbers<[1], [0], [0], [1], [0, 0, 1, 1], [], []>} : vector<16x20xf32>, vector<20x20xf32>, vector<16x20xf32> -> vector<16x20xf32>
    %c1_237 = arith.constant 1 : index
    %c0_238 = arith.constant 0 : index
    %c0_239 = arith.constant 0 : index
    %371 = vector.load %arg9[%c1_237, %c0_238, %c0_239] : memref<4x20x20xf32, #tpu.memory_space<vmem>>, vector<1x20x20xf32>
    %372 = vector.shape_cast %371 : vector<1x20x20xf32> to vector<20x20xf32>
    %cst_240 = arith.constant dense<0.000000e+00> : vector<16x20xf32>
    %373 = tpu.matmul %342, %372, %cst_240 {dimension_numbers = #tpu.dot_dimension_numbers<[1], [0], [0], [1], [0, 0, 1, 1], [], []>} : vector<16x20xf32>, vector<20x20xf32>, vector<16x20xf32> -> vector<16x20xf32>
    %374 = vector.shape_cast %373 : vector<16x20xf32> to vector<2x8x20xf32>
    %c1_241 = arith.constant 1 : index
    %c0_242 = arith.constant 0 : index
    %c0_243 = arith.constant 0 : index
    %375 = vector.load %arg8[%c1_241, %c0_242, %c0_243] : memref<4x20x20xf32, #tpu.memory_space<vmem>>, vector<1x20x20xf32>
    %376 = vector.shape_cast %375 : vector<1x20x20xf32> to vector<20x20xf32>
    %cst_244 = arith.constant dense<0.000000e+00> : vector<16x20xf32>
    %377 = tpu.matmul %189, %376, %cst_244 {dimension_numbers = #tpu.dot_dimension_numbers<[1], [0], [0], [1], [0, 0, 1, 1], [], []>} : vector<16x20xf32>, vector<20x20xf32>, vector<16x20xf32> -> vector<16x20xf32>
    %378 = vector.shape_cast %377 : vector<16x20xf32> to vector<2x8x20xf32>
    %c1_245 = arith.constant 1 : index
    %c0_246 = arith.constant 0 : index
    %c0_247 = arith.constant 0 : index
    %379 = vector.load %arg11[%c1_245, %c0_246, %c0_247] : memref<4x20x20xf32, #tpu.memory_space<vmem>>, vector<1x20x20xf32>
    %380 = vector.shape_cast %379 : vector<1x20x20xf32> to vector<20x20xf32>
    %cst_248 = arith.constant dense<0.000000e+00> : vector<16x20xf32>
    %381 = tpu.matmul %189, %380, %cst_248 {dimension_numbers = #tpu.dot_dimension_numbers<[1], [0], [0], [1], [0, 0, 1, 1], [], []>} : vector<16x20xf32>, vector<20x20xf32>, vector<16x20xf32> -> vector<16x20xf32>
    %382 = vector.shape_cast %381 : vector<16x20xf32> to vector<2x8x20xf32>
    "tpu.trace_start"() <{level = 10 : i32, message = "bqd,bkd->bqk"}> : () -> ()
    %cst_249 = arith.constant dense<0.000000e+00> : vector<2x8x8xf32>
    %383 = tpu.matmul %374, %378, %cst_249 {dimension_numbers = #tpu.dot_dimension_numbers<[2], [2], [1], [1], [0, 0, 0, 1, 1, 1], [0], [0]>} : vector<2x8x20xf32>, vector<2x8x20xf32>, vector<2x8x8xf32> -> vector<2x8x8xf32>
    "tpu.trace_stop"() : () -> ()
    %cst_250 = arith.constant dense<0xFF800000> : vector<2x8xf32>
    %384 = vector.multi_reduction <maximumf>, %383, %cst_250 [2] : vector<2x8x8xf32> to vector<2x8xf32>
    %385 = vector.shape_cast %384 : vector<2x8xf32> to vector<2x8x1xf32>
    %386 = vector.broadcast %385 : vector<2x8x1xf32> to vector<2x8x8xf32>
    %387 = arith.subf %383, %386 : vector<2x8x8xf32>
    %388 = math.exp %387 : vector<2x8x8xf32>
    %cst_251 = arith.constant dense<0.000000e+00> : vector<2x8xf32>
    %389 = vector.multi_reduction <add>, %388, %cst_251 [2] : vector<2x8x8xf32> to vector<2x8xf32>
    %390 = vector.shape_cast %389 : vector<2x8xf32> to vector<2x8x1xf32>
    %391 = tpu.reciprocal %390 {approx = true} : vector<2x8x1xf32> -> vector<2x8x1xf32>
    %392 = vector.broadcast %391 : vector<2x8x1xf32> to vector<2x8x8xf32>
    %393 = arith.mulf %388, %392 : vector<2x8x8xf32>
    "tpu.trace_start"() <{level = 10 : i32, message = "bqk,bkd->bqd"}> : () -> ()
    %cst_252 = arith.constant dense<0.000000e+00> : vector<2x8x20xf32>
    %394 = tpu.matmul %393, %382, %cst_252 {dimension_numbers = #tpu.dot_dimension_numbers<[2], [1], [1], [2], [0, 0, 0, 1, 1, 2], [0], [0]>} : vector<2x8x8xf32>, vector<2x8x20xf32>, vector<2x8x20xf32> -> vector<2x8x20xf32>
    "tpu.trace_stop"() : () -> ()
    %395 = vector.shape_cast %394 : vector<2x8x20xf32> to vector<16x20xf32>
    %c1_253 = arith.constant 1 : index
    %c0_254 = arith.constant 0 : index
    %c0_255 = arith.constant 0 : index
    %396 = vector.load %arg10[%c1_253, %c0_254, %c0_255] : memref<4x20x20xf32, #tpu.memory_space<vmem>>, vector<1x20x20xf32>
    %397 = vector.shape_cast %396 : vector<1x20x20xf32> to vector<20x20xf32>
    %cst_256 = arith.constant dense<0.000000e+00> : vector<16x20xf32>
    %398 = tpu.matmul %395, %397, %cst_256 {dimension_numbers = #tpu.dot_dimension_numbers<[1], [0], [0], [1], [0, 0, 1, 1], [], []>} : vector<16x20xf32>, vector<20x20xf32>, vector<16x20xf32> -> vector<16x20xf32>
    %399 = arith.addf %370, %398 : vector<16x20xf32>
    %c2_257 = arith.constant 2 : index
    %c0_258 = arith.constant 0 : index
    %c0_259 = arith.constant 0 : index
    %400 = vector.load %arg9[%c2_257, %c0_258, %c0_259] : memref<4x20x20xf32, #tpu.memory_space<vmem>>, vector<1x20x20xf32>
    %401 = vector.shape_cast %400 : vector<1x20x20xf32> to vector<20x20xf32>
    %cst_260 = arith.constant dense<0.000000e+00> : vector<16x20xf32>
    %402 = tpu.matmul %342, %401, %cst_260 {dimension_numbers = #tpu.dot_dimension_numbers<[1], [0], [0], [1], [0, 0, 1, 1], [], []>} : vector<16x20xf32>, vector<20x20xf32>, vector<16x20xf32> -> vector<16x20xf32>
    %403 = vector.shape_cast %402 : vector<16x20xf32> to vector<2x8x20xf32>
    %c2_261 = arith.constant 2 : index
    %c0_262 = arith.constant 0 : index
    %c0_263 = arith.constant 0 : index
    %404 = vector.load %arg8[%c2_261, %c0_262, %c0_263] : memref<4x20x20xf32, #tpu.memory_space<vmem>>, vector<1x20x20xf32>
    %405 = vector.shape_cast %404 : vector<1x20x20xf32> to vector<20x20xf32>
    %cst_264 = arith.constant dense<0.000000e+00> : vector<16x20xf32>
    %406 = tpu.matmul %189, %405, %cst_264 {dimension_numbers = #tpu.dot_dimension_numbers<[1], [0], [0], [1], [0, 0, 1, 1], [], []>} : vector<16x20xf32>, vector<20x20xf32>, vector<16x20xf32> -> vector<16x20xf32>
    %407 = vector.shape_cast %406 : vector<16x20xf32> to vector<2x8x20xf32>
    %c2_265 = arith.constant 2 : index
    %c0_266 = arith.constant 0 : index
    %c0_267 = arith.constant 0 : index
    %408 = vector.load %arg11[%c2_265, %c0_266, %c0_267] : memref<4x20x20xf32, #tpu.memory_space<vmem>>, vector<1x20x20xf32>
    %409 = vector.shape_cast %408 : vector<1x20x20xf32> to vector<20x20xf32>
    %cst_268 = arith.constant dense<0.000000e+00> : vector<16x20xf32>
    %410 = tpu.matmul %189, %409, %cst_268 {dimension_numbers = #tpu.dot_dimension_numbers<[1], [0], [0], [1], [0, 0, 1, 1], [], []>} : vector<16x20xf32>, vector<20x20xf32>, vector<16x20xf32> -> vector<16x20xf32>
    %411 = vector.shape_cast %410 : vector<16x20xf32> to vector<2x8x20xf32>
    "tpu.trace_start"() <{level = 10 : i32, message = "bqd,bkd->bqk"}> : () -> ()
    %cst_269 = arith.constant dense<0.000000e+00> : vector<2x8x8xf32>
    %412 = tpu.matmul %403, %407, %cst_269 {dimension_numbers = #tpu.dot_dimension_numbers<[2], [2], [1], [1], [0, 0, 0, 1, 1, 1], [0], [0]>} : vector<2x8x20xf32>, vector<2x8x20xf32>, vector<2x8x8xf32> -> vector<2x8x8xf32>
    "tpu.trace_stop"() : () -> ()
    %cst_270 = arith.constant dense<0xFF800000> : vector<2x8xf32>
    %413 = vector.multi_reduction <maximumf>, %412, %cst_270 [2] : vector<2x8x8xf32> to vector<2x8xf32>
    %414 = vector.shape_cast %413 : vector<2x8xf32> to vector<2x8x1xf32>
    %415 = vector.broadcast %414 : vector<2x8x1xf32> to vector<2x8x8xf32>
    %416 = arith.subf %412, %415 : vector<2x8x8xf32>
    %417 = math.exp %416 : vector<2x8x8xf32>
    %cst_271 = arith.constant dense<0.000000e+00> : vector<2x8xf32>
    %418 = vector.multi_reduction <add>, %417, %cst_271 [2] : vector<2x8x8xf32> to vector<2x8xf32>
    %419 = vector.shape_cast %418 : vector<2x8xf32> to vector<2x8x1xf32>
    %420 = tpu.reciprocal %419 {approx = true} : vector<2x8x1xf32> -> vector<2x8x1xf32>
    %421 = vector.broadcast %420 : vector<2x8x1xf32> to vector<2x8x8xf32>
    %422 = arith.mulf %417, %421 : vector<2x8x8xf32>
    "tpu.trace_start"() <{level = 10 : i32, message = "bqk,bkd->bqd"}> : () -> ()
    %cst_272 = arith.constant dense<0.000000e+00> : vector<2x8x20xf32>
    %423 = tpu.matmul %422, %411, %cst_272 {dimension_numbers = #tpu.dot_dimension_numbers<[2], [1], [1], [2], [0, 0, 0, 1, 1, 2], [0], [0]>} : vector<2x8x8xf32>, vector<2x8x20xf32>, vector<2x8x20xf32> -> vector<2x8x20xf32>
    "tpu.trace_stop"() : () -> ()
    %424 = vector.shape_cast %423 : vector<2x8x20xf32> to vector<16x20xf32>
    %c2_273 = arith.constant 2 : index
    %c0_274 = arith.constant 0 : index
    %c0_275 = arith.constant 0 : index
    %425 = vector.load %arg10[%c2_273, %c0_274, %c0_275] : memref<4x20x20xf32, #tpu.memory_space<vmem>>, vector<1x20x20xf32>
    %426 = vector.shape_cast %425 : vector<1x20x20xf32> to vector<20x20xf32>
    %cst_276 = arith.constant dense<0.000000e+00> : vector<16x20xf32>
    %427 = tpu.matmul %424, %426, %cst_276 {dimension_numbers = #tpu.dot_dimension_numbers<[1], [0], [0], [1], [0, 0, 1, 1], [], []>} : vector<16x20xf32>, vector<20x20xf32>, vector<16x20xf32> -> vector<16x20xf32>
    %428 = arith.addf %399, %427 : vector<16x20xf32>
    %c3_277 = arith.constant 3 : index
    %c0_278 = arith.constant 0 : index
    %c0_279 = arith.constant 0 : index
    %429 = vector.load %arg9[%c3_277, %c0_278, %c0_279] : memref<4x20x20xf32, #tpu.memory_space<vmem>>, vector<1x20x20xf32>
    %430 = vector.shape_cast %429 : vector<1x20x20xf32> to vector<20x20xf32>
    %cst_280 = arith.constant dense<0.000000e+00> : vector<16x20xf32>
    %431 = tpu.matmul %342, %430, %cst_280 {dimension_numbers = #tpu.dot_dimension_numbers<[1], [0], [0], [1], [0, 0, 1, 1], [], []>} : vector<16x20xf32>, vector<20x20xf32>, vector<16x20xf32> -> vector<16x20xf32>
    %432 = vector.shape_cast %431 : vector<16x20xf32> to vector<2x8x20xf32>
    %c3_281 = arith.constant 3 : index
    %c0_282 = arith.constant 0 : index
    %c0_283 = arith.constant 0 : index
    %433 = vector.load %arg8[%c3_281, %c0_282, %c0_283] : memref<4x20x20xf32, #tpu.memory_space<vmem>>, vector<1x20x20xf32>
    %434 = vector.shape_cast %433 : vector<1x20x20xf32> to vector<20x20xf32>
    %cst_284 = arith.constant dense<0.000000e+00> : vector<16x20xf32>
    %435 = tpu.matmul %189, %434, %cst_284 {dimension_numbers = #tpu.dot_dimension_numbers<[1], [0], [0], [1], [0, 0, 1, 1], [], []>} : vector<16x20xf32>, vector<20x20xf32>, vector<16x20xf32> -> vector<16x20xf32>
    %436 = vector.shape_cast %435 : vector<16x20xf32> to vector<2x8x20xf32>
    %c3_285 = arith.constant 3 : index
    %c0_286 = arith.constant 0 : index
    %c0_287 = arith.constant 0 : index
    %437 = vector.load %arg11[%c3_285, %c0_286, %c0_287] : memref<4x20x20xf32, #tpu.memory_space<vmem>>, vector<1x20x20xf32>
    %438 = vector.shape_cast %437 : vector<1x20x20xf32> to vector<20x20xf32>
    %cst_288 = arith.constant dense<0.000000e+00> : vector<16x20xf32>
    %439 = tpu.matmul %189, %438, %cst_288 {dimension_numbers = #tpu.dot_dimension_numbers<[1], [0], [0], [1], [0, 0, 1, 1], [], []>} : vector<16x20xf32>, vector<20x20xf32>, vector<16x20xf32> -> vector<16x20xf32>
    %440 = vector.shape_cast %439 : vector<16x20xf32> to vector<2x8x20xf32>
    "tpu.trace_start"() <{level = 10 : i32, message = "bqd,bkd->bqk"}> : () -> ()
    %cst_289 = arith.constant dense<0.000000e+00> : vector<2x8x8xf32>
    %441 = tpu.matmul %432, %436, %cst_289 {dimension_numbers = #tpu.dot_dimension_numbers<[2], [2], [1], [1], [0, 0, 0, 1, 1, 1], [0], [0]>} : vector<2x8x20xf32>, vector<2x8x20xf32>, vector<2x8x8xf32> -> vector<2x8x8xf32>
    "tpu.trace_stop"() : () -> ()
    %cst_290 = arith.constant dense<0xFF800000> : vector<2x8xf32>
    %442 = vector.multi_reduction <maximumf>, %441, %cst_290 [2] : vector<2x8x8xf32> to vector<2x8xf32>
    %443 = vector.shape_cast %442 : vector<2x8xf32> to vector<2x8x1xf32>
    %444 = vector.broadcast %443 : vector<2x8x1xf32> to vector<2x8x8xf32>
    %445 = arith.subf %441, %444 : vector<2x8x8xf32>
    %446 = math.exp %445 : vector<2x8x8xf32>
    %cst_291 = arith.constant dense<0.000000e+00> : vector<2x8xf32>
    %447 = vector.multi_reduction <add>, %446, %cst_291 [2] : vector<2x8x8xf32> to vector<2x8xf32>
    %448 = vector.shape_cast %447 : vector<2x8xf32> to vector<2x8x1xf32>
    %449 = tpu.reciprocal %448 {approx = true} : vector<2x8x1xf32> -> vector<2x8x1xf32>
    %450 = vector.broadcast %449 : vector<2x8x1xf32> to vector<2x8x8xf32>
    %451 = arith.mulf %446, %450 : vector<2x8x8xf32>
    "tpu.trace_start"() <{level = 10 : i32, message = "bqk,bkd->bqd"}> : () -> ()
    %cst_292 = arith.constant dense<0.000000e+00> : vector<2x8x20xf32>
    %452 = tpu.matmul %451, %440, %cst_292 {dimension_numbers = #tpu.dot_dimension_numbers<[2], [1], [1], [2], [0, 0, 0, 1, 1, 2], [0], [0]>} : vector<2x8x8xf32>, vector<2x8x20xf32>, vector<2x8x20xf32> -> vector<2x8x20xf32>
    "tpu.trace_stop"() : () -> ()
    %453 = vector.shape_cast %452 : vector<2x8x20xf32> to vector<16x20xf32>
    %c3_293 = arith.constant 3 : index
    %c0_294 = arith.constant 0 : index
    %c0_295 = arith.constant 0 : index
    %454 = vector.load %arg10[%c3_293, %c0_294, %c0_295] : memref<4x20x20xf32, #tpu.memory_space<vmem>>, vector<1x20x20xf32>
    %455 = vector.shape_cast %454 : vector<1x20x20xf32> to vector<20x20xf32>
    %cst_296 = arith.constant dense<0.000000e+00> : vector<16x20xf32>
    %456 = tpu.matmul %453, %455, %cst_296 {dimension_numbers = #tpu.dot_dimension_numbers<[1], [0], [0], [1], [0, 0, 1, 1], [], []>} : vector<16x20xf32>, vector<20x20xf32>, vector<16x20xf32> -> vector<16x20xf32>
    %457 = arith.addf %428, %456 : vector<16x20xf32>
    %c0_297 = arith.constant 0 : index
    %c0_298 = arith.constant 0 : index
    %458 = vector.load %arg7[%c0_297, %c0_298] : memref<1x20xf32, #tpu.memory_space<vmem>>, vector<1x20xf32>
    %459 = vector.broadcast %458 : vector<1x20xf32> to vector<16x20xf32>
    %460 = arith.addf %457, %459 : vector<16x20xf32>
    %461 = arith.addf %460, %342 : vector<16x20xf32>
    %cst_299 = arith.constant dense<0.000000e+00> : vector<16xf32>
    %462 = vector.multi_reduction <add>, %461, %cst_299 [1] : vector<16x20xf32> to vector<16xf32>
    %463 = vector.shape_cast %462 : vector<16xf32> to vector<16x1xf32>
    %cst_300 = arith.constant 2.000000e+01 : f32
    %464 = vector.broadcast %cst_300 : f32 to vector<16x1xf32>
    %465 = arith.divf %463, %464 : vector<16x1xf32>
    %466 = vector.broadcast %465 : vector<16x1xf32> to vector<16x20xf32>
    %467 = arith.subf %461, %466 : vector<16x20xf32>
    %468 = arith.mulf %467, %467 : vector<16x20xf32>
    %cst_301 = arith.constant dense<0.000000e+00> : vector<16xf32>
    %469 = vector.multi_reduction <add>, %468, %cst_301 [1] : vector<16x20xf32> to vector<16xf32>
    %470 = vector.shape_cast %469 : vector<16xf32> to vector<16x1xf32>
    %cst_302 = arith.constant 2.000000e+01 : f32
    %471 = vector.broadcast %cst_302 : f32 to vector<16x1xf32>
    %472 = arith.divf %470, %471 : vector<16x1xf32>
    %473 = vector.broadcast %465 : vector<16x1xf32> to vector<16x20xf32>
    %474 = arith.subf %461, %473 : vector<16x20xf32>
    %cst_303 = arith.constant 9.99999974E-6 : f32
    %475 = vector.broadcast %cst_303 : f32 to vector<16x1xf32>
    %476 = arith.addf %472, %475 : vector<16x1xf32>
    %477 = math.rsqrt %476 : vector<16x1xf32>
    %478 = vector.broadcast %477 : vector<16x1xf32> to vector<16x20xf32>
    %479 = arith.mulf %474, %478 : vector<16x20xf32>
    %c0_304 = arith.constant 0 : index
    %c0_305 = arith.constant 0 : index
    %480 = vector.load %arg20[%c0_304, %c0_305] : memref<1x20xf32, #tpu.memory_space<vmem>>, vector<1x20xf32>
    %481 = vector.broadcast %480 : vector<1x20xf32> to vector<16x20xf32>
    %482 = arith.mulf %479, %481 : vector<16x20xf32>
    %c0_306 = arith.constant 0 : index
    %c0_307 = arith.constant 0 : index
    %483 = vector.load %arg13[%c0_306, %c0_307] : memref<1x20xf32, #tpu.memory_space<vmem>>, vector<1x20xf32>
    %484 = vector.broadcast %483 : vector<1x20xf32> to vector<16x20xf32>
    %485 = arith.addf %482, %484 : vector<16x20xf32>
    %c0_308 = arith.constant 0 : index
    %c0_309 = arith.constant 0 : index
    %486 = vector.load %arg17[%c0_308, %c0_309] : memref<20x80xf32, #tpu.memory_space<vmem>>, vector<20x80xf32>
    %cst_310 = arith.constant dense<0.000000e+00> : vector<16x80xf32>
    %487 = tpu.matmul %485, %486, %cst_310 {dimension_numbers = #tpu.dot_dimension_numbers<[1], [0], [0], [1], [0, 0, 1, 1], [], []>} : vector<16x20xf32>, vector<20x80xf32>, vector<16x80xf32> -> vector<16x80xf32>
    %c0_311 = arith.constant 0 : index
    %c0_312 = arith.constant 0 : index
    %488 = vector.load %arg15[%c0_311, %c0_312] : memref<1x80xf32, #tpu.memory_space<vmem>>, vector<1x80xf32>
    %489 = vector.broadcast %488 : vector<1x80xf32> to vector<16x80xf32>
    %490 = arith.addf %487, %489 : vector<16x80xf32>
    %cst_313 = arith.constant 0.000000e+00 : f32
    %491 = vector.broadcast %cst_313 : f32 to vector<16x80xf32>
    %492 = arith.maximumf %490, %491 : vector<16x80xf32>
    %c0_314 = arith.constant 0 : index
    %c0_315 = arith.constant 0 : index
    %493 = vector.load %arg18[%c0_314, %c0_315] : memref<80x20xf32, #tpu.memory_space<vmem>>, vector<80x20xf32>
    %cst_316 = arith.constant dense<0.000000e+00> : vector<16x20xf32>
    %494 = tpu.matmul %492, %493, %cst_316 {dimension_numbers = #tpu.dot_dimension_numbers<[1], [0], [0], [1], [0, 0, 1, 1], [], []>} : vector<16x80xf32>, vector<80x20xf32>, vector<16x20xf32> -> vector<16x20xf32>
    %c0_317 = arith.constant 0 : index
    %c0_318 = arith.constant 0 : index
    %495 = vector.load %arg16[%c0_317, %c0_318] : memref<1x20xf32, #tpu.memory_space<vmem>>, vector<1x20xf32>
    %496 = vector.broadcast %495 : vector<1x20xf32> to vector<16x20xf32>
    %497 = arith.addf %494, %496 : vector<16x20xf32>
    %498 = arith.addf %497, %485 : vector<16x20xf32>
    %cst_319 = arith.constant dense<0.000000e+00> : vector<16xf32>
    %499 = vector.multi_reduction <add>, %498, %cst_319 [1] : vector<16x20xf32> to vector<16xf32>
    %500 = vector.shape_cast %499 : vector<16xf32> to vector<16x1xf32>
    %cst_320 = arith.constant 2.000000e+01 : f32
    %501 = vector.broadcast %cst_320 : f32 to vector<16x1xf32>
    %502 = arith.divf %500, %501 : vector<16x1xf32>
    %503 = vector.broadcast %502 : vector<16x1xf32> to vector<16x20xf32>
    %504 = arith.subf %498, %503 : vector<16x20xf32>
    %505 = arith.mulf %504, %504 : vector<16x20xf32>
    %cst_321 = arith.constant dense<0.000000e+00> : vector<16xf32>
    %506 = vector.multi_reduction <add>, %505, %cst_321 [1] : vector<16x20xf32> to vector<16xf32>
    %507 = vector.shape_cast %506 : vector<16xf32> to vector<16x1xf32>
    %cst_322 = arith.constant 2.000000e+01 : f32
    %508 = vector.broadcast %cst_322 : f32 to vector<16x1xf32>
    %509 = arith.divf %507, %508 : vector<16x1xf32>
    %510 = vector.broadcast %502 : vector<16x1xf32> to vector<16x20xf32>
    %511 = arith.subf %498, %510 : vector<16x20xf32>
    %cst_323 = arith.constant 9.99999974E-6 : f32
    %512 = vector.broadcast %cst_323 : f32 to vector<16x1xf32>
    %513 = arith.addf %509, %512 : vector<16x1xf32>
    %514 = math.rsqrt %513 : vector<16x1xf32>
    %515 = vector.broadcast %514 : vector<16x1xf32> to vector<16x20xf32>
    %516 = arith.mulf %511, %515 : vector<16x20xf32>
    %c0_324 = arith.constant 0 : index
    %c0_325 = arith.constant 0 : index
    %517 = vector.load %arg21[%c0_324, %c0_325] : memref<1x20xf32, #tpu.memory_space<vmem>>, vector<1x20xf32>
    %518 = vector.broadcast %517 : vector<1x20xf32> to vector<16x20xf32>
    %519 = arith.mulf %516, %518 : vector<16x20xf32>
    %c0_326 = arith.constant 0 : index
    %c0_327 = arith.constant 0 : index
    %520 = vector.load %arg14[%c0_326, %c0_327] : memref<1x20xf32, #tpu.memory_space<vmem>>, vector<1x20xf32>
    %521 = vector.broadcast %520 : vector<1x20xf32> to vector<16x20xf32>
    %522 = arith.addf %519, %521 : vector<16x20xf32>
    %c0_328 = arith.constant 0 : index
    %c0_329 = arith.constant 0 : index
    %523 = vector.load %arg38[%c0_328, %c0_329] : memref<20x1xf32, #tpu.memory_space<vmem>>, vector<20x1xf32>
    %cst_330 = arith.constant dense<0.000000e+00> : vector<16x1xf32>
    %524 = tpu.matmul %522, %523, %cst_330 {dimension_numbers = #tpu.dot_dimension_numbers<[1], [0], [0], [1], [0, 0, 1, 1], [], []>} : vector<16x20xf32>, vector<20x1xf32>, vector<16x1xf32> -> vector<16x1xf32>
    %c0_331 = arith.constant 0 : index
    %c0_332 = arith.constant 0 : index
    %525 = vector.load %arg37[%c0_331, %c0_332] : memref<1x1xf32, #tpu.memory_space<vmem>>, vector<1x1xf32>
    %526 = vector.broadcast %525 : vector<1x1xf32> to vector<16x1xf32>
    %527 = arith.addf %524, %526 : vector<16x1xf32>
    %c0_333 = arith.constant 0 : index
    %c0_334 = arith.constant 0 : index
    %528 = vector.load %arg43[%c0_333, %c0_334] : memref<16x1xf32, #tpu.memory_space<vmem>>, vector<16x1xf32>
    tpu.vector_store %arg43[%c0_333, %c0_334], %527 {strides = array<i32>} : memref<16x1xf32, #tpu.memory_space<vmem>>, vector<16x1xf32>,
    return
  }
}

</mosaic_0001>

<bundles_post_ra>
// kernel: ml4f_transformer.1
= control target key start
LH: loop header
LB: loop body
LE: loop exit
PB: predicated region body
PF: predicated region fallthrough
CT: control target
= control target key end

     0   :  { %s10710_s3 = smov 23   ;;  %s10711_s7 = smov 41   ;;  %vm197_vm0 = vcmask 1044480   ;;  %vm190_vm1 = vcmask 39936   ;;  %vm292_vm2 = vcmask 1043456   ;;  %vm285_vm3 = vcmask 162816   ;;  %s11749_s0 = inlined_call_operand.smem [shape: u32[44], index: -1, kind: input, shape index: {}] }
   0x1   :  { %s9029_s6 = sld [smem:[%s11749_s0 + %s10710_s3]]   ;;  %s10712_s11 = smov 26   ;;  %v10717_v23 = vmov 0.0   ;;  %vm10718_vm4 = vmmov 0   ;;  %vm685_vm5 = vcmask 64512   ;;  %vm3221_vm6 = vcmask 1042432  }
   0x2   :  { %s9047_s10 = sld [smem:[%s11749_s0 + %s10711_s7]]   ;;  %s10713_s15 = smov 25   ;;  %vm3214_vm7 = vcmask 23552   ;;  %vm3076_vm8 = vcmask 654336   ;;  %vm9000_vm9 = vcmask 7168  }
   0x3   :  { %s10769_s14 = sld [smem:[%s11749_s0 + %s10712_s11]]   ;;  %s10714_s19 = smov 22  }
   0x4   :  { %s10775_s18 = sld [smem:[%s11749_s0 + %s10713_s15]]   ;;  %s10715_s23 = smov 40  }
   0x5   :  { %s9028_s22 = sld [smem:[%s11749_s0 + %s10714_s19]]   ;;  %s10716_s27 = smov 28  }
   0x6   :  { %s9046_s26 = sld [smem:[%s11749_s0 + %s10715_s23]]   ;;  %s10719_s1 = smov 27  }
   0x7   :  { %v182_v0 = vld [vmem:[%s9029_s6] sm:$0x1f]  ;;  %s10792_s30 = sld [smem:[%s11749_s0 + %s10716_s27]]   ;;  %s10720_s5 = smov 24  }
   0x8   :  { %9794 = vmatprep.subr.msk.mxu0 %vm197_vm0, %v182_v0  ;;  %v180_v1 = vld [vmem:[%s9047_s10] sm:$0xff]  ;;  %v181_v2 = vld [vmem:[%s9047_s10 + $0x8] sm:$0xff]  ;;  %s10892_s4 = sld [smem:[%s11749_s0 + %s10719_s1]]   ;;  %s10721_s9 = smov 33  }
   0x9   :  { %9795 = vmatpush3.msk.msra.mxu0 %vm197_vm0, %v182_v0  ;;  %9796 = vmatprep.mubr.msk.f32.mxu0 %vm190_vm1, %v180_v1  ;;  %v284_v3 = vld [vmem:[%s10769_s14 + $0x10] sm:$0xf]  ;;  %v283_v4 = vld [vmem:[%s10769_s14 + $0x8] sm:$0xff]  ;;  %v282_v5 = vld [vmem:[%s10769_s14] sm:$0xff]  ;;  %s9030_s8 = sld [smem:[%s11749_s0 + %s10720_s5]]   ;;  %s10722_s13 = smov 1  }
   0xa   :  { %9797 = vmatmul.mubr.msk.f32.vlgmr.msra.gmra.mxu0 %vm190_vm1, %v181_v2  ;;  %9799 = vmatprep.subr.msk.mxu1 %vm292_vm2, %v284_v3  ;;  %v373_v6 = vld [vmem:[%s10775_s18 + $0x10] sm:$0xf]  ;;  %v372_v18 = vld [vmem:[%s10775_s18 + $0x8] sm:$0xff]  ;;  %v371_v19 = vld [vmem:[%s10775_s18] sm:$0xff]  ;;  %s9039_s12 = sld [smem:[%s11749_s0 + %s10721_s9]]   ;;  %s10723_s17 = smov 34  }
   0xb   :  { %9800 = vmatpush3.msk.msra.mxu1 %vm292_vm2, %v284_v3  ;;  %v9050_v7 = vld [vmem:[%s9028_s22] ss:$0 sm:$0xff]  ;;  %9826 = vmatprep.subr.mxu0 %v10717_v23  ;;  %v9077_v46 = vld [vmem:[%s10775_s18 + $0x28] sm:$0xf]  ;;  %v9075_v54 = vld [vmem:[%s10775_s18 + $0x18] sm:$0xff]  ;;  %s9007_s16 = sld [smem:[%s11749_s0 + %s10722_s13]]   ;;  %s10724_s21 = smov 35  }
   0xc   :  { %9801 = vmatprep.subr.mxu1 %v283_v4  ;;  %v278_v13 = vld [vmem:[%s9046_s26] sm:$0xff]  ;;  %v279_v14 = vld [vmem:[%s9046_s26 + $0x8] sm:$0xff]  ;;  %9828 = vmatprep.mubr.msk.f32.mxu0 %vm10718_vm4, %v10717_v23  ;;  %v9069_v57 = vld [vmem:[%s10769_s14 + $0x18] sm:$0xff]  ;;  %s11062_s20 = sld [smem:[%s11749_s0 + %s10723_s17]]   ;;  %s10725_s25 = smov 29  }
   0xd   :  { %9802 = vmatpush3.msra.mxu1 %v283_v4  ;;  %v454_v20 = vld [vmem:[%s10792_s30 + $0x10] sm:$0xf]  ;;  %v453_v21 = vld [vmem:[%s10792_s30 + $0x8] sm:$0xff]  ;;  %v452_v22 = vld [vmem:[%s10792_s30] sm:$0xff]  ;;  %s9041_s24 = sld [smem:[%s11749_s0 + %s10724_s21]]   ;;  %s10726_s29 = smov 42  }
   0xe   :  { %9803 = vmatprep.subr.mxu1 %v282_v5  ;;  %v9071_v47 = vld [vmem:[%s10769_s14 + $0x28] sm:$0xf]  ;;  %v9076_v52 = vld [vmem:[%s10775_s18 + $0x20] sm:$0xff]  ;;  %v9081_v60 = vld [vmem:[%s10792_s30 + $0x18] sm:$0xff]  ;;  %s9035_s28 = sld [smem:[%s11749_s0 + %s10725_s25]]   ;;  %s10727_s3 = smov 4  }
   0xf   :  { %9804 = vmatpush3.msra.mxu1 %v282_v5  ;;  %v9070_v56 = vld [vmem:[%s10769_s14 + $0x20] sm:$0xff]  ;;  %v9083_v58 = vld [vmem:[%s10792_s30 + $0x28] sm:$0xf]  ;;  %s9048_s2 = sld [smem:[%s11749_s0 + %s10726_s29]]   ;;  %s10728_s7 = smov 3  }
  0x10   :  { %9808 = vmatprep.subr.msk.mxu1 %vm292_vm2, %v373_v6  ;;  %v9082_v59 = vld [vmem:[%s10792_s30 + $0x20] sm:$0xff]  ;;  %s11092_s6 = sld [smem:[%s11749_s0 + %s10727_s3]]   ;;  %s10729_s11 = smov 31  }
  0x11   :  { %s11101_s10 = sld [smem:[%s11749_s0 + %s10728_s7]]   ;;  %s10731_s22 = smov 6  }
  0x12   :  { %s1_s17 = sld [smem:[%s11749_s0]]   ;;  %s10732_s26 = smov 5  }
  0x13   :  { %s11124_s25 = sld [smem:[%s11749_s0 + %s10731_s22]]   ;;  %s10746_s22 = smov 20  }
  0x14   :  { %s11227_s29 = sld [smem:[%s11749_s0 + %s10732_s26]]   ;;  %s10747_s26 = smov 13  }
  0xca   :  { %v9798_v8 = vpop.f32.mrf.mxu0 }
  0xcb   :  { %v273_v9 = vadd.f32 %v9798_v8, %v9050_v7 }
  0xcc   :  { %v267_v10 = vpop.f32.mrf.mxu0 }
  0xcd   :  { %v268_v11 = vadd.f32 %v9050_v7, %v267_v10  ;;  %v277_v12 = vmul.f32 4.472136, %v273_v9 }
  0xcf   :  { %v276_v15 = vmul.f32 4.472136, %v268_v11  ;;  %v10796_v17 = vadd.f32 %v279_v14, %v277_v12 }
  0xd1   :  { %v10794_v16 = vadd.f32 %v278_v13, %v276_v15 }
  0xd3   :  { %9805 = vmatprep.mubr.msk.f32.mxu1 %vm285_vm3, %v10794_v16 }
  0xd4   :  { %9806 = vmatmul.mubr.msk.f32.vlgmr.msra.gmra.mxu1 %vm285_vm3, %v10796_v17 }
  0xd5   :  { %9809 = vmatpush3.msk.msra.mxu1 %vm292_vm2, %v373_v6  ;;  %9814 = vmatprep.mubr.msk.f32.mxu1 %vm285_vm3, %v10794_v16 }
  0xd6   :  { %9810 = vmatprep.subr.mxu1 %v372_v18 }
  0xd7   :  { %9811 = vmatpush3.msra.mxu1 %v372_v18 }
  0xd8   :  { %9812 = vmatprep.subr.mxu1 %v371_v19 }
  0xd9   :  { %9813 = vmatpush3.msra.mxu1 %v371_v19 }
  0xda   :  { %9815 = vmatmul.mubr.msk.f32.vlgmr.msra.gmra.mxu1 %vm285_vm3, %v10796_v17  ;;  %9817 = vmatprep.subr.msk.mxu1 %vm292_vm2, %v454_v20 }
  0xdb   :  { %9818 = vmatpush3.msk.msra.mxu1 %vm292_vm2, %v454_v20  ;;  %9823 = vmatprep.mubr.msk.f32.mxu1 %vm285_vm3, %v10794_v16 }
  0xdc   :  { %9819 = vmatprep.subr.mxu1 %v453_v21 }
  0xdd   :  { %9820 = vmatpush3.msra.mxu1 %v453_v21 }
  0xde   :  { %9821 = vmatprep.subr.mxu1 %v452_v22 }
  0xdf   :  { %9822 = vmatpush3.msra.mxu1 %v452_v22 }
  0xe0   :  { %9824 = vmatmul.mubr.msk.f32.vlgmr.msra.gmra.mxu1 %vm285_vm3, %v10796_v17  ;;  %9836 = vmatprep.subr.mxu1 %v10717_v23 }
  0xe1   :  { %9838 = vmatprep.mubr.msk.f32.mxu1 %vm10718_vm4, %v10717_v23 }
 0x194   :  { %v9807_v24 = vpop.f32.mrf.mxu1 }
 0x196   :  { %v362_v25 = vpop.f32.mrf.mxu1 }
 0x19a   :  { %v9816_v26 = vpop.f32.mrf.mxu1 }
 0x19c   :  { %v443_v27 = vpop.f32.mrf.mxu1 }
 0x19d   :  { %9827 = vmatpush3.xpose.msk.msra.mxu0 %vm285_vm3, %v443_v27  ;;  %v9095_v27 = vld [vmem:[%s10892_s4 + $0x28] sm:$0xf] }
 0x19e   :  { %9831 = vmatprep.subr.mxu0 %v10717_v23 }
 0x1a0   :  { %v9825_v28 = vpop.f32.mrf.mxu1  ;;  %9829 = vmatmul.mubr.msk.f32.vlgmr.msra.gmra.mxu0 %vm285_vm3, %v362_v25 }
 0x1a1   :  { %9832 = vmatpush3.xpose.msk.msra.mxu0 %vm285_vm3, %v9816_v26  ;;  %9833 = vmatprep.mubr.msk.f32.mxu0 %vm10718_vm4, %v10717_v23  ;;  %v856_v26 = vld [vmem:[%s10892_s4 + $0x10] sm:$0xf] }
 0x1a2   :  { %v524_v29 = vpop.f32.mrf.mxu1  ;;  %9841 = vmatprep.subr.mxu0 %v10717_v23 }
 0x1a3   :  { %9837 = vmatpush3.msra.mxu1 %v524_v29 }
 0x1a4   :  { %9834 = vmatmul.mubr.msk.f32.vlgmr.msra.gmra.mxu0 %vm285_vm3, %v9807_v24  ;;  %9846 = vmatprep.subr.msk.mxu1 %vm292_vm2, %v9071_v47 }
 0x1a5   :  { %9842 = vmatpush3.msra.mxu0 %v9825_v28  ;;  %9843 = vmatprep.mubr.msk.f32.mxu0 %vm10718_vm4, %v10717_v23 }
 0x1a6   :  { %9855 = vmatprep.subr.msk.mxu0 %vm292_vm2, %v9077_v46 }
 0x260   :  { %v605_v30 = vpop.f32.mrf.mxu0 }
 0x261   :  { %v686_v35 = vsel %vm685_vm5, %v605_v30, -inf }
 0x262   :  { %v9830_v31 = vpop.f32.mrf.mxu0 }
 0x264   :  { %v681_v32 = vpop.f32.mrf.mxu0 }
 0x265   :  { %v689_v33 = vsel %vm685_vm5, %v681_v32, -inf }
 0x266   :  { %690 = vmax.xlane.f32.xlu0 %v689_v33  ;;  %v9835_v34 = vpop.f32.mrf.mxu0  ;;  %v855_v33 = vld [vmem:[%s10892_s4 + $0x8] sm:$0xff] }
 0x26a   :  { %687 = vmax.xlane.f32.xlu0 %v686_v35  ;;  %v854_v35 = vld [vmem:[%s10892_s4] sm:$0xff] }
 0x2ef   :  { %v691_v36 = vpop.xlane.xlu0 %690 }
 0x2f0   :  { %v693_v37 = vsub.f32 %v681_v32, %v691_v36  ;;  %v9094_v36 = vld [vmem:[%s10892_s4 + $0x20] sm:$0xff] }
 0x2f2   :  { %v696_v38 = vmul.f32 1.442695, %v693_v37  ;;  %v9110_v37 = vld [vmem:[%s10775_s18 + $0x40] sm:$0xf] }
 0x2f3   :  { %v688_v39 = vpop.xlane.xlu0 %687 }
 0x2f4   :  { %10594 = vpow2.f32 %v696_v38  ;;  %v692_v40 = vsub.f32 %v605_v30, %v688_v39  ;;  %v9109_v38 = vld [vmem:[%s10775_s18 + $0x38] sm:$0xff]  ;;  %v9108_v39 = vld [vmem:[%s10775_s18 + $0x30] sm:$0xff] }
 0x2f6   :  { %v694_v41 = vmul.f32 1.442695, %v692_v40  ;;  %v9093_v40 = vld [vmem:[%s10892_s4 + $0x18] sm:$0xff] }
 0x2f8   :  { %10596 = vpow2.f32 %v694_v41  ;;  %v9104_v41 = vld [vmem:[%s10769_s14 + $0x40] sm:$0xf] }
 0x301   :  { %v10595_v42 = vpop.eup %10594 }
 0x302   :  { %v701_v43 = vsel %vm685_vm5, %v10595_v42, 0.0 }
 0x303   :  { %702 = vadd.xlane.f32.xlu1 %v701_v43 }
 0x305   :  { %v10597_v44 = vpop.eup %10596 }
 0x306   :  { %v698_v45 = vsel %vm685_vm5, %v10597_v44, 0.0 }
 0x307   :  { %699 = vadd.xlane.f32.xlu1 %v698_v45  ;;  %v9103_v45 = vld [vmem:[%s10769_s14 + $0x38] sm:$0xff] }
 0x38c   :  { %v703_v48 = vpop.xlane.xlu1 %702 }
 0x38d   :  { %10598 = vrcp.f32 %v703_v48 }
 0x390   :  { %v700_v49 = vpop.xlane.xlu1 %699 }
 0x391   :  { %10600 = vrcp.f32 %v700_v49  ;;  %v9116_v49 = vld [vmem:[%s10792_s30 + $0x40] sm:$0xf] }
 0x39a   :  { %v10599_v50 = vpop.eup %10598 }
 0x39b   :  { %v707_v51 = vmul.f32 %v10599_v50, %v10595_v42  ;;  %v9115_v50 = vld [vmem:[%s10792_s30 + $0x38] sm:$0xff] }
 0x39d   :  { %9844 = vmatmul.mubr.msk.f32.vlgmr.msra.gmra.mxu0 %vm685_vm5, %v707_v51 }
 0x39e   :  { %v10601_v53 = vpop.eup %10600  ;;  %9856 = vmatpush3.msk.msra.mxu0 %vm292_vm2, %v9077_v46  ;;  %9861 = vmatprep.mubr.msk.f32.mxu0 %vm285_vm3, %v10794_v16 }
 0x39f   :  { %9857 = vmatprep.subr.mxu0 %v9076_v52  ;;  %v706_v55 = vmul.f32 %v10601_v53, %v10597_v44 }
 0x3a0   :  { %9858 = vmatpush3.msra.mxu0 %v9076_v52  ;;  %v9114_v52 = vld [vmem:[%s10792_s30 + $0x30] sm:$0xff] }
 0x3a1   :  { %9859 = vmatprep.subr.mxu0 %v9075_v54  ;;  %9839 = vmatmul.mubr.msk.f32.vlgmr.msra.gmra.mxu1 %vm685_vm5, %v706_v55 }
 0x3a2   :  { %9847 = vmatpush3.msk.msra.mxu1 %vm292_vm2, %v9071_v47  ;;  %9860 = vmatpush3.msra.mxu0 %v9075_v54  ;;  %v9102_v47 = vld [vmem:[%s10769_s14 + $0x30] sm:$0xff] }
 0x3a3   :  { %9848 = vmatprep.subr.mxu1 %v9070_v56  ;;  %9852 = vmatprep.mubr.msk.f32.mxu1 %vm285_vm3, %v10794_v16 }
 0x3a4   :  { %9862 = vmatmul.mubr.msk.f32.vlgmr.msra.gmra.mxu0 %vm285_vm3, %v10796_v17  ;;  %9849 = vmatpush3.msra.mxu1 %v9070_v56 }
 0x3a5   :  { %9850 = vmatprep.subr.mxu1 %v9069_v57  ;;  %9873 = vmatprep.subr.mxu0 %v10717_v23 }
 0x3a6   :  { %9851 = vmatpush3.msra.mxu1 %v9069_v57  ;;  %9875 = vmatprep.mubr.msk.f32.mxu0 %vm10718_vm4, %v10717_v23 }
 0x3a7   :  { %9853 = vmatmul.mubr.msk.f32.vlgmr.msra.gmra.mxu1 %vm285_vm3, %v10796_v17  ;;  %9864 = vmatprep.subr.msk.mxu1 %vm292_vm2, %v9083_v58 }
 0x3a8   :  { %9865 = vmatpush3.msk.msra.mxu1 %vm292_vm2, %v9083_v58  ;;  %9870 = vmatprep.mubr.msk.f32.mxu1 %vm285_vm3, %v10794_v16 }
 0x3a9   :  { %9866 = vmatprep.subr.mxu1 %v9082_v59 }
 0x3aa   :  { %9867 = vmatpush3.msra.mxu1 %v9082_v59 }
 0x3ab   :  { %9868 = vmatprep.subr.mxu1 %v9081_v60 }
 0x3ac   :  { %9869 = vmatpush3.msra.mxu1 %v9081_v60 }
 0x3ad   :  { %9871 = vmatmul.mubr.msk.f32.vlgmr.msra.gmra.mxu1 %vm285_vm3, %v10796_v17  ;;  %9878 = vmatprep.subr.mxu1 %v10717_v23 }
 0x3ae   :  { %9880 = vmatprep.mubr.msk.f32.mxu1 %vm10718_vm4, %v10717_v23 }
 0x45d   :  { %v10873_v61 = vpop.f32.mrf.mxu0 }
 0x45f   :  { %v9845_v62 = vpop.f32.mrf.mxu0 }
 0x461   :  { %v777_v63 = vpop.f32.mrf.mxu1 }
 0x463   :  { %v9840_v0 = vpop.f32.mrf.mxu1 }
 0x464   :  { %v9863_v1 = vpop.f32.mrf.mxu0 }
 0x465   :  { %9879 = vmatpush3.xpose.msk.msra.mxu1 %vm285_vm3, %v9863_v1 }
 0x466   :  { %v1012_v2 = vpop.f32.mrf.mxu0  ;;  %9888 = vmatprep.subr.mxu1 %v10717_v23 }
 0x467   :  { %9874 = vmatpush3.xpose.msk.msra.mxu0 %vm285_vm3, %v1012_v2  ;;  %v9854_v3 = vpop.f32.mrf.mxu1 }
 0x468   :  { %9881 = vmatmul.mubr.msk.f32.vlgmr.msra.gmra.mxu1 %vm285_vm3, %v9854_v3  ;;  %9883 = vmatprep.subr.mxu0 %v10717_v23 }
 0x469   :  { %v930_v4 = vpop.f32.mrf.mxu1  ;;  %9890 = vmatprep.mubr.msk.f32.mxu1 %vm10718_vm4, %v10717_v23 }
 0x46a   :  { %9876 = vmatmul.mubr.msk.f32.vlgmr.msra.gmra.mxu0 %vm285_vm3, %v930_v4 }
 0x46b   :  { %9885 = vmatprep.mubr.msk.f32.mxu0 %vm10718_vm4, %v10717_v23 }
 0x46d   :  { %v9872_v5 = vpop.f32.mrf.mxu1 }
 0x46e   :  { %9889 = vmatpush3.msra.mxu1 %v9872_v5 }
 0x46f   :  { %v1094_v6 = vpop.f32.mrf.mxu1  ;;  %9902 = vmatprep.subr.msk.mxu1 %vm292_vm2, %v856_v26 }
 0x470   :  { %9884 = vmatpush3.msra.mxu0 %v1094_v6 }
 0x471   :  { %9893 = vmatprep.subr.msk.mxu0 %vm292_vm2, %v9095_v27 }
 0x528   :  { %v1251_v7 = vpop.f32.mrf.mxu1 }
 0x529   :  { %v1258_v8 = vsel %vm685_vm5, %v1251_v7, -inf }
 0x52a   :  { %v1175_v9 = vpop.f32.mrf.mxu0  ;;  %1259 = vmax.xlane.f32.xlu1 %v1258_v8  ;;  %v9882_v10 = vpop.f32.mrf.mxu1 }
 0x52b   :  { %v1255_v11 = vsel %vm685_vm5, %v1175_v9, -inf }
 0x52c   :  { %1256 = vmax.xlane.f32.xlu0 %v1255_v11  ;;  %v9877_v12 = vpop.f32.mrf.mxu0 }
 0x5b3   :  { %v1260_v13 = vpop.xlane.xlu1 %1259 }
 0x5b4   :  { %v1262_v14 = vsub.f32 %v1251_v7, %v1260_v13  ;;  %v9134_v13 = vld [vmem:[%s10769_s14 + $0x58] sm:$0xf] }
 0x5b5   :  { %v1257_v15 = vpop.xlane.xlu0 %1256 }
 0x5b6   :  { %v1265_v18 = vmul.f32 1.442695, %v1262_v14  ;;  %v1261_v19 = vsub.f32 %v1175_v9, %v1257_v15  ;;  %v9128_v14 = vld [vmem:[%s10892_s4 + $0x40] sm:$0xf] }
 0x5b8   :  { %10602 = vpow2.f32 %v1265_v18  ;;  %v1263_v20 = vmul.f32 1.442695, %v1261_v19 }
 0x5ba   :  { %10604 = vpow2.f32 %v1263_v20 }
 0x5c5   :  { %v10603_v21 = vpop.eup %10602 }
 0x5c6   :  { %v1270_v22 = vsel %vm685_vm5, %v10603_v21, 0.0 }
 0x5c7   :  { %v10605_v24 = vpop.eup %10604  ;;  %1271 = vadd.xlane.f32.xlu1 %v1270_v22  ;;  %v9133_v22 = vld [vmem:[%s10769_s14 + $0x50] sm:$0xff] }
 0x5c8   :  { %v1267_v25 = vsel %vm685_vm5, %v10605_v24, 0.0 }
 0x5c9   :  { %1268 = vadd.xlane.f32.xlu0 %v1267_v25  ;;  %v9132_v25 = vld [vmem:[%s10769_s14 + $0x48] sm:$0xff]  ;;  %s9037_s14 = sld [smem:[%s11749_s0 + %s10729_s11]]  }
 0x650   :  { %v1272_v28 = vpop.xlane.xlu1 %1271 }
 0x651   :  { %10606 = vrcp.f32 %v1272_v28  ;;  %v9145_v28 = vld [vmem:[%s10792_s30 + $0x50] sm:$0xff] }
 0x652   :  { %v1269_v29 = vpop.xlane.xlu0 %1268 }
 0x653   :  { %10608 = vrcp.f32 %v1269_v29  ;;  %v9144_v29 = vld [vmem:[%s10792_s30 + $0x48] sm:$0xff] }
 0x65e   :  { %v10607_v30 = vpop.eup %10606 }
 0x65f   :  { %v1276_v31 = vmul.f32 %v10607_v30, %v10603_v21  ;;  %v9126_v30 = vld [vmem:[%s10892_s4 + $0x30] sm:$0xff] }
 0x660   :  { %v10609_v32 = vpop.eup %10608 }
 0x661   :  { %9891 = vmatmul.mubr.msk.f32.vlgmr.msra.gmra.mxu1 %vm685_vm5, %v1276_v31  ;;  %v1275_v34 = vmul.f32 %v10609_v32, %v10605_v24  ;;  %v9140_v31 = vld [vmem:[%s10775_s18 + $0x58] sm:$0xf] }
 0x662   :  { %9903 = vmatpush3.msk.msra.mxu1 %vm292_vm2, %v856_v26  ;;  %9908 = vmatprep.mubr.msk.f32.mxu1 %vm285_vm3, %v777_v63  ;;  %v9127_v26 = vld [vmem:[%s10892_s4 + $0x38] sm:$0xff] }
 0x663   :  { %9904 = vmatprep.subr.mxu1 %v855_v33  ;;  %9886 = vmatmul.mubr.msk.f32.vlgmr.msra.gmra.mxu0 %vm685_vm5, %v1275_v34 }
 0x664   :  { %9905 = vmatpush3.msra.mxu1 %v855_v33  ;;  %9894 = vmatpush3.msk.msra.mxu0 %vm292_vm2, %v9095_v27  ;;  %v9146_v27 = vld [vmem:[%s10792_s30 + $0x58] sm:$0xf]  ;;  %s10733_s30 = smov 32  }
 0x665   :  { %9906 = vmatprep.subr.mxu1 %v854_v35  ;;  %9895 = vmatprep.subr.mxu0 %v9094_v36  ;;  %s9038_s3 = sld [smem:[%s11749_s0 + %s10733_s30]]   ;;  %s10748_s30 = smov 15  }
 0x666   :  { %9907 = vmatpush3.msra.mxu1 %v854_v35  ;;  %9896 = vmatpush3.msra.mxu0 %v9094_v36  ;;  %v9139_v35 = vld [vmem:[%s10775_s18 + $0x50] sm:$0xff] }
 0x667   :  { %9909 = vmatmul.mubr.msk.f32.vlgmr.msra.gmra.mxu1 %vm285_vm3, %v10873_v61  ;;  %9920 = vmatprep.subr.msk.mxu1 %vm292_vm2, %v9110_v37 }
 0x668   :  { %9921 = vmatpush3.msk.msra.mxu1 %vm292_vm2, %v9110_v37  ;;  %9926 = vmatprep.mubr.msk.f32.mxu1 %vm285_vm3, %v10794_v16  ;;  %v9138_v37 = vld [vmem:[%s10775_s18 + $0x48] sm:$0xff]  ;;  %s10730_s18 = smov 39  }
 0x669   :  { %9922 = vmatprep.subr.mxu1 %v9109_v38  ;;  %9897 = vmatprep.subr.mxu0 %v9093_v40  ;;  %s9045_s21 = sld [smem:[%s11749_s0 + %s10730_s18]]   ;;  %s10745_s18 = smov 18  }
 0x66a   :  { %9923 = vmatpush3.msra.mxu1 %v9109_v38  ;;  %9898 = vmatpush3.msra.mxu0 %v9093_v40 }
 0x66b   :  { %9924 = vmatprep.subr.mxu1 %v9108_v39  ;;  %9911 = vmatprep.subr.msk.mxu0 %vm292_vm2, %v9104_v41 }
 0x66c   :  { %9925 = vmatpush3.msra.mxu1 %v9108_v39 }
 0x66d   :  { %9927 = vmatmul.mubr.msk.f32.vlgmr.msra.gmra.mxu1 %vm285_vm3, %v10796_v17  ;;  %9938 = vmatprep.subr.mxu1 %v10717_v23 }
 0x66e   :  { %9940 = vmatprep.mubr.msk.f32.mxu1 %vm10718_vm4, %v10717_v23 }
 0x721   :  { %v1419_v42 = vpop.f32.mrf.mxu1 }
 0x723   :  { %v1346_v43 = vpop.f32.mrf.mxu0  ;;  %v9892_v44 = vpop.f32.mrf.mxu1 }
 0x724   :  { %9899 = vmatprep.mubr.msk.f32.mxu0 %vm285_vm3, %v1346_v43 }
 0x725   :  { %v9887_v46 = vpop.f32.mrf.mxu0  ;;  %9900 = vmatmul.mubr.msk.f32.vlgmr.msra.gmra.mxu0 %vm285_vm3, %v1419_v42 }
 0x726   :  { %9912 = vmatpush3.msk.msra.mxu0 %vm292_vm2, %v9104_v41  ;;  %9917 = vmatprep.mubr.msk.f32.mxu0 %vm285_vm3, %v10794_v16 }
 0x727   :  { %v10930_v48 = vpop.f32.mrf.mxu1  ;;  %9913 = vmatprep.subr.mxu0 %v9103_v45 }
 0x728   :  { %9914 = vmatpush3.msra.mxu0 %v9103_v45 }
 0x729   :  { %9915 = vmatprep.subr.mxu0 %v9102_v47  ;;  %v10934_v51 = vpop.f32.mrf.mxu1 }
 0x72a   :  { %9916 = vmatpush3.msra.mxu0 %v9102_v47 }
 0x72b   :  { %9918 = vmatmul.mubr.msk.f32.vlgmr.msra.gmra.mxu0 %vm285_vm3, %v10796_v17  ;;  %9929 = vmatprep.subr.msk.mxu0 %vm292_vm2, %v9116_v49 }
 0x72c   :  { %9930 = vmatpush3.msk.msra.mxu0 %vm292_vm2, %v9116_v49  ;;  %9935 = vmatprep.mubr.msk.f32.mxu0 %vm285_vm3, %v10794_v16 }
 0x72d   :  { %v9928_v53 = vpop.f32.mrf.mxu1  ;;  %9931 = vmatprep.subr.mxu0 %v9115_v50 }
 0x72e   :  { %9932 = vmatpush3.msra.mxu0 %v9115_v50 }
 0x72f   :  { %v1750_v54 = vpop.f32.mrf.mxu1  ;;  %9933 = vmatprep.subr.mxu0 %v9114_v52 }
 0x730   :  { %9934 = vmatpush3.msra.mxu0 %v9114_v52  ;;  %9939 = vmatpush3.xpose.msk.msra.mxu1 %vm285_vm3, %v1750_v54 }
 0x731   :  { %9936 = vmatmul.mubr.msk.f32.vlgmr.msra.gmra.mxu0 %vm285_vm3, %v10796_v17  ;;  %9943 = vmatprep.subr.mxu0 %v10717_v23 }
 0x732   :  { %9944 = vmatpush3.xpose.msk.msra.mxu0 %vm285_vm3, %v9928_v53  ;;  %9945 = vmatprep.mubr.msk.f32.mxu0 %vm10718_vm4, %v10717_v23 }
 0x733   :  { %9953 = vmatprep.subr.mxu0 %v10717_v23  ;;  %9948 = vmatprep.subr.mxu1 %v10717_v23 }
 0x7e5   :  { %v10952_v55 = vpop.f32.mrf.mxu0 }
 0x7e6   :  { %v1592_v38 = vadd.f32 %v10930_v48, %v10952_v55 }
 0x7e7   :  { %v10954_v56 = vpop.f32.mrf.mxu0 }
 0x7e8   :  { %v1587_v40 = vadd.f32 %v10934_v51, %v10954_v56 }
 0x7eb   :  { %v9919_v57 = vpop.f32.mrf.mxu0 }
 0x7ec   :  { %9946 = vmatmul.mubr.msk.f32.vlgmr.msra.gmra.mxu0 %vm285_vm3, %v9919_v57 }
 0x7ed   :  { %v1668_v58 = vpop.f32.mrf.mxu0  ;;  %9955 = vmatprep.mubr.msk.f32.mxu0 %vm10718_vm4, %v10717_v23 }
 0x7ee   :  { %9941 = vmatmul.mubr.msk.f32.vlgmr.msra.gmra.mxu1 %vm285_vm3, %v1668_v58 }
 0x7ef   :  { %9950 = vmatprep.mubr.msk.f32.mxu1 %vm10718_vm4, %v10717_v23 }
 0x7f1   :  { %v9937_v59 = vpop.f32.mrf.mxu0 }
 0x7f2   :  { %9954 = vmatpush3.msra.mxu0 %v9937_v59 }
 0x7f3   :  { %v1832_v60 = vpop.f32.mrf.mxu0  ;;  %9967 = vmatprep.subr.msk.mxu0 %vm292_vm2, %v9134_v13 }
 0x7f4   :  { %9949 = vmatpush3.msra.mxu1 %v1832_v60 }
 0x7f5   :  { %9958 = vmatprep.subr.msk.mxu1 %vm292_vm2, %v9128_v14 }
 0x8ac   :  { %v1989_v61 = vpop.f32.mrf.mxu0 }
 0x8ad   :  { %v1996_v62 = vsel %vm685_vm5, %v1989_v61, -inf }
 0x8ae   :  { %1997 = vmax.xlane.f32.xlu1 %v1996_v62  ;;  %v1913_v63 = vpop.f32.mrf.mxu1  ;;  %v9947_v0 = vpop.f32.mrf.mxu0 }
 0x8af   :  { %v1993_v1 = vsel %vm685_vm5, %v1913_v63, -inf }
 0x8b0   :  { %1994 = vmax.xlane.f32.xlu0 %v1993_v1  ;;  %v9942_v2 = vpop.f32.mrf.mxu1 }
 0x8b1   :  { %v9158_v2 = vld [vmem:[%s10892_s4 + $0x58] sm:$0xf] }
 0x937   :  { %v1998_v3 = vpop.xlane.xlu1 %1997 }
 0x938   :  { %v2000_v4 = vsub.f32 %v1989_v61, %v1998_v3 }
 0x939   :  { %v1995_v5 = vpop.xlane.xlu0 %1994 }
 0x93a   :  { %v2003_v6 = vmul.f32 1.442695, %v2000_v4  ;;  %v1999_v7 = vsub.f32 %v1913_v63, %v1995_v5 }
 0x93c   :  { %10610 = vpow2.f32 %v2003_v6  ;;  %v2001_v8 = vmul.f32 1.442695, %v1999_v7 }
 0x93e   :  { %10612 = vpow2.f32 %v2001_v8 }
 0x949   :  { %v10611_v9 = vpop.eup %10610 }
 0x94a   :  { %v2008_v10 = vsel %vm685_vm5, %v10611_v9, 0.0 }
 0x94b   :  { %v10613_v11 = vpop.eup %10612  ;;  %2009 = vadd.xlane.f32.xlu1 %v2008_v10  ;;  %v9156_v10 = vld [vmem:[%s10892_s4 + $0x48] sm:$0xff] }
 0x94c   :  { %v2005_v12 = vsel %vm685_vm5, %v10613_v11, 0.0 }
 0x94d   :  { %2006 = vadd.xlane.f32.xlu0 %v2005_v12 }
 0x9d4   :  { %v2010_v15 = vpop.xlane.xlu1 %2009 }
 0x9d5   :  { %10614 = vrcp.f32 %v2010_v15 }
 0x9d6   :  { %v2007_v18 = vpop.xlane.xlu0 %2006 }
 0x9d7   :  { %10616 = vrcp.f32 %v2007_v18  ;;  %v9162_v18 = vld [vmem:[%s9030_s8] ss:$0 sm:$0xff]  ;;  %s10735_s8 = smov 8  }
 0x9d8   :  { %s11397_s11 = sld [smem:[%s11749_s0 + %s10735_s8]]   ;;  %s10750_s8 = smov 38  }
 0x9e2   :  { %v10615_v19 = vpop.eup %10614 }
 0x9e3   :  { %v2014_v20 = vmul.f32 %v10615_v19, %v10611_v9  ;;  %v9157_v9 = vld [vmem:[%s10892_s4 + $0x50] sm:$0xff]  ;;  %s10734_s4 = smov 2  }
 0x9e4   :  { %v10617_v21 = vpop.eup %10616  ;;  %s9008_s7 = sld [smem:[%s11749_s0 + %s10734_s4]]   ;;  %s10749_s4 = smov 16  }
 0x9e5   :  { %9956 = vmatmul.mubr.msk.f32.vlgmr.msra.gmra.mxu0 %vm685_vm5, %v2014_v20  ;;  %v2013_v24 = vmul.f32 %v10617_v21, %v10613_v11 }
 0x9e6   :  { %9968 = vmatpush3.msk.msra.mxu0 %vm292_vm2, %v9134_v13  ;;  %9973 = vmatprep.mubr.msk.f32.mxu0 %vm285_vm3, %v10794_v16 }
 0x9e7   :  { %9969 = vmatprep.subr.mxu0 %v9133_v22  ;;  %9951 = vmatmul.mubr.msk.f32.vlgmr.msra.gmra.mxu1 %vm685_vm5, %v2013_v24 }
 0x9e8   :  { %9970 = vmatpush3.msra.mxu0 %v9133_v22  ;;  %9959 = vmatpush3.msk.msra.mxu1 %vm292_vm2, %v9128_v14 }
 0x9e9   :  { %9971 = vmatprep.subr.mxu0 %v9132_v25  ;;  %9960 = vmatprep.subr.mxu1 %v9127_v26 }
 0x9ea   :  { %9972 = vmatpush3.msra.mxu0 %v9132_v25  ;;  %9961 = vmatpush3.msra.mxu1 %v9127_v26 }
 0x9eb   :  { %9974 = vmatmul.mubr.msk.f32.vlgmr.msra.gmra.mxu0 %vm285_vm3, %v10796_v17  ;;  %9985 = vmatprep.subr.msk.mxu0 %vm292_vm2, %v9146_v27 }
 0x9ec   :  { %9986 = vmatpush3.msk.msra.mxu0 %vm292_vm2, %v9146_v27  ;;  %9991 = vmatprep.mubr.msk.f32.mxu0 %vm285_vm3, %v10794_v16 }
 0x9ed   :  { %9987 = vmatprep.subr.mxu0 %v9145_v28  ;;  %9962 = vmatprep.subr.mxu1 %v9126_v30 }
 0x9ee   :  { %9988 = vmatpush3.msra.mxu0 %v9145_v28  ;;  %9963 = vmatpush3.msra.mxu1 %v9126_v30 }
 0x9ef   :  { %9989 = vmatprep.subr.mxu0 %v9144_v29  ;;  %9976 = vmatprep.subr.msk.mxu1 %vm292_vm2, %v9140_v31 }
 0x9f0   :  { %9990 = vmatpush3.msra.mxu0 %v9144_v29 }
 0x9f1   :  { %9992 = vmatmul.mubr.msk.f32.vlgmr.msra.gmra.mxu0 %vm285_vm3, %v10796_v17  ;;  %9999 = vmatprep.subr.mxu0 %v10717_v23 }
 0x9f2   :  { %10001 = vmatprep.mubr.msk.f32.mxu0 %vm10718_vm4, %v10717_v23 }
 0xaa5   :  { %v2157_v32 = vpop.f32.mrf.mxu0 }
 0xaa7   :  { %v2084_v33 = vpop.f32.mrf.mxu1  ;;  %v9957_v34 = vpop.f32.mrf.mxu0 }
 0xaa8   :  { %9964 = vmatprep.mubr.msk.f32.mxu1 %vm285_vm3, %v2084_v33 }
 0xaa9   :  { %v9952_v36 = vpop.f32.mrf.mxu1  ;;  %9965 = vmatmul.mubr.msk.f32.vlgmr.msra.gmra.mxu1 %vm285_vm3, %v2157_v32 }
 0xaaa   :  { %9977 = vmatpush3.msk.msra.mxu1 %vm292_vm2, %v9140_v31  ;;  %9982 = vmatprep.mubr.msk.f32.mxu1 %vm285_vm3, %v10794_v16 }
 0xaab   :  { %9978 = vmatprep.subr.mxu1 %v9139_v35  ;;  %v9975_v42 = vpop.f32.mrf.mxu0 }
 0xaac   :  { %9979 = vmatpush3.msra.mxu1 %v9139_v35 }
 0xaad   :  { %9980 = vmatprep.subr.mxu1 %v9138_v37  ;;  %v2324_v45 = vpop.f32.mrf.mxu0 }
 0xaae   :  { %9981 = vmatpush3.msra.mxu1 %v9138_v37 }
 0xaaf   :  { %9983 = vmatmul.mubr.msk.f32.vlgmr.msra.gmra.mxu1 %vm285_vm3, %v10796_v17  ;;  %9994 = vmatprep.subr.mxu1 %v10717_v23 }
 0xab0   :  { %9996 = vmatprep.mubr.msk.f32.mxu1 %vm10718_vm4, %v10717_v23 }
 0xab1   :  { %v9993_v47 = vpop.f32.mrf.mxu0 }
 0xab3   :  { %v2488_v48 = vpop.f32.mrf.mxu0 }
 0xb69   :  { %v9966_v39 = vpop.f32.mrf.mxu1 }
 0xb6a   :  { %v11012_v41 = vadd.f32 %v9966_v39, %v1592_v38  ;;  %v2964_v38 = vld [vmem:[%s9039_s12 + $0x8] sm:$0xff]  ;;  %v2963_v39 = vld [vmem:[%s9039_s12] sm:$0xff] }
 0xb6b   :  { %v2240_v43 = vpop.f32.mrf.mxu1 }
 0xb6c   :  { %v11014_v44 = vadd.f32 %v2240_v43, %v1587_v40  ;;  %v3206_v40 = vld [vmem:[%s9007_s16] sm:$0x7]  ;;  %v3066_v43 = vld [vmem:[%s11062_s20 + $0x38] sm:$0xff]  ;;  %s10737_s16 = smov 30  }
 0xb6d   :  { %s9036_s19 = sld [smem:[%s11749_s0 + %s10737_s16]]   ;;  %s10752_s16 = smov 21  }
 0xb6f   :  { %v9984_v46 = vpop.f32.mrf.mxu1 }
 0xb70   :  { %10000 = vmatpush3.xpose.msk.msra.mxu0 %vm285_vm3, %v9984_v46  ;;  %v3063_v46 = vld [vmem:[%s11062_s20 + $0x20] sm:$0xff] }
 0xb71   :  { %v2406_v49 = vpop.f32.mrf.mxu1  ;;  %10009 = vmatprep.subr.mxu0 %v10717_v23 }
 0xb72   :  { %9995 = vmatpush3.xpose.msk.msra.mxu1 %vm285_vm3, %v2406_v49 }
 0xb73   :  { %10002 = vmatmul.mubr.msk.f32.vlgmr.msra.gmra.mxu0 %vm285_vm3, %v9975_v42  ;;  %10004 = vmatprep.subr.mxu1 %v10717_v23  ;;  %v3067_v42 = vld [vmem:[%s11062_s20 + $0x40] sm:$0xff] }
 0xb74   :  { %10010 = vmatpush3.msra.mxu0 %v9993_v47  ;;  %10011 = vmatprep.mubr.msk.f32.mxu0 %vm10718_vm4, %v10717_v23 }
 0xb75   :  { %9997 = vmatmul.mubr.msk.f32.vlgmr.msra.gmra.mxu1 %vm285_vm3, %v2324_v45  ;;  %v3064_v45 = vld [vmem:[%s11062_s20 + $0x28] sm:$0xff] }
 0xb76   :  { %10005 = vmatpush3.msra.mxu1 %v2488_v48  ;;  %10006 = vmatprep.mubr.msk.f32.mxu1 %vm10718_vm4, %v10717_v23 }
 0xb77   :  { %10014 = vmatprep.subr.msk.mxu1 %vm292_vm2, %v9158_v2 }
 0xc33   :  { %v2645_v50 = vpop.f32.mrf.mxu0 }
 0xc34   :  { %v2652_v51 = vsel %vm685_vm5, %v2645_v50, -inf }
 0xc35   :  { %2653 = vmax.xlane.f32.xlu1 %v2652_v51  ;;  %v2569_v52 = vpop.f32.mrf.mxu1  ;;  %v10003_v53 = vpop.f32.mrf.mxu0 }
 0xc36   :  { %v2649_v54 = vsel %vm685_vm5, %v2569_v52, -inf }
 0xc37   :  { %2650 = vmax.xlane.f32.xlu0 %v2649_v54  ;;  %v9998_v55 = vpop.f32.mrf.mxu1 }
 0xc38   :  { %v9163_v55 = vld [vmem:[%s9041_s24] ss:$0 sm:$0xff]  ;;  %s10739_s24 = smov 11  }
 0xc39   :  { %s11432_s27 = sld [smem:[%s11749_s0 + %s10739_s24]]   ;;  %s10754_s24 = smov 43  }
 0xcbe   :  { %v2654_v56 = vpop.xlane.xlu1 %2653 }
 0xcbf   :  { %v2656_v57 = vsub.f32 %v2645_v50, %v2654_v56 }
 0xcc0   :  { %v2651_v58 = vpop.xlane.xlu0 %2650 }
 0xcc1   :  { %v2659_v59 = vmul.f32 1.442695, %v2656_v57  ;;  %v2655_v60 = vsub.f32 %v2569_v52, %v2651_v58 }
 0xcc3   :  { %10618 = vpow2.f32 %v2659_v59  ;;  %v2657_v61 = vmul.f32 1.442695, %v2655_v60  ;;  %v9164_v60 = vld [vmem:[%s9035_s28] ss:$0 sm:$0xff]  ;;  %s10740_s28 = smov 19  }
 0xcc4   :  { %s9025_s1 = sld [smem:[%s11749_s0 + %s10740_s28]]  }
 0xcc5   :  { %10620 = vpow2.f32 %v2657_v61 }
 0xcd0   :  { %v10619_v62 = vpop.eup %10618 }
 0xcd1   :  { %v2664_v63 = vsel %vm685_vm5, %v10619_v62, 0.0 }
 0xcd2   :  { %v10621_v0 = vpop.eup %10620  ;;  %2665 = vadd.xlane.f32.xlu1 %v2664_v63  ;;  %v3204_v63 = vld [vmem:[%s9048_s2] sm:$0xff] }
 0xcd3   :  { %v2661_v1 = vsel %vm685_vm5, %v10621_v0, 0.0 }
 0xcd4   :  { %2662 = vadd.xlane.f32.xlu0 %v2661_v1  ;;  %v3062_v1 = vld [vmem:[%s11062_s20 + $0x18] sm:$0xff] }
 0xd5b   :  { %v2666_v3 = vpop.xlane.xlu1 %2665 }
 0xd5c   :  { %10622 = vrcp.f32 %v2666_v3  ;;  %v3060_v3 = vld [vmem:[%s11062_s20 + $0x8] sm:$0xff] }
 0xd5d   :  { %v2663_v4 = vpop.xlane.xlu0 %2662 }
 0xd5e   :  { %10624 = vrcp.f32 %v2663_v4  ;;  %v3059_v4 = vld [vmem:[%s11062_s20] sm:$0xff] }
 0xd69   :  { %v10623_v5 = vpop.eup %10622 }
 0xd6a   :  { %v2670_v6 = vmul.f32 %v10623_v5, %v10619_v62  ;;  %v3308_v5 = vld [vmem:[%s11092_s6 + $0x10] sm:$0xf] }
 0xd6b   :  { %v10625_v7 = vpop.eup %10624 }
 0xd6c   :  { %10012 = vmatmul.mubr.msk.f32.vlgmr.msra.gmra.mxu0 %vm685_vm5, %v2670_v6  ;;  %v2669_v8 = vmul.f32 %v10625_v7, %v10621_v0  ;;  %v3205_v0 = vld [vmem:[%s9048_s2 + $0x8] sm:$0xff]  ;;  %v3306_v7 = vld [vmem:[%s11092_s6] sm:$0xff]  ;;  %s10741_s2 = smov 12  }
 0xd6d   :  { %v3307_v6 = vld [vmem:[%s11092_s6 + $0x8] sm:$0xff]  ;;  %s9018_s5 = sld [smem:[%s11749_s0 + %s10741_s2]]  }
 0xd6e   :  { %10007 = vmatmul.mubr.msk.f32.vlgmr.msra.gmra.mxu1 %vm685_vm5, %v2669_v8  ;;  %v3395_v8 = vld [vmem:[%s11101_s10 + $0x10] sm:$0xf] }
 0xd6f   :  { %10015 = vmatpush3.msk.msra.mxu1 %vm292_vm2, %v9158_v2  ;;  %v3061_v2 = vld [vmem:[%s11062_s20 + $0x10] sm:$0xff] }
 0xd70   :  { %10016 = vmatprep.subr.mxu1 %v9157_v9 }
 0xd71   :  { %10017 = vmatpush3.msra.mxu1 %v9157_v9  ;;  %v9165_v9 = vld [vmem:[%s9037_s14] ss:$0 sm:$0xff]  ;;  %s10744_s14 = smov 17  }
 0xd72   :  { %10018 = vmatprep.subr.mxu1 %v9156_v10 }
 0xd73   :  { %10019 = vmatpush3.msra.mxu1 %v9156_v10 }
 0xe2c   :  { %v2813_v11 = vpop.f32.mrf.mxu0 }
 0xe2e   :  { %v2740_v12 = vpop.f32.mrf.mxu1  ;;  %v10013_v13 = vpop.f32.mrf.mxu0 }
 0xe2f   :  { %10020 = vmatprep.mubr.msk.f32.mxu1 %vm285_vm3, %v2740_v12  ;;  %v9174_v13 = vld [vmem:[%s1_s17] ss:$0 sm:$0xff]  ;;  %s9023_s17 = sld [smem:[%s11749_s0 + %s10744_s14]]  }
 0xe30   :  { %v10008_v14 = vpop.f32.mrf.mxu1  ;;  %10021 = vmatmul.mubr.msk.f32.vlgmr.msra.gmra.mxu1 %vm285_vm3, %v2813_v11 }
 0xef0   :  { %v10022_v15 = vpop.f32.mrf.mxu1 }
 0xef1   :  { %v2906_v19 = vadd.f32 %v10022_v15, %v11012_v41  ;;  %v3068_v41 = vld [vmem:[%s11062_s20 + $0x48] sm:$0xff] }
 0xef2   :  { %v2896_v20 = vpop.f32.mrf.mxu1  ;;  %10032 = vmatprep.subr.mxu1 %v3068_v41 }
 0xef3   :  { %v2915_v21 = vadd.f32 %v9162_v18, %v2906_v19  ;;  %v2905_v22 = vadd.f32 %v2896_v20, %v11014_v44  ;;  %10033 = vmatpush3.msra.mxu1 %v3068_v41  ;;  %v3065_v44 = vld [vmem:[%s11062_s20 + $0x30] sm:$0xff]  ;;  %s10738_s20 = smov 9  }
 0xef4   :  { %10034 = vmatprep.subr.mxu1 %v3067_v42  ;;  %s11422_s23 = sld [smem:[%s11749_s0 + %s10738_s20]]   ;;  %s10753_s20 = smov 14  }
 0xef5   :  { %v2914_v24 = vadd.f32 %v9162_v18, %v2905_v22  ;;  %v2917_v25 = vadd.f32 %v2915_v21, %v10796_v17  ;;  %10035 = vmatpush3.msra.mxu1 %v3067_v42 }
 0xef6   :  { %10036 = vmatprep.subr.mxu1 %v3066_v43 }
 0xef7   :  { %v2921_v26 = vsel %vm285_vm3, %v2917_v25, 0.0  ;;  %v2916_v27 = vadd.f32 %v2914_v24, %v10794_v16  ;;  %v2965_v16 = vld [vmem:[%s9039_s12 + $0x10] sm:$0xf]  ;;  %10037 = vmatpush3.msra.mxu1 %v3066_v43  ;;  %s10736_s12 = smov 36  }
 0xef8   :  { %2922 = vadd.xlane.f32.xlu1 %v2921_v26  ;;  %10023 = vmatprep.subr.msk.mxu0 %vm292_vm2, %v2965_v16  ;;  %v3303_v26 = vld [vmem:[%s9045_s21 + $0x8] sm:$0xff]  ;;  %s9042_s15 = sld [smem:[%s11749_s0 + %s10736_s12]]   ;;  %s10751_s12 = smov 37  }
 0xef9   :  { %v2918_v28 = vsel %vm285_vm3, %v2916_v27, 0.0  ;;  %10024 = vmatpush3.msk.msra.mxu0 %vm292_vm2, %v2965_v16  ;;  %10038 = vmatprep.subr.mxu1 %v3065_v44 }
 0xefa   :  { %2919 = vadd.xlane.f32.xlu0 %v2918_v28  ;;  %10025 = vmatprep.subr.mxu0 %v2964_v38 }
 0xefb   :  { %10026 = vmatpush3.msra.mxu0 %v2964_v38  ;;  %10039 = vmatpush3.msra.mxu1 %v3065_v44 }
 0xefc   :  { %10027 = vmatprep.subr.mxu0 %v2963_v39  ;;  %10040 = vmatprep.subr.mxu1 %v3064_v45 }
 0xefd   :  { %10028 = vmatpush3.msra.mxu0 %v2963_v39  ;;  %10041 = vmatpush3.msra.mxu1 %v3064_v45 }
 0xefe   :  { %10055 = vmatprep.subr.msk.mxu0 %vm3221_vm6, %v3206_v40  ;;  %10042 = vmatprep.subr.mxu1 %v3063_v46 }
 0xeff   :  { %10043 = vmatpush3.msra.mxu1 %v3063_v46 }
 0xf00   :  { %10044 = vmatprep.subr.mxu1 %v3062_v1 }
 0xf01   :  { %10045 = vmatpush3.msra.mxu1 %v3062_v1  ;;  %v9194_v1 = vld [vmem:[%s11092_s6 + $0x20] sm:$0xff] }
 0xf02   :  { %10046 = vmatprep.subr.mxu1 %v3061_v2 }
 0xf03   :  { %10047 = vmatpush3.msra.mxu1 %v3061_v2 }
 0xf04   :  { %10048 = vmatprep.subr.mxu1 %v3060_v3 }
 0xf05   :  { %10049 = vmatpush3.msra.mxu1 %v3060_v3  ;;  %v9193_v3 = vld [vmem:[%s11092_s6 + $0x18] sm:$0xff] }
 0xf06   :  { %10050 = vmatprep.subr.mxu1 %v3059_v4 }
 0xf07   :  { %10051 = vmatpush3.msra.mxu1 %v3059_v4 }
 0xf08   :  { %10087 = vmatprep.subr.mxu1 %v10717_v23 }
 0xf81   :  { %v2923_v29 = vpop.xlane.xlu1 %2922 }
 0xf82   :  { %v2926_v30 = vmul.f32 0.05, %v2923_v29 }
 0xf83   :  { %v2920_v31 = vpop.xlane.xlu0 %2919 }
 0xf84   :  { %v2928_v32 = vsub.f32 %v2917_v25, %v2926_v30  ;;  %v2925_v33 = vmul.f32 0.05, %v2920_v31  ;;  %v3302_v25 = vld [vmem:[%s9045_s21] sm:$0xff]  ;;  %v3394_v30 = vld [vmem:[%s11101_s10 + $0x8] sm:$0xff]  ;;  %s11698_s21 = sld [smem:[%s11749_s0 + %s10745_s18]]  }
 0xf85   :  { %v3393_v31 = vld [vmem:[%s11101_s10] sm:$0xff] }
 0xf86   :  { %v2927_v34 = vsub.f32 %v2916_v27, %v2925_v33  ;;  %v2930_v35 = vmul.f32 %v2928_v32, %v2928_v32  ;;  %v3475_v33 = vld [vmem:[%s11124_s25 + $0x8] sm:$0xff] }
 0xf88   :  { %v2934_v36 = vsel %vm285_vm3, %v2930_v35, 0.0  ;;  %v2929_v37 = vmul.f32 %v2927_v34, %v2927_v34 }
 0xf89   :  { %2935 = vadd.xlane.f32.xlu1 %v2934_v36 }
 0xf8a   :  { %v2931_v17 = vsel %vm285_vm3, %v2929_v37, 0.0 }
 0xf8b   :  { %2932 = vadd.xlane.f32.xlu0 %v2931_v17 }
0x1012   :  { %v2936_v47 = vpop.xlane.xlu1 %2935 }
0x1013   :  { %v2938_v49 = vmul.f32 0.05, %v2936_v47 }
0x1014   :  { %v2933_v48 = vpop.xlane.xlu0 %2932 }
0x1015   :  { %v2940_v50 = vadd.f32 1e-05, %v2938_v49  ;;  %v2937_v51 = vmul.f32 0.05, %v2933_v48 }
0x1017   :  { %10626 = vrsqrt.f32 %v2940_v50  ;;  %v2939_v52 = vadd.f32 1e-05, %v2937_v51 }
0x1019   :  { %10628 = vrsqrt.f32 %v2939_v52 }
0x1024   :  { %v10627_v53 = vpop.eup %10626 }
0x1025   :  { %v2944_v54 = vmul.f32 %v10627_v53, %v2928_v32  ;;  %v3476_v32 = vld [vmem:[%s11124_s25 + $0x10] sm:$0xf] }
0x1026   :  { %v10629_v56 = vpop.eup %10628 }
0x1027   :  { %v2943_v57 = vmul.f32 %v10629_v56, %v2927_v34  ;;  %v2953_v58 = vmul.f32 %v9163_v55, %v2944_v54  ;;  %v3474_v34 = vld [vmem:[%s11124_s25] sm:$0xff] }
0x1029   :  { %v2952_v59 = vmul.f32 %v9163_v55, %v2943_v57  ;;  %v11081_v62 = vadd.f32 %v9164_v60, %v2953_v58  ;;  %v9195_v57 = vld [vmem:[%s11092_s6 + $0x28] sm:$0xf] }
0x102a   :  { %v9201_v58 = vld [vmem:[%s11101_s10 + $0x28] sm:$0xf] }
0x102b   :  { %v11079_v61 = vadd.f32 %v9164_v60, %v2952_v59 }
0x102d   :  { %10029 = vmatprep.mubr.msk.f32.mxu0 %vm285_vm3, %v11079_v61 }
0x102e   :  { %10030 = vmatmul.mubr.msk.f32.vlgmr.msra.gmra.mxu0 %vm285_vm3, %v11081_v62 }
0x102f   :  { %10056 = vmatpush3.msk.msra.mxu0 %vm3221_vm6, %v3206_v40  ;;  %10057 = vmatprep.mubr.msk.f32.mxu0 %vm3214_vm7, %v3204_v63 }
0x1030   :  { %10060 = vmatprep.subr.msk.mxu0 %vm292_vm2, %v3308_v5 }
0x1032   :  { %10058 = vmatmul.mubr.msk.f32.vlgmr.msra.gmra.mxu0 %vm3214_vm7, %v3205_v0 }
0x1033   :  { %10061 = vmatpush3.msk.msra.mxu0 %vm292_vm2, %v3308_v5  ;;  %v9200_v5 = vld [vmem:[%s11101_s10 + $0x20] sm:$0xff] }
0x1034   :  { %10062 = vmatprep.subr.mxu0 %v3307_v6 }
0x1035   :  { %10063 = vmatpush3.msra.mxu0 %v3307_v6  ;;  %v9207_v6 = vld [vmem:[%s11124_s25 + $0x28] sm:$0xf] }
0x1036   :  { %10064 = vmatprep.subr.mxu0 %v3306_v7 }
0x1037   :  { %10065 = vmatpush3.msra.mxu0 %v3306_v7  ;;  %v9199_v7 = vld [vmem:[%s11101_s10 + $0x18] sm:$0xff] }
0x1038   :  { %10069 = vmatprep.subr.msk.mxu0 %vm292_vm2, %v3395_v8 }
0x10ee   :  { %v10031_v10 = vpop.f32.mrf.mxu0 }
0x10ef   :  { %v3054_v11 = vadd.f32 %v10031_v10, %v9165_v9 }
0x10f0   :  { %v3048_v12 = vpop.f32.mrf.mxu0 }
0x10f1   :  { %v3049_v14 = vadd.f32 %v9165_v9, %v3048_v12  ;;  %v3058_v20 = vmax.f32 %v3054_v11, 0.0  ;;  %v9205_v9 = vld [vmem:[%s11124_s25 + $0x18] sm:$0xff] }
0x10f2   :  { %v10059_v15 = vpop.f32.mrf.mxu0 }
0x10f3   :  { %v3057_v18 = vmax.f32 %v3049_v14, 0.0  ;;  %v3297_v19 = vadd.f32 %v10059_v15, %v9174_v13 }
0x10f4   :  { %v3291_v21 = vpop.f32.mrf.mxu0 }
0x10f5   :  { %v3292_v22 = vadd.f32 %v9174_v13, %v3291_v21  ;;  %10052 = vmatprep.mubr.msk.f32.mxu1 %vm3076_vm8, %v3057_v18  ;;  %v3301_v24 = vmul.f32 4.472136, %v3297_v19 }
0x10f6   :  { %10053 = vmatmul.mubr.msk.f32.vlgmr.msra.gmra.mxu1 %vm3076_vm8, %v3058_v20 }
0x10f7   :  { %v3300_v27 = vmul.f32 4.472136, %v3292_v22  ;;  %10089 = vmatprep.mubr.msk.f32.mxu1 %vm10718_vm4, %v10717_v23  ;;  %v11130_v29 = vadd.f32 %v3303_v26, %v3301_v24 }
0x10f9   :  { %v11128_v28 = vadd.f32 %v3302_v25, %v3300_v27 }
0x10fb   :  { %10066 = vmatprep.mubr.msk.f32.mxu0 %vm285_vm3, %v11128_v28 }
0x10fc   :  { %10067 = vmatmul.mubr.msk.f32.vlgmr.msra.gmra.mxu0 %vm285_vm3, %v11130_v29 }
0x10fd   :  { %10070 = vmatpush3.msk.msra.mxu0 %vm292_vm2, %v3395_v8  ;;  %10075 = vmatprep.mubr.msk.f32.mxu0 %vm285_vm3, %v11128_v28  ;;  %v9206_v8 = vld [vmem:[%s11124_s25 + $0x20] sm:$0xff] }
0x10fe   :  { %10071 = vmatprep.subr.mxu0 %v3394_v30 }
0x10ff   :  { %10072 = vmatpush3.msra.mxu0 %v3394_v30 }
0x1100   :  { %10073 = vmatprep.subr.mxu0 %v3393_v31 }
0x1101   :  { %10074 = vmatpush3.msra.mxu0 %v3393_v31 }
0x1102   :  { %10076 = vmatmul.mubr.msk.f32.vlgmr.msra.gmra.mxu0 %vm285_vm3, %v11130_v29  ;;  %10078 = vmatprep.subr.msk.mxu0 %vm292_vm2, %v3476_v32 }
0x1103   :  { %10079 = vmatpush3.msk.msra.mxu0 %vm292_vm2, %v3476_v32  ;;  %10084 = vmatprep.mubr.msk.f32.mxu0 %vm285_vm3, %v11128_v28 }
0x1104   :  { %10080 = vmatprep.subr.mxu0 %v3475_v33 }
0x1105   :  { %10081 = vmatpush3.msra.mxu0 %v3475_v33 }
0x1106   :  { %10082 = vmatprep.subr.mxu0 %v3474_v34 }
0x1107   :  { %10083 = vmatpush3.msra.mxu0 %v3474_v34 }
0x1108   :  { %10085 = vmatmul.mubr.msk.f32.vlgmr.msra.gmra.mxu0 %vm285_vm3, %v11130_v29  ;;  %10097 = vmatprep.subr.mxu0 %v10717_v23 }
0x1109   :  { %10099 = vmatprep.mubr.msk.f32.mxu0 %vm10718_vm4, %v10717_v23 }
0x11b6   :  { %v11165_v39 = vpop.f32.mrf.mxu1 }
0x11b8   :  { %v11167_v40 = vpop.f32.mrf.mxu1 }
0x11bc   :  { %v10068_v35 = vpop.f32.mrf.mxu0 }
0x11be   :  { %v3384_v36 = vpop.f32.mrf.mxu0 }
0x11c2   :  { %v10077_v37 = vpop.f32.mrf.mxu0 }
0x11c4   :  { %v3465_v17 = vpop.f32.mrf.mxu0 }
0x11c5   :  { %10088 = vmatpush3.xpose.msk.msra.mxu1 %vm285_vm3, %v3465_v17 }
0x11c6   :  { %10092 = vmatprep.subr.mxu1 %v10717_v23 }
0x11c8   :  { %v10086_v16 = vpop.f32.mrf.mxu0  ;;  %10090 = vmatmul.mubr.msk.f32.vlgmr.msra.gmra.mxu1 %vm285_vm3, %v3384_v36 }
0x11c9   :  { %10093 = vmatpush3.xpose.msk.msra.mxu1 %vm285_vm3, %v10077_v37  ;;  %10094 = vmatprep.mubr.msk.f32.mxu1 %vm10718_vm4, %v10717_v23 }
0x11ca   :  { %v3546_v38 = vpop.f32.mrf.mxu0  ;;  %10102 = vmatprep.subr.mxu1 %v10717_v23 }
0x11cb   :  { %10098 = vmatpush3.msra.mxu0 %v3546_v38 }
0x11cc   :  { %10095 = vmatmul.mubr.msk.f32.vlgmr.msra.gmra.mxu1 %vm285_vm3, %v10068_v35  ;;  %10107 = vmatprep.subr.msk.mxu0 %vm292_vm2, %v9195_v57 }
0x11cd   :  { %10103 = vmatpush3.msra.mxu1 %v10086_v16  ;;  %10104 = vmatprep.mubr.msk.f32.mxu1 %vm10718_vm4, %v10717_v23 }
0x11ce   :  { %10116 = vmatprep.subr.msk.mxu1 %vm292_vm2, %v9201_v58 }
0x1288   :  { %v3627_v41 = vpop.f32.mrf.mxu1 }
0x1289   :  { %v3707_v42 = vsel %vm685_vm5, %v3627_v41, -inf }
0x128a   :  { %3708 = vmax.xlane.f32.xlu1 %v3707_v42  ;;  %v10091_v43 = vpop.f32.mrf.mxu1  ;;  %v9219_v42 = vld [vmem:[%s11227_s29 + $0x28] sm:$0xf] }
0x128c   :  { %v3703_v44 = vpop.f32.mrf.mxu1 }
0x128d   :  { %v3710_v45 = vsel %vm685_vm5, %v3703_v44, -inf }
0x128e   :  { %3711 = vmax.xlane.f32.xlu0 %v3710_v45  ;;  %v10096_v46 = vpop.f32.mrf.mxu1 }
0x1313   :  { %v3709_v47 = vpop.xlane.xlu1 %3708 }
0x1314   :  { %v3713_v49 = vsub.f32 %v3627_v41, %v3709_v47  ;;  %v3877_v41 = vld [vmem:[%s11227_s29 + $0x10] sm:$0xf] }
0x1316   :  { %v3715_v48 = vmul.f32 1.442695, %v3713_v49  ;;  %v3876_v49 = vld [vmem:[%s11227_s29 + $0x8] sm:$0xff] }
0x1317   :  { %v3712_v50 = vpop.xlane.xlu0 %3711 }
0x1318   :  { %10630 = vpow2.f32 %v3715_v48  ;;  %v3714_v51 = vsub.f32 %v3703_v44, %v3712_v50  ;;  %v3875_v50 = vld [vmem:[%s11227_s29] sm:$0xff] }
0x131a   :  { %v3717_v52 = vmul.f32 1.442695, %v3714_v51  ;;  %v9218_v51 = vld [vmem:[%s11227_s29 + $0x20] sm:$0xff] }
0x131c   :  { %10632 = vpow2.f32 %v3717_v52  ;;  %v9234_v52 = vld [vmem:[%s11101_s10 + $0x40] sm:$0xf] }
0x1325   :  { %v10631_v53 = vpop.eup %10630 }
0x1326   :  { %v3719_v54 = vsel %vm685_vm5, %v10631_v53, 0.0 }
0x1327   :  { %3720 = vadd.xlane.f32.xlu1 %v3719_v54  ;;  %v9232_v54 = vld [vmem:[%s11101_s10 + $0x30] sm:$0xff] }
0x1329   :  { %v10633_v55 = vpop.eup %10632 }
0x132a   :  { %v3722_v56 = vsel %vm685_vm5, %v10633_v55, 0.0 }
0x132b   :  { %3723 = vadd.xlane.f32.xlu0 %v3722_v56  ;;  %v9228_v56 = vld [vmem:[%s11092_s6 + $0x40] sm:$0xf] }
0x13b0   :  { %v3721_v59 = vpop.xlane.xlu1 %3720 }
0x13b1   :  { %10634 = vrcp.f32 %v3721_v59 }
0x13b4   :  { %v3724_v60 = vpop.xlane.xlu0 %3723 }
0x13b5   :  { %10636 = vrcp.f32 %v3724_v60  ;;  %v9227_v60 = vld [vmem:[%s11092_s6 + $0x38] sm:$0xff] }
0x13be   :  { %v10635_v63 = vpop.eup %10634 }
0x13bf   :  { %v3727_v0 = vmul.f32 %v10635_v63, %v10631_v53  ;;  %v9233_v53 = vld [vmem:[%s11101_s10 + $0x38] sm:$0xff] }
0x13c1   :  { %10100 = vmatmul.mubr.msk.f32.vlgmr.msra.gmra.mxu0 %vm685_vm5, %v3727_v0  ;;  %v9226_v0 = vld [vmem:[%s11092_s6 + $0x30] sm:$0xff] }
0x13c2   :  { %v10637_v2 = vpop.eup %10636  ;;  %10108 = vmatpush3.msk.msra.mxu0 %vm292_vm2, %v9195_v57  ;;  %10113 = vmatprep.mubr.msk.f32.mxu0 %vm285_vm3, %v11128_v28 }
0x13c3   :  { %10109 = vmatprep.subr.mxu0 %v9194_v1  ;;  %v3728_v4 = vmul.f32 %v10637_v2, %v10633_v55  ;;  %v9217_v55 = vld [vmem:[%s11227_s29 + $0x18] sm:$0xff]  ;;  %v9240_v2 = vld [vmem:[%s11124_s25 + $0x40] sm:$0xf] }
0x13c4   :  { %10110 = vmatpush3.msra.mxu0 %v9194_v1 }
0x13c5   :  { %10111 = vmatprep.subr.mxu0 %v9193_v3  ;;  %10105 = vmatmul.mubr.msk.f32.vlgmr.msra.gmra.mxu1 %vm685_vm5, %v3728_v4 }
0x13c6   :  { %10112 = vmatpush3.msra.mxu0 %v9193_v3  ;;  %10117 = vmatpush3.msk.msra.mxu1 %vm292_vm2, %v9201_v58  ;;  %v9239_v3 = vld [vmem:[%s11124_s25 + $0x38] sm:$0xff] }
0x13c7   :  { %10114 = vmatmul.mubr.msk.f32.vlgmr.msra.gmra.mxu0 %vm285_vm3, %v11130_v29  ;;  %10118 = vmatprep.subr.mxu1 %v9200_v5 }
0x13c8   :  { %10122 = vmatprep.mubr.msk.f32.mxu1 %vm285_vm3, %v11128_v28  ;;  %10125 = vmatprep.subr.msk.mxu0 %vm292_vm2, %v9207_v6 }
0x13c9   :  { %10119 = vmatpush3.msra.mxu1 %v9200_v5  ;;  %10126 = vmatpush3.msk.msra.mxu0 %vm292_vm2, %v9207_v6  ;;  %v9238_v5 = vld [vmem:[%s11124_s25 + $0x30] sm:$0xff] }
0x13ca   :  { %10131 = vmatprep.mubr.msk.f32.mxu0 %vm285_vm3, %v11128_v28  ;;  %10120 = vmatprep.subr.mxu1 %v9199_v7 }
0x13cb   :  { %10127 = vmatprep.subr.mxu0 %v9206_v8  ;;  %10121 = vmatpush3.msra.mxu1 %v9199_v7 }
0x13cc   :  { %10128 = vmatpush3.msra.mxu0 %v9206_v8  ;;  %10123 = vmatmul.mubr.msk.f32.vlgmr.msra.gmra.mxu1 %vm285_vm3, %v11130_v29 }
0x13cd   :  { %10129 = vmatprep.subr.mxu0 %v9205_v9  ;;  %10134 = vmatprep.subr.mxu1 %v10717_v23 }
0x13ce   :  { %10130 = vmatpush3.msra.mxu0 %v9205_v9  ;;  %10136 = vmatprep.mubr.msk.f32.mxu1 %vm10718_vm4, %v10717_v23 }
0x13cf   :  { %10132 = vmatmul.mubr.msk.f32.vlgmr.msra.gmra.mxu0 %vm285_vm3, %v11130_v29  ;;  %10139 = vmatprep.subr.mxu0 %v10717_v23 }
0x13d0   :  { %10141 = vmatprep.mubr.msk.f32.mxu0 %vm10718_vm4, %v10717_v23 }
0x1481   :  { %v3798_v10 = vpop.f32.mrf.mxu0 }
0x1483   :  { %v10101_v11 = vpop.f32.mrf.mxu0 }
0x1485   :  { %v11208_v12 = vpop.f32.mrf.mxu1 }
0x1487   :  { %v10106_v13 = vpop.f32.mrf.mxu1  ;;  %v10115_v14 = vpop.f32.mrf.mxu0 }
0x1489   :  { %v3951_v18 = vpop.f32.mrf.mxu0 }
0x148c   :  { %v10124_v15 = vpop.f32.mrf.mxu1 }
0x148d   :  { %10140 = vmatpush3.xpose.msk.msra.mxu0 %vm285_vm3, %v10124_v15 }
0x148e   :  { %v4033_v19 = vpop.f32.mrf.mxu1  ;;  %10149 = vmatprep.subr.mxu0 %v10717_v23 }
0x148f   :  { %v10133_v20 = vpop.f32.mrf.mxu0  ;;  %10135 = vmatpush3.xpose.msk.msra.mxu1 %vm285_vm3, %v4033_v19 }
0x1490   :  { %10142 = vmatmul.mubr.msk.f32.vlgmr.msra.gmra.mxu0 %vm285_vm3, %v10115_v14  ;;  %10144 = vmatprep.subr.mxu1 %v10717_v23 }
0x1491   :  { %10150 = vmatpush3.msra.mxu0 %v10133_v20  ;;  %10151 = vmatprep.mubr.msk.f32.mxu0 %vm10718_vm4, %v10717_v23  ;;  %v4115_v21 = vpop.f32.mrf.mxu0 }
0x1492   :  { %10137 = vmatmul.mubr.msk.f32.vlgmr.msra.gmra.mxu1 %vm285_vm3, %v3951_v18  ;;  %10163 = vmatprep.subr.msk.mxu0 %vm292_vm2, %v3877_v41 }
0x1493   :  { %10145 = vmatpush3.msra.mxu1 %v4115_v21  ;;  %10146 = vmatprep.mubr.msk.f32.mxu1 %vm10718_vm4, %v10717_v23 }
0x1494   :  { %10154 = vmatprep.subr.msk.mxu1 %vm292_vm2, %v9219_v42 }
0x1550   :  { %v4272_v22 = vpop.f32.mrf.mxu0 }
0x1551   :  { %v4279_v24 = vsel %vm685_vm5, %v4272_v22, -inf }
0x1552   :  { %v4196_v25 = vpop.f32.mrf.mxu1  ;;  %4280 = vmax.xlane.f32.xlu1 %v4279_v24  ;;  %v10143_v26 = vpop.f32.mrf.mxu0 }
0x1553   :  { %v4276_v27 = vsel %vm685_vm5, %v4196_v25, -inf }
0x1554   :  { %4277 = vmax.xlane.f32.xlu0 %v4276_v27  ;;  %v10138_v30 = vpop.f32.mrf.mxu1 }
0x15db   :  { %v4281_v31 = vpop.xlane.xlu1 %4280 }
0x15dc   :  { %v4283_v32 = vsub.f32 %v4272_v22, %v4281_v31 }
0x15dd   :  { %v4278_v33 = vpop.xlane.xlu0 %4277 }
0x15de   :  { %v4286_v34 = vmul.f32 1.442695, %v4283_v32  ;;  %v4282_v35 = vsub.f32 %v4196_v25, %v4278_v33 }
0x15e0   :  { %10638 = vpow2.f32 %v4286_v34  ;;  %v4284_v36 = vmul.f32 1.442695, %v4282_v35  ;;  %v9258_v35 = vld [vmem:[%s11092_s6 + $0x58] sm:$0xf] }
0x15e2   :  { %10640 = vpow2.f32 %v4284_v36  ;;  %v9252_v36 = vld [vmem:[%s11227_s29 + $0x40] sm:$0xf] }
0x15ed   :  { %v10639_v37 = vpop.eup %10638 }
0x15ee   :  { %v4291_v17 = vsel %vm685_vm5, %v10639_v37, 0.0 }
0x15ef   :  { %v10641_v16 = vpop.eup %10640  ;;  %4292 = vadd.xlane.f32.xlu1 %v4291_v17 }
0x15f0   :  { %v4288_v38 = vsel %vm685_vm5, %v10641_v16, 0.0 }
0x15f1   :  { %4289 = vadd.xlane.f32.xlu0 %v4288_v38 }
0x1678   :  { %v4293_v43 = vpop.xlane.xlu1 %4292 }
0x1679   :  { %10642 = vrcp.f32 %v4293_v43 }
0x167a   :  { %v4290_v44 = vpop.xlane.xlu0 %4289 }
0x167b   :  { %10644 = vrcp.f32 %v4290_v44  ;;  %v9256_v44 = vld [vmem:[%s11092_s6 + $0x48] sm:$0xff] }
0x1686   :  { %v10643_v45 = vpop.eup %10642 }
0x1687   :  { %v4297_v46 = vmul.f32 %v10643_v45, %v10639_v37  ;;  %v9251_v45 = vld [vmem:[%s11227_s29 + $0x38] sm:$0xff] }
0x1688   :  { %v10645_v47 = vpop.eup %10644 }
0x1689   :  { %10152 = vmatmul.mubr.msk.f32.vlgmr.msra.gmra.mxu0 %vm685_vm5, %v4297_v46  ;;  %v4296_v48 = vmul.f32 %v10645_v47, %v10641_v16  ;;  %v9270_v46 = vld [vmem:[%s11124_s25 + $0x58] sm:$0xf]  ;;  %v9269_v47 = vld [vmem:[%s11124_s25 + $0x50] sm:$0xff] }
0x168a   :  { %10164 = vmatpush3.msk.msra.mxu0 %vm292_vm2, %v3877_v41  ;;  %10169 = vmatprep.mubr.msk.f32.mxu0 %vm285_vm3, %v3798_v10 }
0x168b   :  { %10165 = vmatprep.subr.mxu0 %v3876_v49  ;;  %10147 = vmatmul.mubr.msk.f32.vlgmr.msra.gmra.mxu1 %vm685_vm5, %v4296_v48  ;;  %v9250_v48 = vld [vmem:[%s11227_s29 + $0x30] sm:$0xff] }
0x168c   :  { %10166 = vmatpush3.msra.mxu0 %v3876_v49  ;;  %10155 = vmatpush3.msk.msra.mxu1 %vm292_vm2, %v9219_v42  ;;  %v9257_v42 = vld [vmem:[%s11092_s6 + $0x50] sm:$0xff]  ;;  %v9268_v49 = vld [vmem:[%s11124_s25 + $0x48] sm:$0xff]  ;;  %s10742_s6 = smov 10   ;;  %s9026_s25 = sld [smem:[%s11749_s0 + %s10746_s22]]  }
0x168d   :  { %10167 = vmatprep.subr.mxu0 %v3875_v50  ;;  %10156 = vmatprep.subr.mxu1 %v9218_v51  ;;  %s11532_s9 = sld [smem:[%s11749_s0 + %s10742_s6]]  }
0x168e   :  { %10168 = vmatpush3.msra.mxu0 %v3875_v50  ;;  %10157 = vmatpush3.msra.mxu1 %v9218_v51  ;;  %v9264_v50 = vld [vmem:[%s11101_s10 + $0x58] sm:$0xf] }
0x168f   :  { %10170 = vmatmul.mubr.msk.f32.vlgmr.msra.gmra.mxu0 %vm285_vm3, %v11208_v12  ;;  %10181 = vmatprep.subr.msk.mxu0 %vm292_vm2, %v9234_v52 }
0x1690   :  { %10182 = vmatpush3.msk.msra.mxu0 %vm292_vm2, %v9234_v52  ;;  %10187 = vmatprep.mubr.msk.f32.mxu0 %vm285_vm3, %v11128_v28 }
0x1691   :  { %10183 = vmatprep.subr.mxu0 %v9233_v53  ;;  %10158 = vmatprep.subr.mxu1 %v9217_v55 }
0x1692   :  { %10184 = vmatpush3.msra.mxu0 %v9233_v53  ;;  %10159 = vmatpush3.msra.mxu1 %v9217_v55 }
0x1693   :  { %10185 = vmatprep.subr.mxu0 %v9232_v54  ;;  %10172 = vmatprep.subr.msk.mxu1 %vm292_vm2, %v9228_v56 }
0x1694   :  { %10186 = vmatpush3.msra.mxu0 %v9232_v54  ;;  %v9263_v54 = vld [vmem:[%s11101_s10 + $0x50] sm:$0xff] }
0x1695   :  { %10188 = vmatmul.mubr.msk.f32.vlgmr.msra.gmra.mxu0 %vm285_vm3, %v11130_v29  ;;  %10199 = vmatprep.subr.mxu0 %v10717_v23 }
0x1696   :  { %10201 = vmatprep.mubr.msk.f32.mxu0 %vm10718_vm4, %v10717_v23 }
0x1749   :  { %v4440_v57 = vpop.f32.mrf.mxu0 }
0x174b   :  { %v4367_v58 = vpop.f32.mrf.mxu1  ;;  %v10153_v59 = vpop.f32.mrf.mxu0 }
0x174c   :  { %10160 = vmatprep.mubr.msk.f32.mxu1 %vm285_vm3, %v4367_v58 }
0x174d   :  { %v10148_v63 = vpop.f32.mrf.mxu1  ;;  %10161 = vmatmul.mubr.msk.f32.vlgmr.msra.gmra.mxu1 %vm285_vm3, %v4440_v57 }
0x174e   :  { %10173 = vmatpush3.msk.msra.mxu1 %vm292_vm2, %v9228_v56  ;;  %10178 = vmatprep.mubr.msk.f32.mxu1 %vm285_vm3, %v11128_v28  ;;  %v9262_v56 = vld [vmem:[%s11101_s10 + $0x48] sm:$0xff]  ;;  %s10743_s10 = smov 7  }
0x174f   :  { %v11265_v1 = vpop.f32.mrf.mxu0  ;;  %10174 = vmatprep.subr.mxu1 %v9227_v60  ;;  %s9013_s13 = sld [smem:[%s11749_s0 + %s10743_s10]]  }
0x1750   :  { %10175 = vmatpush3.msra.mxu1 %v9227_v60 }
0x1751   :  { %10176 = vmatprep.subr.mxu1 %v9226_v0  ;;  %v11269_v4 = vpop.f32.mrf.mxu0 }
0x1752   :  { %10177 = vmatpush3.msra.mxu1 %v9226_v0 }
0x1753   :  { %10179 = vmatmul.mubr.msk.f32.vlgmr.msra.gmra.mxu1 %vm285_vm3, %v11130_v29  ;;  %10190 = vmatprep.subr.msk.mxu1 %vm292_vm2, %v9240_v2 }
0x1754   :  { %10191 = vmatpush3.msk.msra.mxu1 %vm292_vm2, %v9240_v2  ;;  %10196 = vmatprep.mubr.msk.f32.mxu1 %vm285_vm3, %v11128_v28 }
0x1755   :  { %v10189_v6 = vpop.f32.mrf.mxu0  ;;  %10192 = vmatprep.subr.mxu1 %v9239_v3 }
0x1756   :  { %10193 = vmatpush3.msra.mxu1 %v9239_v3 }
0x1757   :  { %v4771_v7 = vpop.f32.mrf.mxu0  ;;  %10194 = vmatprep.subr.mxu1 %v9238_v5 }
0x1758   :  { %10195 = vmatpush3.msra.mxu1 %v9238_v5  ;;  %10200 = vmatpush3.xpose.msk.msra.mxu0 %vm285_vm3, %v4771_v7 }
0x1759   :  { %10197 = vmatmul.mubr.msk.f32.vlgmr.msra.gmra.mxu1 %vm285_vm3, %v11130_v29  ;;  %10204 = vmatprep.subr.mxu1 %v10717_v23 }
0x175a   :  { %10205 = vmatpush3.xpose.msk.msra.mxu1 %vm285_vm3, %v10189_v6  ;;  %10206 = vmatprep.mubr.msk.f32.mxu1 %vm10718_vm4, %v10717_v23 }
0x175b   :  { %10214 = vmatprep.subr.mxu1 %v10717_v23  ;;  %10209 = vmatprep.subr.mxu0 %v10717_v23 }
0x180d   :  { %v11287_v8 = vpop.f32.mrf.mxu1 }
0x180e   :  { %v4613_v57 = vadd.f32 %v11265_v1, %v11287_v8 }
0x180f   :  { %v11289_v9 = vpop.f32.mrf.mxu1 }
0x1810   :  { %v4608_v59 = vadd.f32 %v11269_v4, %v11289_v9 }
0x1813   :  { %v10180_v10 = vpop.f32.mrf.mxu1 }
0x1814   :  { %10207 = vmatmul.mubr.msk.f32.vlgmr.msra.gmra.mxu1 %vm285_vm3, %v10180_v10 }
0x1815   :  { %v4689_v11 = vpop.f32.mrf.mxu1  ;;  %10216 = vmatprep.mubr.msk.f32.mxu1 %vm10718_vm4, %v10717_v23 }
0x1816   :  { %10202 = vmatmul.mubr.msk.f32.vlgmr.msra.gmra.mxu0 %vm285_vm3, %v4689_v11 }
0x1817   :  { %10211 = vmatprep.mubr.msk.f32.mxu0 %vm10718_vm4, %v10717_v23 }
0x1819   :  { %v10198_v12 = vpop.f32.mrf.mxu1 }
0x181a   :  { %10215 = vmatpush3.msra.mxu1 %v10198_v12 }
0x181b   :  { %v4853_v13 = vpop.f32.mrf.mxu1  ;;  %10228 = vmatprep.subr.msk.mxu1 %vm292_vm2, %v9258_v35 }
0x181c   :  { %10210 = vmatpush3.msra.mxu0 %v4853_v13 }
0x181d   :  { %10219 = vmatprep.subr.msk.mxu0 %vm292_vm2, %v9252_v36 }
0x18d4   :  { %v5010_v14 = vpop.f32.mrf.mxu1 }
0x18d5   :  { %v5017_v15 = vsel %vm685_vm5, %v5010_v14, -inf }
0x18d6   :  { %5018 = vmax.xlane.f32.xlu1 %v5017_v15  ;;  %v4934_v18 = vpop.f32.mrf.mxu0  ;;  %v10208_v19 = vpop.f32.mrf.mxu1 }
0x18d7   :  { %v5014_v20 = vsel %vm685_vm5, %v4934_v18, -inf }
0x18d8   :  { %5015 = vmax.xlane.f32.xlu0 %v5014_v20  ;;  %v10203_v21 = vpop.f32.mrf.mxu0 }
0x18d9   :  { %v9169_v21 = vld [vmem:[%s9038_s3] ss:$0 sm:$0xff]  ;;  %s9021_s3 = sld [smem:[%s11749_s0 + %s10748_s30]]  }
0x195f   :  { %v5019_v22 = vpop.xlane.xlu1 %5018 }
0x1960   :  { %v5021_v24 = vsub.f32 %v5010_v14, %v5019_v22  ;;  %v3155_v22 = vadd.f32 %v11165_v39, %v9169_v21 }
0x1961   :  { %v5016_v25 = vpop.xlane.xlu0 %5015 }
0x1962   :  { %v5024_v26 = vmul.f32 1.442695, %v5021_v24  ;;  %v5020_v27 = vsub.f32 %v4934_v18, %v5016_v25  ;;  %v3150_v24 = vadd.f32 %v9169_v21, %v11167_v40  ;;  %v9282_v40 = vld [vmem:[%s11227_s29 + $0x58] sm:$0xf] }
0x1964   :  { %10646 = vpow2.f32 %v5024_v26  ;;  %v5022_v30 = vmul.f32 1.442695, %v5020_v27  ;;  %v3159_v27 = vadd.f32 %v3155_v22, %v11081_v62 }
0x1966   :  { %10648 = vpow2.f32 %v5022_v30 }
0x1971   :  { %v10647_v31 = vpop.eup %10646 }
0x1972   :  { %v5029_v32 = vsel %vm685_vm5, %v10647_v31, 0.0 }
0x1973   :  { %v10649_v33 = vpop.eup %10648  ;;  %5030 = vadd.xlane.f32.xlu1 %v5029_v32  ;;  %v3158_v32 = vadd.f32 %v3150_v24, %v11079_v61  ;;  %v9172_v24 = vld [vmem:[%s9042_s15] ss:$0 sm:$0xff]  ;;  %s9043_s15 = sld [smem:[%s11749_s0 + %s10751_s12]]  }
0x1974   :  { %v5026_v34 = vsel %vm685_vm5, %v10649_v33, 0.0 }
0x1975   :  { %5027 = vadd.xlane.f32.xlu0 %v5026_v34  ;;  %v3160_v39 = vsel %vm285_vm3, %v3158_v32, 0.0 }
0x19fc   :  { %v5031_v37 = vpop.xlane.xlu1 %5030 }
0x19fd   :  { %10650 = vrcp.f32 %v5031_v37 }
0x19fe   :  { %v5028_v17 = vpop.xlane.xlu0 %5027 }
0x19ff   :  { %10652 = vrcp.f32 %v5028_v17  ;;  %v9281_v17 = vld [vmem:[%s11227_s29 + $0x50] sm:$0xff] }
0x1a0a   :  { %v10651_v16 = vpop.eup %10650 }
0x1a0b   :  { %v5035_v38 = vmul.f32 %v10651_v16, %v10647_v31  ;;  %v9280_v16 = vld [vmem:[%s11227_s29 + $0x48] sm:$0xff]  ;;  %s9019_s29 = sld [smem:[%s11749_s0 + %s10747_s26]]  }
0x1a0c   :  { %v10653_v41 = vpop.eup %10652 }
0x1a0d   :  { %10217 = vmatmul.mubr.msk.f32.vlgmr.msra.gmra.mxu1 %vm685_vm5, %v5035_v38  ;;  %v5034_v43 = vmul.f32 %v10653_v41, %v10649_v33  ;;  %v3163_v33 = vsel %vm285_vm3, %v3159_v27, 0.0 }
0x1a0e   :  { %10229 = vmatpush3.msk.msra.mxu1 %vm292_vm2, %v9258_v35  ;;  %10234 = vmatprep.mubr.msk.f32.mxu1 %vm285_vm3, %v11128_v28 }
0x1a0f   :  { %10230 = vmatprep.subr.mxu1 %v9257_v42  ;;  %10212 = vmatmul.mubr.msk.f32.vlgmr.msra.gmra.mxu0 %vm685_vm5, %v5034_v43 }
0x1a10   :  { %10231 = vmatpush3.msra.mxu1 %v9257_v42  ;;  %10220 = vmatpush3.msk.msra.mxu0 %vm292_vm2, %v9252_v36 }
0x1a11   :  { %10232 = vmatprep.subr.mxu1 %v9256_v44  ;;  %10221 = vmatprep.subr.mxu0 %v9251_v45 }
0x1a12   :  { %10233 = vmatpush3.msra.mxu1 %v9256_v44  ;;  %10222 = vmatpush3.msra.mxu0 %v9251_v45 }
0x1a13   :  { %10235 = vmatmul.mubr.msk.f32.vlgmr.msra.gmra.mxu1 %vm285_vm3, %v11130_v29  ;;  %10246 = vmatprep.subr.msk.mxu1 %vm292_vm2, %v9270_v46 }
0x1a14   :  { %10247 = vmatpush3.msk.msra.mxu1 %vm292_vm2, %v9270_v46  ;;  %10252 = vmatprep.mubr.msk.f32.mxu1 %vm285_vm3, %v11128_v28 }
0x1a15   :  { %10248 = vmatprep.subr.mxu1 %v9269_v47  ;;  %10223 = vmatprep.subr.mxu0 %v9250_v48 }
0x1a16   :  { %10249 = vmatpush3.msra.mxu1 %v9269_v47  ;;  %10224 = vmatpush3.msra.mxu0 %v9250_v48 }
0x1a17   :  { %10250 = vmatprep.subr.mxu1 %v9268_v49  ;;  %10237 = vmatprep.subr.msk.mxu0 %vm292_vm2, %v9264_v50 }
0x1a18   :  { %10251 = vmatpush3.msra.mxu1 %v9268_v49  ;;  %v9286_v49 = vld [vmem:[%s9008_s7] ss:$0 sm:$0xff]  ;;  %s9022_s7 = sld [smem:[%s11749_s0 + %s10749_s4]]  }
0x1a19   :  { %10253 = vmatmul.mubr.msk.f32.vlgmr.msra.gmra.mxu1 %vm285_vm3, %v11130_v29  ;;  %10260 = vmatprep.subr.mxu1 %v10717_v23 }
0x1a1a   :  { %10262 = vmatprep.mubr.msk.f32.mxu1 %vm10718_vm4, %v10717_v23 }
0x1acd   :  { %v5178_v51 = vpop.f32.mrf.mxu1 }
0x1acf   :  { %v5105_v52 = vpop.f32.mrf.mxu0  ;;  %v10218_v53 = vpop.f32.mrf.mxu1 }
0x1ad0   :  { %10225 = vmatprep.mubr.msk.f32.mxu0 %vm285_vm3, %v5105_v52 }
0x1ad1   :  { %v10213_v55 = vpop.f32.mrf.mxu0  ;;  %10226 = vmatmul.mubr.msk.f32.vlgmr.msra.gmra.mxu0 %vm285_vm3, %v5178_v51 }
0x1ad2   :  { %10238 = vmatpush3.msk.msra.mxu0 %vm292_vm2, %v9264_v50  ;;  %10243 = vmatprep.mubr.msk.f32.mxu0 %vm285_vm3, %v11128_v28 }
0x1ad3   :  { %10239 = vmatprep.subr.mxu0 %v9263_v54  ;;  %v10236_v63 = vpop.f32.mrf.mxu1 }
0x1ad4   :  { %10240 = vmatpush3.msra.mxu0 %v9263_v54 }
0x1ad5   :  { %10241 = vmatprep.subr.mxu0 %v9262_v56  ;;  %v5345_v3 = vpop.f32.mrf.mxu1 }
0x1ad6   :  { %10242 = vmatpush3.msra.mxu0 %v9262_v56 }
0x1ad7   :  { %10244 = vmatmul.mubr.msk.f32.vlgmr.msra.gmra.mxu0 %vm285_vm3, %v11130_v29  ;;  %10255 = vmatprep.subr.mxu0 %v10717_v23 }
0x1ad8   :  { %10257 = vmatprep.mubr.msk.f32.mxu0 %vm10718_vm4, %v10717_v23 }
0x1ad9   :  { %v10254_v6 = vpop.f32.mrf.mxu1 }
0x1adb   :  { %v5509_v1 = vpop.f32.mrf.mxu1 }
0x1b91   :  { %v10227_v58 = vpop.f32.mrf.mxu0 }
0x1b92   :  { %v11347_v60 = vadd.f32 %v10227_v58, %v4613_v57 }
0x1b93   :  { %v5261_v0 = vpop.f32.mrf.mxu0 }
0x1b94   :  { %v11349_v2 = vadd.f32 %v5261_v0, %v4608_v59 }
0x1b97   :  { %v10245_v5 = vpop.f32.mrf.mxu0 }
0x1b98   :  { %10261 = vmatpush3.xpose.msk.msra.mxu1 %vm285_vm3, %v10245_v5 }
0x1b99   :  { %v5427_v7 = vpop.f32.mrf.mxu0  ;;  %10270 = vmatprep.subr.mxu1 %v10717_v23 }
0x1b9a   :  { %10256 = vmatpush3.xpose.msk.msra.mxu0 %vm285_vm3, %v5427_v7 }
0x1b9b   :  { %10263 = vmatmul.mubr.msk.f32.vlgmr.msra.gmra.mxu1 %vm285_vm3, %v10236_v63  ;;  %10265 = vmatprep.subr.mxu0 %v10717_v23 }
0x1b9c   :  { %10271 = vmatpush3.msra.mxu1 %v10254_v6  ;;  %10272 = vmatprep.mubr.msk.f32.mxu1 %vm10718_vm4, %v10717_v23 }
0x1b9d   :  { %10258 = vmatmul.mubr.msk.f32.vlgmr.msra.gmra.mxu0 %vm285_vm3, %v5345_v3 }
0x1b9e   :  { %10266 = vmatpush3.msra.mxu0 %v5509_v1  ;;  %10267 = vmatprep.mubr.msk.f32.mxu0 %vm10718_vm4, %v10717_v23 }
0x1b9f   :  { %10275 = vmatprep.subr.msk.mxu0 %vm292_vm2, %v9282_v40 }
0x1c5b   :  { %v5666_v4 = vpop.f32.mrf.mxu1 }
0x1c5c   :  { %v5673_v8 = vsel %vm685_vm5, %v5666_v4, -inf }
0x1c5d   :  { %5674 = vmax.xlane.f32.xlu1 %v5673_v8  ;;  %v5590_v9 = vpop.f32.mrf.mxu0  ;;  %v10264_v10 = vpop.f32.mrf.mxu1 }
0x1c5e   :  { %v5670_v11 = vsel %vm685_vm5, %v5590_v9, -inf }
0x1c5f   :  { %5671 = vmax.xlane.f32.xlu0 %v5670_v11  ;;  %v10259_v12 = vpop.f32.mrf.mxu0 }
0x1ce6   :  { %v5675_v13 = vpop.xlane.xlu1 %5674 }
0x1ce7   :  { %v5677_v14 = vsub.f32 %v5666_v4, %v5675_v13 }
0x1ce8   :  { %v5672_v15 = vpop.xlane.xlu0 %5671 }
0x1ce9   :  { %v5680_v18 = vmul.f32 1.442695, %v5677_v14  ;;  %v5676_v19 = vsub.f32 %v5590_v9, %v5672_v15 }
0x1ceb   :  { %10654 = vpow2.f32 %v5680_v18  ;;  %v5678_v20 = vmul.f32 1.442695, %v5676_v19 }
0x1ced   :  { %10656 = vpow2.f32 %v5678_v20 }
0x1cf8   :  { %v10655_v25 = vpop.eup %10654 }
0x1cf9   :  { %v5685_v26 = vsel %vm685_vm5, %v10655_v25, 0.0 }
0x1cfa   :  { %v10657_v30 = vpop.eup %10656  ;;  %5686 = vadd.xlane.f32.xlu1 %v5685_v26 }
0x1cfb   :  { %v5682_v31 = vsel %vm685_vm5, %v10657_v30, 0.0 }
0x1cfc   :  { %5683 = vadd.xlane.f32.xlu0 %v5682_v31  ;;  %v9173_v31 = vld [vmem:[%s9036_s19] ss:$0 sm:$0xff]  ;;  %s9027_s19 = sld [smem:[%s11749_s0 + %s10752_s16]]  }
0x1cfe   :  { %3164 = vadd.xlane.f32.xlu1 %v3163_v33 }
0x1d00   :  { %3161 = vadd.xlane.f32.xlu0 %v3160_v39 }
0x1d83   :  { %v5687_v34 = vpop.xlane.xlu1 %5686 }
0x1d84   :  { %10658 = vrcp.f32 %v5687_v34  ;;  %v5984_v34 = vld [vmem:[%s11422_s23 + $0x8] sm:$0xff] }
0x1d85   :  { %v5684_v62 = vpop.xlane.xlu0 %5683 }
0x1d86   :  { %10660 = vrcp.f32 %v5684_v62  ;;  %v5983_v62 = vld [vmem:[%s11422_s23] sm:$0xff] }
0x1d87   :  { %v3165_v44 = vpop.xlane.xlu1 %3164 }
0x1d88   :  { %v3167_v46 = vmul.f32 0.05, %v3165_v44 }
0x1d89   :  { %v3162_v45 = vpop.xlane.xlu0 %3161 }
0x1d8a   :  { %v3166_v48 = vmul.f32 0.05, %v3162_v45  ;;  %v3169_v52 = vsub.f32 %v3159_v27, %v3167_v46 }
0x1d8c   :  { %v3168_v55 = vsub.f32 %v3158_v32, %v3166_v48  ;;  %v3171_v63 = vmul.f32 %v3169_v52, %v3169_v52 }
0x1d8e   :  { %v3170_v3 = vmul.f32 %v3168_v55, %v3168_v55 }
0x1d90   :  { %v3172_v5 = vsel %vm285_vm3, %v3170_v3, 0.0 }
0x1d91   :  { %v10659_v35 = vpop.eup %10658 }
0x1d92   :  { %v5691_v36 = vmul.f32 %v10659_v35, %v10655_v25  ;;  %v6159_v35 = vld [vmem:[%s11432_s27 + $0x10] sm:$0xf] }
0x1d93   :  { %v10661_v37 = vpop.eup %10660 }
0x1d94   :  { %10273 = vmatmul.mubr.msk.f32.vlgmr.msra.gmra.mxu1 %vm685_vm5, %v5691_v36  ;;  %v5690_v61 = vmul.f32 %v10661_v37, %v10657_v30 }
0x1d96   :  { %10268 = vmatmul.mubr.msk.f32.vlgmr.msra.gmra.mxu0 %vm685_vm5, %v5690_v61 }
0x1d97   :  { %10276 = vmatpush3.msk.msra.mxu0 %vm292_vm2, %v9282_v40  ;;  %v5985_v40 = vld [vmem:[%s11422_s23 + $0x10] sm:$0xf] }
0x1d98   :  { %10277 = vmatprep.subr.mxu0 %v9281_v17  ;;  %10284 = vmatprep.subr.msk.mxu1 %vm292_vm2, %v5985_v40 }
0x1d99   :  { %10278 = vmatpush3.msra.mxu0 %v9281_v17  ;;  %10285 = vmatpush3.msk.msra.mxu1 %vm292_vm2, %v5985_v40 }
0x1d9a   :  { %10279 = vmatprep.subr.mxu0 %v9280_v16  ;;  %10286 = vmatprep.subr.mxu1 %v5984_v34 }
0x1d9b   :  { %10280 = vmatpush3.msra.mxu0 %v9280_v16  ;;  %10287 = vmatpush3.msra.mxu1 %v5984_v34 }
0x1d9c   :  { %10288 = vmatprep.subr.mxu1 %v5983_v62 }
0x1d9d   :  { %10289 = vmatpush3.msra.mxu1 %v5983_v62 }
0x1d9e   :  { %10302 = vmatprep.subr.msk.mxu1 %vm292_vm2, %v6159_v35 }
0x1e54   :  { %v5834_v38 = vpop.f32.mrf.mxu1 }
0x1e56   :  { %v5761_v41 = vpop.f32.mrf.mxu0  ;;  %v10274_v42 = vpop.f32.mrf.mxu1 }
0x1e57   :  { %10281 = vmatprep.mubr.msk.f32.mxu0 %vm285_vm3, %v5761_v41 }
0x1e58   :  { %v10269_v43 = vpop.f32.mrf.mxu0  ;;  %10282 = vmatmul.mubr.msk.f32.vlgmr.msra.gmra.mxu0 %vm285_vm3, %v5834_v38 }
0x1e59   :  { %v9287_v43 = vld [vmem:[%s9025_s1] ss:$0 sm:$0xff] }
0x1f18   :  { %v10283_v47 = vpop.f32.mrf.mxu0 }
0x1f19   :  { %v5927_v50 = vadd.f32 %v10283_v47, %v11347_v60  ;;  %v3175_v60 = vsel %vm285_vm3, %v3171_v63, 0.0 }
0x1f1a   :  { %v5917_v51 = vpop.f32.mrf.mxu0 }
0x1f1b   :  { %v5936_v53 = vadd.f32 %v9286_v49, %v5927_v50  ;;  %v5926_v54 = vadd.f32 %v5917_v51, %v11349_v2  ;;  %v6070_v2 = vld [vmem:[%s11397_s11] sm:$0xff]  ;;  %v6158_v51 = vld [vmem:[%s11432_s27 + $0x8] sm:$0xff] }
0x1f1d   :  { %v5935_v56 = vadd.f32 %v9286_v49, %v5926_v54  ;;  %v5938_v57 = vadd.f32 %v5936_v53, %v11130_v29  ;;  %v6071_v29 = vld [vmem:[%s11397_s11 + $0x8] sm:$0xff]  ;;  %v9288_v49 = vld [vmem:[%s9018_s5] ss:$0 sm:$0xff] }
0x1f1f   :  { %v5942_v58 = vsel %vm285_vm3, %v5938_v57, 0.0  ;;  %v5937_v59 = vadd.f32 %v5935_v56, %v11128_v28  ;;  %v6072_v28 = vld [vmem:[%s11397_s11 + $0x10] sm:$0xf] }
0x1f20   :  { %5943 = vadd.xlane.f32.xlu1 %v5942_v58  ;;  %10293 = vmatprep.subr.msk.mxu0 %vm292_vm2, %v6072_v28 }
0x1f21   :  { %v5939_v0 = vsel %vm285_vm3, %v5937_v59, 0.0  ;;  %10294 = vmatpush3.msk.msra.mxu0 %vm292_vm2, %v6072_v28 }
0x1f22   :  { %5940 = vadd.xlane.f32.xlu0 %v5939_v0  ;;  %10295 = vmatprep.subr.mxu0 %v6071_v29 }
0x1f23   :  { %10296 = vmatpush3.msra.mxu0 %v6071_v29 }
0x1f24   :  { %3176 = vadd.xlane.f32.xlu1 %v3175_v60  ;;  %10297 = vmatprep.subr.mxu0 %v6070_v2 }
0x1f25   :  { %10298 = vmatpush3.msra.mxu0 %v6070_v2 }
0x1f26   :  { %3173 = vadd.xlane.f32.xlu0 %v3172_v5  ;;  %10311 = vmatprep.subr.mxu0 %v10717_v23 }
0x1fa9   :  { %v5944_v6 = vpop.xlane.xlu1 %5943 }
0x1faa   :  { %v5946_v7 = vmul.f32 0.05, %v5944_v6 }
0x1fab   :  { %v5941_v1 = vpop.xlane.xlu0 %5940 }
0x1fac   :  { %v5948_v4 = vsub.f32 %v5938_v57, %v5946_v7  ;;  %v5945_v8 = vmul.f32 0.05, %v5941_v1 }
0x1fad   :  { %v3177_v9 = vpop.xlane.xlu1 %3176 }
0x1fae   :  { %v5947_v10 = vsub.f32 %v5937_v59, %v5945_v8  ;;  %v3179_v11 = vmul.f32 0.05, %v3177_v9  ;;  %v5950_v12 = vmul.f32 %v5948_v4, %v5948_v4 }
0x1faf   :  { %v3174_v13 = vpop.xlane.xlu0 %3173 }
0x1fb0   :  { %v3181_v14 = vadd.f32 1e-05, %v3179_v11  ;;  %v3178_v15 = vmul.f32 0.05, %v3174_v13  ;;  %v5954_v18 = vsel %vm285_vm3, %v5950_v12, 0.0  ;;  %v5949_v19 = vmul.f32 %v5947_v10, %v5947_v10 }
0x1fb1   :  { %5955 = vadd.xlane.f32.xlu1 %v5954_v18  ;;  %v9312_v11 = vld [vmem:[%s11397_s11 + $0x28] sm:$0xf] }
0x1fb2   :  { %10662 = vrsqrt.f32 %v3181_v14  ;;  %v3180_v20 = vadd.f32 1e-05, %v3178_v15  ;;  %v5951_v21 = vsel %vm285_vm3, %v5949_v19, 0.0  ;;  %v9306_v12 = vld [vmem:[%s11422_s23 + $0x28] sm:$0xf] }
0x1fb3   :  { %5952 = vadd.xlane.f32.xlu0 %v5951_v21 }
0x1fb4   :  { %10664 = vrsqrt.f32 %v3180_v20  ;;  %v9311_v20 = vld [vmem:[%s11397_s11 + $0x20] sm:$0xff] }
0x1fbf   :  { %v10663_v22 = vpop.eup %10662 }
0x1fc0   :  { %v3185_v25 = vmul.f32 %v10663_v22, %v3169_v52  ;;  %v6157_v52 = vld [vmem:[%s11432_s27] sm:$0xff] }
0x1fc1   :  { %v10665_v26 = vpop.eup %10664  ;;  %v9305_v22 = vld [vmem:[%s11422_s23 + $0x20] sm:$0xff] }
0x1fc2   :  { %v3184_v27 = vmul.f32 %v10665_v26, %v3168_v55  ;;  %v3194_v30 = vmul.f32 %v9172_v24, %v3185_v25  ;;  %v9304_v25 = vld [vmem:[%s11422_s23 + $0x18] sm:$0xff]  ;;  %v9318_v26 = vld [vmem:[%s11432_s27 + $0x28] sm:$0xf] }
0x1fc4   :  { %v3193_v32 = vmul.f32 %v9172_v24, %v3184_v27  ;;  %v11415_v39 = vadd.f32 %v9173_v31, %v3194_v30  ;;  %v9310_v24 = vld [vmem:[%s11397_s11 + $0x18] sm:$0xff]  ;;  %v9317_v27 = vld [vmem:[%s11432_s27 + $0x20] sm:$0xff] }
0x1fc5   :  { %v9316_v30 = vld [vmem:[%s11432_s27 + $0x18] sm:$0xff] }
0x1fc6   :  { %v11413_v33 = vadd.f32 %v9173_v31, %v3193_v32 }
0x1fc8   :  { %10299 = vmatprep.mubr.msk.f32.mxu0 %vm285_vm3, %v11413_v33 }
0x1fc9   :  { %10300 = vmatmul.mubr.msk.f32.vlgmr.msra.gmra.mxu0 %vm285_vm3, %v11415_v39 }
0x1fca   :  { %10313 = vmatprep.mubr.msk.f32.mxu0 %vm10718_vm4, %v10717_v23 }
0x203a   :  { %v5956_v36 = vpop.xlane.xlu1 %5955 }
0x203b   :  { %v5958_v37 = vmul.f32 0.05, %v5956_v36 }
0x203c   :  { %v5953_v61 = vpop.xlane.xlu0 %5952 }
0x203d   :  { %v5960_v17 = vadd.f32 1e-05, %v5958_v37  ;;  %v5957_v16 = vmul.f32 0.05, %v5953_v61 }
0x203f   :  { %10666 = vrsqrt.f32 %v5960_v17  ;;  %v5959_v38 = vadd.f32 1e-05, %v5957_v16 }
0x2041   :  { %10668 = vrsqrt.f32 %v5959_v38 }
0x204c   :  { %v10667_v41 = vpop.eup %10666 }
0x204d   :  { %v5964_v42 = vmul.f32 %v10667_v41, %v5948_v4 }
0x204e   :  { %v10669_v44 = vpop.eup %10668 }
0x204f   :  { %v5963_v45 = vmul.f32 %v10669_v44, %v5947_v10  ;;  %v5973_v46 = vmul.f32 %v9287_v43, %v5964_v42 }
0x2051   :  { %v5972_v47 = vmul.f32 %v9287_v43, %v5963_v45  ;;  %v11448_v50 = vadd.f32 %v9288_v49, %v5973_v46 }
0x2053   :  { %v11446_v48 = vadd.f32 %v9288_v49, %v5972_v47 }
0x2055   :  { %10290 = vmatprep.mubr.msk.f32.mxu1 %vm285_vm3, %v11446_v48 }
0x2056   :  { %10291 = vmatmul.mubr.msk.f32.vlgmr.msra.gmra.mxu1 %vm285_vm3, %v11448_v50 }
0x2057   :  { %10303 = vmatpush3.msk.msra.mxu1 %vm292_vm2, %v6159_v35  ;;  %10308 = vmatprep.mubr.msk.f32.mxu1 %vm285_vm3, %v11413_v33 }
0x2058   :  { %10304 = vmatprep.subr.mxu1 %v6158_v51 }
0x2059   :  { %10305 = vmatpush3.msra.mxu1 %v6158_v51 }
0x205a   :  { %10306 = vmatprep.subr.mxu1 %v6157_v52 }
0x205b   :  { %10307 = vmatpush3.msra.mxu1 %v6157_v52 }
0x205c   :  { %10309 = vmatmul.mubr.msk.f32.vlgmr.msra.gmra.mxu1 %vm285_vm3, %v11415_v39  ;;  %10316 = vmatprep.subr.mxu1 %v10717_v23 }
0x205d   :  { %10318 = vmatprep.mubr.msk.f32.mxu1 %vm10718_vm4, %v10717_v23 }
0x2089   :  { %v10301_v53 = vpop.f32.mrf.mxu0 }
0x208a   :  { %10317 = vmatpush3.xpose.msk.msra.mxu1 %vm285_vm3, %v10301_v53 }
0x208b   :  { %v6148_v54 = vpop.f32.mrf.mxu0  ;;  %10326 = vmatprep.subr.mxu1 %v10717_v23 }
0x208c   :  { %10312 = vmatpush3.xpose.msk.msra.mxu0 %vm285_vm3, %v6148_v54 }
0x208d   :  { %10321 = vmatprep.subr.mxu0 %v10717_v23 }
0x2116   :  { %v10292_v55 = vpop.f32.mrf.mxu1 }
0x2117   :  { %10319 = vmatmul.mubr.msk.f32.vlgmr.msra.gmra.mxu1 %vm285_vm3, %v10292_v55 }
0x2118   :  { %v6061_v56 = vpop.f32.mrf.mxu1  ;;  %10328 = vmatprep.mubr.msk.f32.mxu1 %vm10718_vm4, %v10717_v23 }
0x2119   :  { %10314 = vmatmul.mubr.msk.f32.vlgmr.msra.gmra.mxu0 %vm285_vm3, %v6061_v56 }
0x211a   :  { %10323 = vmatprep.mubr.msk.f32.mxu0 %vm10718_vm4, %v10717_v23 }
0x211c   :  { %v10310_v57 = vpop.f32.mrf.mxu1 }
0x211d   :  { %10327 = vmatpush3.msra.mxu1 %v10310_v57  ;;  %v6560_v57 = vld [vmem:[%s11532_s9 + $0x10] sm:$0xf] }
0x211e   :  { %v6229_v58 = vpop.f32.mrf.mxu1  ;;  %10340 = vmatprep.subr.msk.mxu1 %vm292_vm2, %v9312_v11 }
0x211f   :  { %10322 = vmatpush3.msra.mxu0 %v6229_v58  ;;  %v9330_v58 = vld [vmem:[%s11532_s9 + $0x28] sm:$0xf] }
0x2120   :  { %10331 = vmatprep.subr.msk.mxu0 %vm292_vm2, %v9306_v12 }
0x21d7   :  { %v6386_v59 = vpop.f32.mrf.mxu1 }
0x21d8   :  { %v6393_v63 = vsel %vm685_vm5, %v6386_v59, -inf }
0x21d9   :  { %v6310_v0 = vpop.f32.mrf.mxu0  ;;  %6394 = vmax.xlane.f32.xlu0 %v6393_v63  ;;  %v10320_v3 = vpop.f32.mrf.mxu1 }
0x21da   :  { %v6390_v60 = vsel %vm685_vm5, %v6310_v0, -inf }
0x21db   :  { %6391 = vmax.xlane.f32.xlu1 %v6390_v60  ;;  %v10315_v5 = vpop.f32.mrf.mxu0 }
0x21dc   :  { %v6559_v5 = vld [vmem:[%s11532_s9 + $0x8] sm:$0xff] }
0x2262   :  { %v6395_v28 = vpop.xlane.xlu0 %6394 }
0x2263   :  { %v6397_v29 = vsub.f32 %v6386_v59, %v6395_v28 }
0x2264   :  { %v6392_v2 = vpop.xlane.xlu1 %6391 }
0x2265   :  { %v6400_v6 = vmul.f32 1.442695, %v6397_v29  ;;  %v6396_v7 = vsub.f32 %v6310_v0, %v6392_v2  ;;  %v6558_v29 = vld [vmem:[%s11532_s9] sm:$0xff] }
0x2266   :  { %v9329_v2 = vld [vmem:[%s11532_s9 + $0x20] sm:$0xff] }
0x2267   :  { %10670 = vpow2.f32 %v6400_v6  ;;  %v6398_v1 = vmul.f32 1.442695, %v6396_v7  ;;  %v9345_v6 = vld [vmem:[%s11397_s11 + $0x40] sm:$0xf]  ;;  %v9344_v7 = vld [vmem:[%s11397_s11 + $0x38] sm:$0xff] }
0x2269   :  { %10672 = vpow2.f32 %v6398_v1  ;;  %v9343_v1 = vld [vmem:[%s11397_s11 + $0x30] sm:$0xff] }
0x2274   :  { %v10671_v4 = vpop.eup %10670 }
0x2275   :  { %v6405_v8 = vsel %vm685_vm5, %v10671_v4, 0.0 }
0x2276   :  { %v10673_v9 = vpop.eup %10672  ;;  %6406 = vadd.xlane.f32.xlu0 %v6405_v8  ;;  %v9339_v8 = vld [vmem:[%s11422_s23 + $0x40] sm:$0xf] }
0x2277   :  { %v6402_v10 = vsel %vm685_vm5, %v10673_v9, 0.0 }
0x2278   :  { %6403 = vadd.xlane.f32.xlu1 %v6402_v10 }
0x22ff   :  { %v6407_v13 = vpop.xlane.xlu0 %6406 }
0x2300   :  { %10674 = vrcp.f32 %v6407_v13 }
0x2301   :  { %v6404_v14 = vpop.xlane.xlu1 %6403 }
0x2302   :  { %10676 = vrcp.f32 %v6404_v14  ;;  %v9337_v14 = vld [vmem:[%s11422_s23 + $0x30] sm:$0xff] }
0x230d   :  { %v10675_v15 = vpop.eup %10674 }
0x230e   :  { %v6411_v18 = vmul.f32 %v10675_v15, %v10671_v4  ;;  %v9328_v4 = vld [vmem:[%s11532_s9 + $0x18] sm:$0xff] }
0x230f   :  { %v10677_v19 = vpop.eup %10676 }
0x2310   :  { %10329 = vmatmul.mubr.msk.f32.vlgmr.msra.gmra.mxu1 %vm685_vm5, %v6411_v18  ;;  %v6410_v21 = vmul.f32 %v10677_v19, %v10673_v9  ;;  %v9351_v18 = vld [vmem:[%s11432_s27 + $0x40] sm:$0xf]  ;;  %v9350_v19 = vld [vmem:[%s11432_s27 + $0x38] sm:$0xff] }
0x2311   :  { %10341 = vmatpush3.msk.msra.mxu1 %vm292_vm2, %v9312_v11  ;;  %10346 = vmatprep.mubr.msk.f32.mxu1 %vm285_vm3, %v11413_v33 }
0x2312   :  { %10342 = vmatprep.subr.mxu1 %v9311_v20  ;;  %10324 = vmatmul.mubr.msk.f32.vlgmr.msra.gmra.mxu0 %vm685_vm5, %v6410_v21  ;;  %v9349_v21 = vld [vmem:[%s11432_s27 + $0x30] sm:$0xff] }
0x2313   :  { %10332 = vmatpush3.msk.msra.mxu0 %vm292_vm2, %v9306_v12  ;;  %10343 = vmatpush3.msra.mxu1 %v9311_v20  ;;  %v9338_v12 = vld [vmem:[%s11422_s23 + $0x38] sm:$0xff] }
0x2314   :  { %10333 = vmatprep.subr.mxu0 %v9305_v22  ;;  %10337 = vmatprep.mubr.msk.f32.mxu0 %vm285_vm3, %v11446_v48 }
0x2315   :  { %10344 = vmatprep.subr.mxu1 %v9310_v24  ;;  %10334 = vmatpush3.msra.mxu0 %v9305_v22 }
0x2316   :  { %10345 = vmatpush3.msra.mxu1 %v9310_v24  ;;  %10335 = vmatprep.subr.mxu0 %v9304_v25 }
0x2317   :  { %10347 = vmatmul.mubr.msk.f32.vlgmr.msra.gmra.mxu1 %vm285_vm3, %v11415_v39  ;;  %10336 = vmatpush3.msra.mxu0 %v9304_v25 }
0x2318   :  { %10338 = vmatmul.mubr.msk.f32.vlgmr.msra.gmra.mxu0 %vm285_vm3, %v11448_v50  ;;  %10349 = vmatprep.subr.msk.mxu0 %vm292_vm2, %v9318_v26 }
0x2319   :  { %10350 = vmatpush3.msk.msra.mxu0 %vm292_vm2, %v9318_v26  ;;  %10355 = vmatprep.mubr.msk.f32.mxu0 %vm285_vm3, %v11413_v33 }
0x231a   :  { %10351 = vmatprep.subr.mxu0 %v9317_v27  ;;  %10358 = vmatprep.subr.mxu1 %v10717_v23 }
0x231b   :  { %10352 = vmatpush3.msra.mxu0 %v9317_v27  ;;  %10360 = vmatprep.mubr.msk.f32.mxu1 %vm10718_vm4, %v10717_v23 }
0x231c   :  { %10353 = vmatprep.subr.mxu0 %v9316_v30 }
0x231d   :  { %10354 = vmatpush3.msra.mxu0 %v9316_v30 }
0x231e   :  { %10356 = vmatmul.mubr.msk.f32.vlgmr.msra.gmra.mxu0 %vm285_vm3, %v11415_v39  ;;  %10363 = vmatprep.subr.mxu0 %v10717_v23 }
0x231f   :  { %10365 = vmatprep.mubr.msk.f32.mxu0 %vm10718_vm4, %v10717_v23 }
0x23d0   :  { %v11513_v31 = vpop.f32.mrf.mxu1 }
0x23d2   :  { %v6481_v32 = vpop.f32.mrf.mxu0  ;;  %v10330_v40 = vpop.f32.mrf.mxu1 }
0x23d4   :  { %v10325_v34 = vpop.f32.mrf.mxu0 }
0x23d7   :  { %v10348_v62 = vpop.f32.mrf.mxu1 }
0x23d8   :  { %10364 = vmatpush3.xpose.msk.msra.mxu0 %vm285_vm3, %v10348_v62  ;;  %v10339_v35 = vpop.f32.mrf.mxu0 }
0x23d9   :  { %v6716_v36 = vpop.f32.mrf.mxu1  ;;  %10373 = vmatprep.subr.mxu0 %v10717_v23 }
0x23da   :  { %10359 = vmatpush3.xpose.msk.msra.mxu1 %vm285_vm3, %v6716_v36  ;;  %v6634_v37 = vpop.f32.mrf.mxu0 }
0x23db   :  { %10366 = vmatmul.mubr.msk.f32.vlgmr.msra.gmra.mxu0 %vm285_vm3, %v10339_v35  ;;  %10368 = vmatprep.subr.mxu1 %v10717_v23 }
0x23dc   :  { %10375 = vmatprep.mubr.msk.f32.mxu0 %vm10718_vm4, %v10717_v23 }
0x23dd   :  { %10361 = vmatmul.mubr.msk.f32.vlgmr.msra.gmra.mxu1 %vm285_vm3, %v6634_v37 }
0x23de   :  { %v10357_v61 = vpop.f32.mrf.mxu0  ;;  %10370 = vmatprep.mubr.msk.f32.mxu1 %vm10718_vm4, %v10717_v23 }
0x23df   :  { %10374 = vmatpush3.msra.mxu0 %v10357_v61 }
0x23e0   :  { %v6798_v17 = vpop.f32.mrf.mxu0  ;;  %10387 = vmatprep.subr.msk.mxu0 %vm292_vm2, %v6560_v57 }
0x23e1   :  { %10369 = vmatpush3.msra.mxu1 %v6798_v17 }
0x23e2   :  { %10378 = vmatprep.subr.msk.mxu1 %vm292_vm2, %v9330_v58 }
0x249b   :  { %v6955_v16 = vpop.f32.mrf.mxu0 }
0x249c   :  { %v6962_v38 = vsel %vm685_vm5, %v6955_v16, -inf }
0x249d   :  { %6963 = vmax.xlane.f32.xlu1 %v6962_v38  ;;  %v6879_v41 = vpop.f32.mrf.mxu1  ;;  %v10367_v42 = vpop.f32.mrf.mxu0 }
0x249e   :  { %v6959_v43 = vsel %vm685_vm5, %v6879_v41, -inf }
0x249f   :  { %6960 = vmax.xlane.f32.xlu0 %v6959_v43  ;;  %v10362_v44 = vpop.f32.mrf.mxu1 }
0x2526   :  { %v6964_v45 = vpop.xlane.xlu1 %6963 }
0x2527   :  { %v6966_v46 = vsub.f32 %v6955_v16, %v6964_v45 }
0x2528   :  { %v6961_v47 = vpop.xlane.xlu0 %6960 }
0x2529   :  { %v6969_v49 = vmul.f32 1.442695, %v6966_v46  ;;  %v6965_v51 = vsub.f32 %v6879_v41, %v6961_v47  ;;  %v9369_v47 = vld [vmem:[%s11422_s23 + $0x58] sm:$0xf] }
0x252b   :  { %10678 = vpow2.f32 %v6969_v49  ;;  %v6967_v52 = vmul.f32 1.442695, %v6965_v51  ;;  %v9363_v49 = vld [vmem:[%s11532_s9 + $0x40] sm:$0xf] }
0x252d   :  { %10680 = vpow2.f32 %v6967_v52 }
0x2538   :  { %v10679_v53 = vpop.eup %10678 }
0x2539   :  { %v6974_v54 = vsel %vm685_vm5, %v10679_v53, 0.0 }
0x253a   :  { %v10681_v55 = vpop.eup %10680  ;;  %6975 = vadd.xlane.f32.xlu1 %v6974_v54 }
0x253b   :  { %v6971_v56 = vsel %vm685_vm5, %v10681_v55, 0.0 }
0x253c   :  { %6972 = vadd.xlane.f32.xlu0 %v6971_v56  ;;  %v9368_v56 = vld [vmem:[%s11422_s23 + $0x50] sm:$0xff] }
0x25c3   :  { %v6976_v59 = vpop.xlane.xlu1 %6975 }
0x25c4   :  { %10682 = vrcp.f32 %v6976_v59  ;;  %v9362_v59 = vld [vmem:[%s11532_s9 + $0x38] sm:$0xff] }
0x25c5   :  { %v6973_v63 = vpop.xlane.xlu0 %6972 }
0x25c6   :  { %10684 = vrcp.f32 %v6973_v63  ;;  %v9381_v63 = vld [vmem:[%s11432_s27 + $0x58] sm:$0xf] }
0x25d1   :  { %v10683_v0 = vpop.eup %10682 }
0x25d2   :  { %v6980_v3 = vmul.f32 %v10683_v0, %v10679_v53  ;;  %v9380_v0 = vld [vmem:[%s11432_s27 + $0x50] sm:$0xff] }
0x25d3   :  { %v10685_v60 = vpop.eup %10684 }
0x25d4   :  { %10376 = vmatmul.mubr.msk.f32.vlgmr.msra.gmra.mxu0 %vm685_vm5, %v6980_v3  ;;  %v6979_v28 = vmul.f32 %v10685_v60, %v10681_v55  ;;  %v9379_v3 = vld [vmem:[%s11432_s27 + $0x48] sm:$0xff]  ;;  %v9361_v60 = vld [vmem:[%s11532_s9 + $0x30] sm:$0xff]  ;;  %s9049_s27 = sld [smem:[%s11749_s0 + %s10754_s24]]  }
0x25d5   :  { %10388 = vmatpush3.msk.msra.mxu0 %vm292_vm2, %v6560_v57  ;;  %10393 = vmatprep.mubr.msk.f32.mxu0 %vm285_vm3, %v6481_v32 }
0x25d6   :  { %10389 = vmatprep.subr.mxu0 %v6559_v5  ;;  %10371 = vmatmul.mubr.msk.f32.vlgmr.msra.gmra.mxu1 %vm685_vm5, %v6979_v28 }
0x25d7   :  { %10390 = vmatpush3.msra.mxu0 %v6559_v5  ;;  %10379 = vmatpush3.msk.msra.mxu1 %vm292_vm2, %v9330_v58  ;;  %v9367_v58 = vld [vmem:[%s11422_s23 + $0x48] sm:$0xff]  ;;  %v9375_v5 = vld [vmem:[%s11397_s11 + $0x58] sm:$0xf]  ;;  %s9020_s23 = sld [smem:[%s11749_s0 + %s10753_s20]]  }
0x25d8   :  { %10391 = vmatprep.subr.mxu0 %v6558_v29  ;;  %10380 = vmatprep.subr.mxu1 %v9329_v2 }
0x25d9   :  { %10392 = vmatpush3.msra.mxu0 %v6558_v29  ;;  %10381 = vmatpush3.msra.mxu1 %v9329_v2 }
0x25da   :  { %10394 = vmatmul.mubr.msk.f32.vlgmr.msra.gmra.mxu0 %vm285_vm3, %v11513_v31  ;;  %10405 = vmatprep.subr.msk.mxu0 %vm292_vm2, %v9345_v6 }
0x25db   :  { %10406 = vmatpush3.msk.msra.mxu0 %vm292_vm2, %v9345_v6  ;;  %10411 = vmatprep.mubr.msk.f32.mxu0 %vm285_vm3, %v11413_v33  ;;  %v9374_v6 = vld [vmem:[%s11397_s11 + $0x50] sm:$0xff] }
0x25dc   :  { %10407 = vmatprep.subr.mxu0 %v9344_v7  ;;  %10382 = vmatprep.subr.mxu1 %v9328_v4 }
0x25dd   :  { %10408 = vmatpush3.msra.mxu0 %v9344_v7  ;;  %10383 = vmatpush3.msra.mxu1 %v9328_v4 }
0x25de   :  { %10409 = vmatprep.subr.mxu0 %v9343_v1  ;;  %10396 = vmatprep.subr.msk.mxu1 %vm292_vm2, %v9339_v8 }
0x25df   :  { %10410 = vmatpush3.msra.mxu0 %v9343_v1  ;;  %v9373_v1 = vld [vmem:[%s11397_s11 + $0x48] sm:$0xff]  ;;  %s9044_s11 = sld [smem:[%s11749_s0 + %s10750_s8]]  }
0x25e0   :  { %10412 = vmatmul.mubr.msk.f32.vlgmr.msra.gmra.mxu0 %vm285_vm3, %v11415_v39  ;;  %10423 = vmatprep.subr.mxu0 %v10717_v23 }
0x25e1   :  { %10425 = vmatprep.mubr.msk.f32.mxu0 %vm10718_vm4, %v10717_v23 }
0x2694   :  { %v7123_v9 = vpop.f32.mrf.mxu0 }
0x2696   :  { %v7050_v10 = vpop.f32.mrf.mxu1  ;;  %v10377_v11 = vpop.f32.mrf.mxu0 }
0x2697   :  { %10384 = vmatprep.mubr.msk.f32.mxu1 %vm285_vm3, %v7050_v10 }
0x2698   :  { %v10372_v13 = vpop.f32.mrf.mxu1  ;;  %10385 = vmatmul.mubr.msk.f32.vlgmr.msra.gmra.mxu1 %vm285_vm3, %v7123_v9 }
0x2699   :  { %10397 = vmatpush3.msk.msra.mxu1 %vm292_vm2, %v9339_v8  ;;  %10402 = vmatprep.mubr.msk.f32.mxu1 %vm285_vm3, %v11446_v48 }
0x269a   :  { %v11570_v15 = vpop.f32.mrf.mxu0  ;;  %10398 = vmatprep.subr.mxu1 %v9338_v12 }
0x269b   :  { %10399 = vmatpush3.msra.mxu1 %v9338_v12 }
0x269c   :  { %10400 = vmatprep.subr.mxu1 %v9337_v14  ;;  %v11574_v20 = vpop.f32.mrf.mxu0 }
0x269d   :  { %10401 = vmatpush3.msra.mxu1 %v9337_v14 }
0x269e   :  { %10403 = vmatmul.mubr.msk.f32.vlgmr.msra.gmra.mxu1 %vm285_vm3, %v11448_v50  ;;  %10414 = vmatprep.subr.msk.mxu1 %vm292_vm2, %v9351_v18 }
0x269f   :  { %10415 = vmatpush3.msk.msra.mxu1 %vm292_vm2, %v9351_v18  ;;  %10420 = vmatprep.mubr.msk.f32.mxu1 %vm285_vm3, %v11413_v33 }
0x26a0   :  { %v10413_v22 = vpop.f32.mrf.mxu0  ;;  %10416 = vmatprep.subr.mxu1 %v9350_v19 }
0x26a1   :  { %10417 = vmatpush3.msra.mxu1 %v9350_v19 }
0x26a2   :  { %v7454_v24 = vpop.f32.mrf.mxu0  ;;  %10418 = vmatprep.subr.mxu1 %v9349_v21 }
0x26a3   :  { %10419 = vmatpush3.msra.mxu1 %v9349_v21  ;;  %10424 = vmatpush3.xpose.msk.msra.mxu0 %vm285_vm3, %v7454_v24 }
0x26a4   :  { %10421 = vmatmul.mubr.msk.f32.vlgmr.msra.gmra.mxu1 %vm285_vm3, %v11415_v39  ;;  %10428 = vmatprep.subr.mxu1 %v10717_v23 }
0x26a5   :  { %10429 = vmatpush3.xpose.msk.msra.mxu1 %vm285_vm3, %v10413_v22  ;;  %10430 = vmatprep.mubr.msk.f32.mxu1 %vm10718_vm4, %v10717_v23 }
0x26a6   :  { %10438 = vmatprep.subr.mxu1 %v10717_v23  ;;  %10433 = vmatprep.subr.mxu0 %v10717_v23 }
0x2758   :  { %v11592_v25 = vpop.f32.mrf.mxu1 }
0x2759   :  { %v7296_v4 = vadd.f32 %v11570_v15, %v11592_v25 }
0x275a   :  { %v11594_v26 = vpop.f32.mrf.mxu1 }
0x275e   :  { %v10404_v27 = vpop.f32.mrf.mxu1 }
0x275f   :  { %10431 = vmatmul.mubr.msk.f32.vlgmr.msra.gmra.mxu1 %vm285_vm3, %v10404_v27 }
0x2760   :  { %v7372_v30 = vpop.f32.mrf.mxu1  ;;  %10440 = vmatprep.mubr.msk.f32.mxu1 %vm10718_vm4, %v10717_v23 }
0x2761   :  { %10426 = vmatmul.mubr.msk.f32.vlgmr.msra.gmra.mxu0 %vm285_vm3, %v7372_v30 }
0x2762   :  { %10435 = vmatprep.mubr.msk.f32.mxu0 %vm10718_vm4, %v10717_v23 }
0x2764   :  { %v10422_v31 = vpop.f32.mrf.mxu1 }
0x2765   :  { %10439 = vmatpush3.msra.mxu1 %v10422_v31 }
0x2766   :  { %v7536_v32 = vpop.f32.mrf.mxu1  ;;  %10452 = vmatprep.subr.msk.mxu1 %vm292_vm2, %v9369_v47 }
0x2767   :  { %10434 = vmatpush3.msra.mxu0 %v7536_v32 }
0x2768   :  { %10443 = vmatprep.subr.msk.mxu0 %vm292_vm2, %v9363_v49 }
0x281f   :  { %v7693_v40 = vpop.f32.mrf.mxu1 }
0x2820   :  { %v7700_v34 = vsel %vm685_vm5, %v7693_v40, -inf }
0x2821   :  { %v7617_v62 = vpop.f32.mrf.mxu0  ;;  %7701 = vmax.xlane.f32.xlu1 %v7700_v34  ;;  %v10432_v35 = vpop.f32.mrf.mxu1 }
0x2822   :  { %v7697_v36 = vsel %vm685_vm5, %v7617_v62, -inf }
0x2823   :  { %7698 = vmax.xlane.f32.xlu0 %v7697_v36  ;;  %v10427_v37 = vpop.f32.mrf.mxu0  ;;  %v9393_v36 = vld [vmem:[%s11532_s9 + $0x58] sm:$0xf] }
0x28aa   :  { %v7702_v61 = vpop.xlane.xlu1 %7701 }
0x28ab   :  { %v7704_v17 = vsub.f32 %v7693_v40, %v7702_v61 }
0x28ac   :  { %v7699_v16 = vpop.xlane.xlu0 %7698 }
0x28ad   :  { %v7707_v38 = vmul.f32 1.442695, %v7704_v17  ;;  %v7703_v41 = vsub.f32 %v7617_v62, %v7699_v16 }
0x28af   :  { %10686 = vpow2.f32 %v7707_v38  ;;  %v7705_v42 = vmul.f32 1.442695, %v7703_v41 }
0x28b1   :  { %10688 = vpow2.f32 %v7705_v42  ;;  %v9392_v42 = vld [vmem:[%s11532_s9 + $0x50] sm:$0xff] }
0x28bc   :  { %v10687_v43 = vpop.eup %10686 }
0x28bd   :  { %v7712_v44 = vsel %vm685_vm5, %v10687_v43, 0.0 }
0x28be   :  { %v10689_v45 = vpop.eup %10688  ;;  %7713 = vadd.xlane.f32.xlu1 %v7712_v44 }
0x28bf   :  { %v7709_v46 = vsel %vm685_vm5, %v10689_v45, 0.0 }
0x28c0   :  { %7710 = vadd.xlane.f32.xlu0 %v7709_v46 }
0x2947   :  { %v7714_v51 = vpop.xlane.xlu1 %7713 }
0x2948   :  { %10690 = vrcp.f32 %v7714_v51  ;;  %v9397_v51 = vld [vmem:[%s9013_s13] ss:$0 sm:$0xff] }
0x2949   :  { %v7711_v52 = vpop.xlane.xlu0 %7710 }
0x294a   :  { %10692 = vrcp.f32 %v7711_v52 }
0x2955   :  { %v10691_v53 = vpop.eup %10690 }
0x2956   :  { %v7718_v54 = vmul.f32 %v10691_v53, %v10687_v43  ;;  %v9391_v43 = vld [vmem:[%s11532_s9 + $0x48] sm:$0xff] }
0x2957   :  { %v10693_v55 = vpop.eup %10692 }
0x2958   :  { %10441 = vmatmul.mubr.msk.f32.vlgmr.msra.gmra.mxu1 %vm685_vm5, %v7718_v54  ;;  %v7717_v57 = vmul.f32 %v10693_v55, %v10689_v45 }
0x2959   :  { %10453 = vmatpush3.msk.msra.mxu1 %vm292_vm2, %v9369_v47  ;;  %10458 = vmatprep.mubr.msk.f32.mxu1 %vm285_vm3, %v11446_v48 }
0x295a   :  { %10454 = vmatprep.subr.mxu1 %v9368_v56  ;;  %10436 = vmatmul.mubr.msk.f32.vlgmr.msra.gmra.mxu0 %vm685_vm5, %v7717_v57 }
0x295b   :  { %10455 = vmatpush3.msra.mxu1 %v9368_v56  ;;  %10444 = vmatpush3.msk.msra.mxu0 %vm292_vm2, %v9363_v49 }
0x295c   :  { %10456 = vmatprep.subr.mxu1 %v9367_v58  ;;  %10445 = vmatprep.subr.mxu0 %v9362_v59 }
0x295d   :  { %10457 = vmatpush3.msra.mxu1 %v9367_v58  ;;  %10446 = vmatpush3.msra.mxu0 %v9362_v59 }
0x295e   :  { %10459 = vmatmul.mubr.msk.f32.vlgmr.msra.gmra.mxu1 %vm285_vm3, %v11448_v50  ;;  %10470 = vmatprep.subr.msk.mxu1 %vm292_vm2, %v9381_v63 }
0x295f   :  { %10471 = vmatpush3.msk.msra.mxu1 %vm292_vm2, %v9381_v63  ;;  %10476 = vmatprep.mubr.msk.f32.mxu1 %vm285_vm3, %v11413_v33 }
0x2960   :  { %10472 = vmatprep.subr.mxu1 %v9380_v0  ;;  %10447 = vmatprep.subr.mxu0 %v9361_v60 }
0x2961   :  { %10473 = vmatpush3.msra.mxu1 %v9380_v0  ;;  %10448 = vmatpush3.msra.mxu0 %v9361_v60 }
0x2962   :  { %10474 = vmatprep.subr.mxu1 %v9379_v3  ;;  %10461 = vmatprep.subr.msk.mxu0 %vm292_vm2, %v9375_v5 }
0x2963   :  { %10475 = vmatpush3.msra.mxu1 %v9379_v3 }
0x2964   :  { %10477 = vmatmul.mubr.msk.f32.vlgmr.msra.gmra.mxu1 %vm285_vm3, %v11415_v39  ;;  %10484 = vmatprep.subr.mxu1 %v10717_v23 }
0x2965   :  { %10486 = vmatprep.mubr.msk.f32.mxu1 %vm10718_vm4, %v10717_v23 }
0x2a18   :  { %v7861_v28 = vpop.f32.mrf.mxu1 }
0x2a1a   :  { %v7788_v29 = vpop.f32.mrf.mxu0  ;;  %v10442_v2 = vpop.f32.mrf.mxu1 }
0x2a1b   :  { %10449 = vmatprep.mubr.msk.f32.mxu0 %vm285_vm3, %v7788_v29 }
0x2a1c   :  { %v10437_v7 = vpop.f32.mrf.mxu0  ;;  %10450 = vmatmul.mubr.msk.f32.vlgmr.msra.gmra.mxu0 %vm285_vm3, %v7861_v28 }
0x2a1d   :  { %10462 = vmatpush3.msk.msra.mxu0 %vm292_vm2, %v9375_v5  ;;  %10467 = vmatprep.mubr.msk.f32.mxu0 %vm285_vm3, %v11413_v33  ;;  %v7291_v33 = vadd.f32 %v11574_v20, %v11594_v26 }
0x2a1e   :  { %10463 = vmatprep.subr.mxu0 %v9374_v6  ;;  %v10460_v10 = vpop.f32.mrf.mxu1 }
0x2a1f   :  { %10464 = vmatpush3.msra.mxu0 %v9374_v6 }
0x2a20   :  { %10465 = vmatprep.subr.mxu0 %v9373_v1  ;;  %v8028_v13 = vpop.f32.mrf.mxu1 }
0x2a21   :  { %10466 = vmatpush3.msra.mxu0 %v9373_v1  ;;  %v8667_v1 = vld [vmem:[%s9023_s17 + $0x8] sm:$0xff] }
0x2a22   :  { %10468 = vmatmul.mubr.msk.f32.vlgmr.msra.gmra.mxu0 %vm285_vm3, %v11415_v39  ;;  %10479 = vmatprep.subr.mxu0 %v10717_v23 }
0x2a23   :  { %10481 = vmatprep.mubr.msk.f32.mxu0 %vm10718_vm4, %v10717_v23 }
0x2a24   :  { %v10478_v14 = vpop.f32.mrf.mxu1 }
0x2a26   :  { %v8192_v15 = vpop.f32.mrf.mxu1 }
0x2adc   :  { %v10451_v8 = vpop.f32.mrf.mxu0 }
0x2add   :  { %v11652_v9 = vadd.f32 %v10451_v8, %v7296_v4  ;;  %v8666_v4 = vld [vmem:[%s9023_s17] sm:$0xff]  ;;  %v8771_v8 = vld [vmem:[%s11698_s21 + $0x48] sm:$0xff] }
0x2ade   :  { %v7944_v11 = vpop.f32.mrf.mxu0 }
0x2adf   :  { %v11654_v12 = vadd.f32 %v7944_v11, %v7291_v33  ;;  %v8770_v33 = vld [vmem:[%s11698_s21 + $0x40] sm:$0xff]  ;;  %v8767_v11 = vld [vmem:[%s11698_s21 + $0x28] sm:$0xff] }
0x2ae2   :  { %v10469_v39 = vpop.f32.mrf.mxu0 }
0x2ae3   :  { %10485 = vmatpush3.xpose.msk.msra.mxu1 %vm285_vm3, %v10469_v39 }
0x2ae4   :  { %v8110_v18 = vpop.f32.mrf.mxu0  ;;  %10494 = vmatprep.subr.mxu1 %v10717_v23 }
0x2ae5   :  { %10480 = vmatpush3.xpose.msk.msra.mxu0 %vm285_vm3, %v8110_v18 }
0x2ae6   :  { %10487 = vmatmul.mubr.msk.f32.vlgmr.msra.gmra.mxu1 %vm285_vm3, %v10460_v10  ;;  %10489 = vmatprep.subr.mxu0 %v10717_v23  ;;  %v8768_v10 = vld [vmem:[%s11698_s21 + $0x30] sm:$0xff] }
0x2ae7   :  { %10495 = vmatpush3.msra.mxu1 %v10478_v14  ;;  %10496 = vmatprep.mubr.msk.f32.mxu1 %vm10718_vm4, %v10717_v23 }
0x2ae8   :  { %10482 = vmatmul.mubr.msk.f32.vlgmr.msra.gmra.mxu0 %vm285_vm3, %v8028_v13 }
0x2ae9   :  { %10490 = vmatpush3.msra.mxu0 %v8192_v15  ;;  %10491 = vmatprep.mubr.msk.f32.mxu0 %vm10718_vm4, %v10717_v23 }
0x2aea   :  { %10499 = vmatprep.subr.msk.mxu0 %vm292_vm2, %v9393_v36 }
0x2ba6   :  { %v8349_v19 = vpop.f32.mrf.mxu1 }
0x2ba7   :  { %v8356_v20 = vsel %vm685_vm5, %v8349_v19, -inf }
0x2ba8   :  { %v8273_v21 = vpop.f32.mrf.mxu0  ;;  %8357 = vmax.xlane.f32.xlu1 %v8356_v20  ;;  %v10488_v22 = vpop.f32.mrf.mxu1 }
0x2ba9   :  { %v8353_v24 = vsel %vm685_vm5, %v8273_v21, -inf  ;;  %v9398_v22 = vld [vmem:[%s9026_s25] ss:$0 sm:$0xff] }
0x2baa   :  { %8354 = vmax.xlane.f32.xlu0 %v8353_v24  ;;  %v10483_v25 = vpop.f32.mrf.mxu0 }
0x2c31   :  { %v8358_v26 = vpop.xlane.xlu1 %8357 }
0x2c32   :  { %v8360_v27 = vsub.f32 %v8349_v19, %v8358_v26 }
0x2c33   :  { %v8355_v30 = vpop.xlane.xlu0 %8354 }
0x2c34   :  { %v8363_v31 = vmul.f32 1.442695, %v8360_v27  ;;  %v8359_v32 = vsub.f32 %v8273_v21, %v8355_v30  ;;  %v9399_v30 = vld [vmem:[%s9019_s29] ss:$0 sm:$0xff] }
0x2c36   :  { %10694 = vpow2.f32 %v8363_v31  ;;  %v8361_v40 = vmul.f32 1.442695, %v8359_v32 }
0x2c38   :  { %10696 = vpow2.f32 %v8361_v40  ;;  %v8765_v40 = vld [vmem:[%s11698_s21 + $0x18] sm:$0xff] }
0x2c43   :  { %v10695_v23 = vpop.eup %10694 }
0x2c44   :  { %v8368_v34 = vsel %vm685_vm5, %v10695_v23, 0.0 }
0x2c45   :  { %v10697_v62 = vpop.eup %10696  ;;  %8369 = vadd.xlane.f32.xlu1 %v8368_v34  ;;  %v8763_v34 = vld [vmem:[%s11698_s21 + $0x8] sm:$0xff] }
0x2c46   :  { %v8365_v35 = vsel %vm685_vm5, %v10697_v62, 0.0 }
0x2c47   :  { %8366 = vadd.xlane.f32.xlu0 %v8365_v35  ;;  %v9400_v35 = vld [vmem:[%s9021_s3] ss:$0 sm:$0xff] }
0x2cce   :  { %v8370_v37 = vpop.xlane.xlu1 %8369 }
0x2ccf   :  { %10698 = vrcp.f32 %v8370_v37 }
0x2cd0   :  { %v8367_v61 = vpop.xlane.xlu0 %8366 }
0x2cd1   :  { %10700 = vrcp.f32 %v8367_v61 }
0x2cdc   :  { %v10699_v17 = vpop.eup %10698 }
0x2cdd   :  { %v8374_v16 = vmul.f32 %v10699_v17, %v10695_v23  ;;  %v8764_v23 = vld [vmem:[%s11698_s21 + $0x10] sm:$0xff] }
0x2cde   :  { %v10701_v38 = vpop.eup %10700 }
0x2cdf   :  { %10497 = vmatmul.mubr.msk.f32.vlgmr.msra.gmra.mxu1 %vm685_vm5, %v8374_v16  ;;  %v8373_v41 = vmul.f32 %v10701_v38, %v10697_v62  ;;  %v8762_v62 = vld [vmem:[%s11698_s21] sm:$0xff] }
0x2ce1   :  { %10492 = vmatmul.mubr.msk.f32.vlgmr.msra.gmra.mxu0 %vm685_vm5, %v8373_v41  ;;  %v9404_v41 = vld [vmem:[%s9022_s7] ss:$0 sm:$0xff] }
0x2ce2   :  { %10500 = vmatpush3.msk.msra.mxu0 %vm292_vm2, %v9393_v36 }
0x2ce3   :  { %10501 = vmatprep.subr.mxu0 %v9392_v42 }
0x2ce4   :  { %10502 = vmatpush3.msra.mxu0 %v9392_v42 }
0x2ce5   :  { %10503 = vmatprep.subr.mxu0 %v9391_v43 }
0x2ce6   :  { %10504 = vmatpush3.msra.mxu0 %v9391_v43 }
0x2ce7   :  { %10517 = vmatprep.subr.mxu0 %v8771_v8 }
0x2d9f   :  { %v8517_v44 = vpop.f32.mrf.mxu1 }
0x2da1   :  { %v8444_v45 = vpop.f32.mrf.mxu0  ;;  %v10498_v46 = vpop.f32.mrf.mxu1 }
0x2da2   :  { %10505 = vmatprep.mubr.msk.f32.mxu0 %vm285_vm3, %v8444_v45 }
0x2da3   :  { %v10493_v47 = vpop.f32.mrf.mxu0  ;;  %10506 = vmatmul.mubr.msk.f32.vlgmr.msra.gmra.mxu0 %vm285_vm3, %v8517_v44 }
0x2da4   :  { %10518 = vmatpush3.msra.mxu0 %v8771_v8  ;;  %v9407_v8 = vld [vmem:[%s9027_s19] ss:$0 sm:$0xff] }
0x2da5   :  { %10519 = vmatprep.subr.mxu0 %v8770_v33 }
0x2da6   :  { %10520 = vmatpush3.msra.mxu0 %v8770_v33 }
0x2e63   :  { %v10507_v49 = vpop.f32.mrf.mxu0 }
0x2e64   :  { %v8610_v52 = vadd.f32 %v10507_v49, %v11652_v9  ;;  %v8769_v9 = vld [vmem:[%s11698_s21 + $0x38] sm:$0xff] }
0x2e65   :  { %v8600_v53 = vpop.f32.mrf.mxu0  ;;  %10521 = vmatprep.subr.mxu0 %v8769_v9 }
0x2e66   :  { %v8619_v54 = vadd.f32 %v9397_v51, %v8610_v52  ;;  %v8609_v55 = vadd.f32 %v8600_v53, %v11654_v12  ;;  %10522 = vmatpush3.msra.mxu0 %v8769_v9  ;;  %v8766_v12 = vld [vmem:[%s11698_s21 + $0x20] sm:$0xff] }
0x2e67   :  { %10523 = vmatprep.subr.mxu0 %v8768_v10 }
0x2e68   :  { %v8618_v56 = vadd.f32 %v9397_v51, %v8609_v55  ;;  %v8621_v57 = vadd.f32 %v8619_v54, %v11448_v50  ;;  %10524 = vmatpush3.msra.mxu0 %v8768_v10 }
0x2e69   :  { %10525 = vmatprep.subr.mxu0 %v8767_v11 }
0x2e6a   :  { %v8625_v58 = vsel %vm285_vm3, %v8621_v57, 0.0  ;;  %v8620_v59 = vadd.f32 %v8618_v56, %v11446_v48  ;;  %v8668_v48 = vld [vmem:[%s9023_s17 + $0x10] sm:$0xf]  ;;  %10526 = vmatpush3.msra.mxu0 %v8767_v11 }
0x2e6b   :  { %8626 = vadd.xlane.f32.xlu1 %v8625_v58  ;;  %10508 = vmatprep.subr.msk.mxu1 %vm292_vm2, %v8668_v48 }
0x2e6c   :  { %v8622_v63 = vsel %vm285_vm3, %v8620_v59, 0.0  ;;  %10509 = vmatpush3.msk.msra.mxu1 %vm292_vm2, %v8668_v48  ;;  %10527 = vmatprep.subr.mxu0 %v8766_v12 }
0x2e6d   :  { %8623 = vadd.xlane.f32.xlu0 %v8622_v63  ;;  %10510 = vmatprep.subr.mxu1 %v8667_v1 }
0x2e6e   :  { %10511 = vmatpush3.msra.mxu1 %v8667_v1  ;;  %10528 = vmatpush3.msra.mxu0 %v8766_v12  ;;  %v9408_v12 = vld [vmem:[%s9020_s23] ss:$0 sm:$0xff] }
0x2e6f   :  { %10512 = vmatprep.subr.mxu1 %v8666_v4  ;;  %10529 = vmatprep.subr.mxu0 %v8765_v40 }
0x2e70   :  { %10513 = vmatpush3.msra.mxu1 %v8666_v4  ;;  %10530 = vmatpush3.msra.mxu0 %v8765_v40 }
0x2e71   :  { %10531 = vmatprep.subr.mxu0 %v8764_v23 }
0x2e72   :  { %10532 = vmatpush3.msra.mxu0 %v8764_v23 }
0x2e73   :  { %10533 = vmatprep.subr.mxu0 %v8763_v34 }
0x2e74   :  { %10534 = vmatpush3.msra.mxu0 %v8763_v34 }
0x2e75   :  { %10535 = vmatprep.subr.mxu0 %v8762_v62 }
0x2e76   :  { %10536 = vmatpush3.msra.mxu0 %v8762_v62 }
0x2ef4   :  { %v8627_v0 = vpop.xlane.xlu1 %8626 }
0x2ef5   :  { %v8629_v3 = vmul.f32 0.05, %v8627_v0 }
0x2ef6   :  { %v8624_v60 = vpop.xlane.xlu0 %8623 }
0x2ef7   :  { %v8631_v5 = vsub.f32 %v8621_v57, %v8629_v3  ;;  %v8628_v28 = vmul.f32 0.05, %v8624_v60  ;;  %v8908_v3 = vld [vmem:[%s9044_s11 + $0x10] sm:$0xf]  ;;  %v8907_v60 = vld [vmem:[%s9044_s11 + $0x8] sm:$0xff] }
0x2ef8   :  { %10540 = vmatprep.subr.msk.mxu1 %vm292_vm2, %v8908_v3 }
0x2ef9   :  { %v8630_v29 = vsub.f32 %v8620_v59, %v8628_v28  ;;  %v8633_v2 = vmul.f32 %v8631_v5, %v8631_v5  ;;  %v92_v28 = vstv %s9043_s15 }
0x2efa   :  { %93 = vst [vmem:[#allocation2] sm:$0x1] %v92_v28 }
0x2efb   :  { %v8637_v6 = vsel %vm285_vm3, %v8633_v2, 0.0  ;;  %v8632_v7 = vmul.f32 %v8630_v29, %v8630_v29 }
0x2efc   :  { %8638 = vadd.xlane.f32.xlu1 %v8637_v6 }
0x2efd   :  { %v8634_v50 = vsel %vm285_vm3, %v8632_v7, 0.0 }
0x2efe   :  { %8635 = vadd.xlane.f32.xlu0 %v8634_v50 }
0x2f85   :  { %v8639_v13 = vpop.xlane.xlu1 %8638 }
0x2f86   :  { %v8641_v39 = vmul.f32 0.05, %v8639_v13 }
0x2f87   :  { %v8636_v14 = vpop.xlane.xlu0 %8635 }
0x2f88   :  { %v8643_v18 = vadd.f32 1e-05, %v8641_v39  ;;  %v8640_v15 = vmul.f32 0.05, %v8636_v14  ;;  %v9409_v14 = vld [vmem:[#allocation2] ss:$0 sm:$0xff] }
0x2f8a   :  { %10702 = vrsqrt.f32 %v8643_v18  ;;  %v8642_v19 = vadd.f32 1e-05, %v8640_v15 }
0x2f8c   :  { %10704 = vrsqrt.f32 %v8642_v19 }
0x2f97   :  { %v10703_v20 = vpop.eup %10702 }
0x2f98   :  { %v8647_v21 = vmul.f32 %v10703_v20, %v8631_v5  ;;  %v8906_v5 = vld [vmem:[%s9044_s11] sm:$0xff] }
0x2f99   :  { %v10705_v24 = vpop.eup %10704 }
0x2f9a   :  { %v8646_v25 = vmul.f32 %v10705_v24, %v8630_v29  ;;  %v8656_v26 = vmul.f32 %v9398_v22, %v8647_v21 }
0x2f9c   :  { %v8655_v27 = vmul.f32 %v9398_v22, %v8646_v25  ;;  %v8665_v32 = vadd.f32 %v9399_v30, %v8656_v26 }
0x2f9e   :  { %v8664_v31 = vadd.f32 %v9399_v30, %v8655_v27 }
0x2fa0   :  { %10514 = vmatprep.mubr.msk.f32.mxu1 %vm285_vm3, %v8664_v31 }
0x2fa1   :  { %10515 = vmatmul.mubr.msk.f32.vlgmr.msra.gmra.mxu1 %vm285_vm3, %v8665_v32 }
0x2fa2   :  { %10541 = vmatpush3.msk.msra.mxu1 %vm292_vm2, %v8908_v3 }
0x2fa3   :  { %10542 = vmatprep.subr.mxu1 %v8907_v60 }
0x2fa4   :  { %10543 = vmatpush3.msra.mxu1 %v8907_v60 }
0x2fa5   :  { %10544 = vmatprep.subr.mxu1 %v8906_v5 }
0x2fa6   :  { %10545 = vmatpush3.msra.mxu1 %v8906_v5 }
0x3061   :  { %v10516_v36 = vpop.f32.mrf.mxu1 }
0x3062   :  { %v8757_v37 = vadd.f32 %v10516_v36, %v9400_v35 }
0x3063   :  { %v8751_v61 = vpop.f32.mrf.mxu1 }
0x3064   :  { %v8752_v17 = vadd.f32 %v9400_v35, %v8751_v61  ;;  %v8761_v38 = vmax.f32 %v8757_v37, 0.0 }
0x3066   :  { %v8760_v16 = vmax.f32 %v8752_v17, 0.0 }
0x3068   :  { %10537 = vmatprep.mubr.msk.f32.mxu0 %vm3076_vm8, %v8760_v16 }
0x3069   :  { %10538 = vmatmul.mubr.msk.f32.vlgmr.msra.gmra.mxu0 %vm3076_vm8, %v8761_v38 }
0x3129   :  { %v10539_v42 = vpop.f32.mrf.mxu0 }
0x312a   :  { %v8857_v43 = vadd.f32 %v10539_v42, %v9404_v41 }
0x312b   :  { %v8851_v44 = vpop.f32.mrf.mxu0 }
0x312c   :  { %v8852_v45 = vadd.f32 %v9404_v41, %v8851_v44  ;;  %v8861_v46 = vadd.f32 %v8857_v43, %v8665_v32 }
0x312e   :  { %v8865_v47 = vsel %vm285_vm3, %v8861_v46, 0.0  ;;  %v8860_v49 = vadd.f32 %v8852_v45, %v8664_v31 }
0x312f   :  { %8866 = vadd.xlane.f32.xlu1 %v8865_v47 }
0x3130   :  { %v8862_v51 = vsel %vm285_vm3, %v8860_v49, 0.0 }
0x3131   :  { %8863 = vadd.xlane.f32.xlu0 %v8862_v51 }
0x31b8   :  { %v8867_v52 = vpop.xlane.xlu1 %8866 }
0x31b9   :  { %v8869_v53 = vmul.f32 0.05, %v8867_v52 }
0x31ba   :  { %v8864_v54 = vpop.xlane.xlu0 %8863 }
0x31bb   :  { %v8871_v55 = vsub.f32 %v8861_v46, %v8869_v53  ;;  %v8868_v56 = vmul.f32 0.05, %v8864_v54 }
0x31bd   :  { %v8870_v57 = vsub.f32 %v8860_v49, %v8868_v56  ;;  %v8873_v58 = vmul.f32 %v8871_v55, %v8871_v55 }
0x31bf   :  { %v8877_v59 = vsel %vm285_vm3, %v8873_v58, 0.0  ;;  %v8872_v63 = vmul.f32 %v8870_v57, %v8870_v57 }
0x31c0   :  { %8878 = vadd.xlane.f32.xlu1 %v8877_v59 }
0x31c1   :  { %v8874_v0 = vsel %vm285_vm3, %v8872_v63, 0.0 }
0x31c2   :  { %8875 = vadd.xlane.f32.xlu0 %v8874_v0 }
0x3249   :  { %v8879_v29 = vpop.xlane.xlu1 %8878 }
0x324a   :  { %v8881_v2 = vmul.f32 0.05, %v8879_v29 }
0x324b   :  { %v8876_v6 = vpop.xlane.xlu0 %8875 }
0x324c   :  { %v8883_v7 = vadd.f32 1e-05, %v8881_v2  ;;  %v8880_v50 = vmul.f32 0.05, %v8876_v6 }
0x324e   :  { %10706 = vrsqrt.f32 %v8883_v7  ;;  %v8882_v48 = vadd.f32 1e-05, %v8880_v50 }
0x3250   :  { %10708 = vrsqrt.f32 %v8882_v48 }
0x325b   :  { %v10707_v1 = vpop.eup %10706 }
0x325c   :  { %v8887_v4 = vmul.f32 %v10707_v1, %v8871_v55 }
0x325d   :  { %v10709_v33 = vpop.eup %10708 }
0x325e   :  { %v8886_v9 = vmul.f32 %v10709_v33, %v8870_v57  ;;  %v8896_v10 = vmul.f32 %v9407_v8, %v8887_v4 }
0x3260   :  { %v8895_v11 = vmul.f32 %v9407_v8, %v8886_v9  ;;  %v8905_v39 = vadd.f32 %v9408_v12, %v8896_v10 }
0x3262   :  { %v8904_v13 = vadd.f32 %v9408_v12, %v8895_v11 }
0x3264   :  { %10546 = vmatprep.mubr.msk.f32.mxu1 %vm285_vm3, %v8904_v13 }
0x3265   :  { %10547 = vmatmul.mubr.msk.f32.vlgmr.msra.gmra.mxu1 %vm285_vm3, %v8905_v39 }
0x3325   :  { %v10548_v18 = vpop.f32.mrf.mxu1 }
0x3326   :  { %v8997_v15 = vadd.f32 %v10548_v18, %v9409_v14 }
0x3327   :  { %v8991_v19 = vpop.f32.mrf.mxu1 }
0x3328   :  { %9002 = vst.msk [vmem:[%s9049_s27 + $0x8] sm:$0xff] %vm9000_vm9, %v8997_v15  ;;  %v8992_v20 = vadd.f32 %v9409_v14, %v8991_v19 }
0x332a   :  { %9001 = vst.msk [vmem:[%s9049_s27] sm:$0xff] %vm9000_vm9, %v8992_v20 }

</bundles_post_ra>
